<compile_context>
chip_gen: v7x
topology: tpu7x:2x2x1
jax: 0.10.0
libtpu: 0.0.40
codegen_flags: <defaults>
</compile_context>

<pallas_src>
import numpy as np
import jax
import jax.numpy as jnp
from jax import lax
from jax.experimental import pallas as pl
from jax.experimental.pallas import tpu as pltpu

# ---------------- config (module defaults) ----------------
NUM_CLASSES = 10
N_MELS = 64          # n_mel_bins
HIDDEN = 32          # hidden_dim
SR = 16000
N_FFT = 400
HOP = 160
N_FREQS = N_FFT // 2 + 1   # 201
FREQ_PAD = 256             # 201 zero-padded to a lane-dense 256
MEL_ROW_BLK = 1024         # STFT-frame rows per grid step in the mel kernel
GP = 128                   # per-gate lane padding: gate g lives in lanes [g*GP, g*GP+H)
OUT_PAD = 128              # lane-dense classifier output (sliced to NUM_CLASSES outside)


def _round_up(x, m):
    return ((x + m - 1) // m) * m


# ======================= Pallas kernels =======================

def mel_db_kernel(frames_ref, dft_ref, fb_ref, out_ref):
    """bf16 windowed-DFT (Hann folded into the DFT matrix, cos|sin fused) ->
       |.|^2 -> mel filterbank (f32) -> AmplitudeToDB."""
    spec = jnp.dot(frames_ref[...], dft_ref[...],
                   preferred_element_type=jnp.float32)          # (R, 2*FREQ_PAD)
    re = spec[:, :FREQ_PAD]
    im = spec[:, FREQ_PAD:]
    power = re * re + im * im                                   # (R, FREQ_PAD) f32
    # TODO(synk): DFT matmul stays bf16 for MXU speed; exact parity with torchaudio's
    # f32 FFT would need an f32 (or split-bf16) DFT matmul.
    mel = jnp.dot(power, fb_ref[...],
                  preferred_element_type=jnp.float32)           # (R, N_MELS) f32 matmul
    # AmplitudeToDB(stype='power', top_db=None): 10*log10(clamp(x, 1e-10))
    out_ref[...] = 10.0 * jnp.log10(jnp.maximum(mel, 1e-10))


def conv_stack_kernel(x_ref, w1_ref, b1_ref, w2_ref, b2_ref, wih_ref, out_ref):
    """Per batch item (grid over B):
       mean/std norm -> Conv1d(k=3,'same')+ReLU -> Conv1d(k=3,'same')+skip+ReLU
       -> GRU input projection (hoisted out of the recurrence) in the gate-major
       128-lane-padded layout consumed directly by the GRU kernel."""
    x = x_ref[0]                                                # (T, C) f32
    T, C = x.shape
    n_el = T * C
    # per-utterance normalization (torch.std is unbiased, +1e-5)
    mean = jnp.sum(jnp.sum(x, axis=1, keepdims=True), axis=0, keepdims=True) / n_el
    diff = x - mean
    var = jnp.sum(jnp.sum(diff * diff, axis=1, keepdims=True),
                  axis=0, keepdims=True) / (n_el - 1)
    xn = diff * (1.0 / (jnp.sqrt(var) + 1e-5))

    zrow = jnp.zeros((1, C), jnp.float32)

    def conv3(inp_bf16, w_ref, b_ref):
        # z[:, d*C:(d+1)*C] = x @ W_tap_d ;  y[t] = z0[t-1] + z1[t] + z2[t+1] + b
        z = jnp.dot(inp_bf16, w_ref[...], preferred_element_type=jnp.float32)
        return (z[:, C:2 * C]
                + jnp.concatenate([zrow, z[:-1, :C]], axis=0)        # tap 0 (x[t-1])
                + jnp.concatenate([z[1:, 2 * C:], zrow], axis=0)     # tap 2 (x[t+1])
                + b_ref[...])

    # TODO(synk): MatchboxNetSkip definition not provided; minimal 2-block
    # Conv1d(64->64,k=3,'same')+ReLU stack with a residual skip on the second block.
    h1 = jnp.maximum(conv3(xn.astype(jnp.bfloat16), w1_ref, b1_ref), 0.0)
    h2 = jnp.maximum(conv3(h1.astype(jnp.bfloat16), w2_ref, b2_ref) + xn, 0.0)
    # hoisted GRU input projection: one (T,64)@(64,384) f32 matmul; gate g occupies
    # lanes [g*128, g*128+32) (all gate slices in the GRU step are tile-aligned).
    out_ref[0] = jnp.dot(h2, wih_ref[...], preferred_element_type=jnp.float32)


def gru_attn_fc_kernel(xg_ref, whh_ref, wa_ref, wf_ref, bf_ref, out_ref,
                       m_scr, l_scr, acc_scr):
    """Per batch item (grid over B, both TCs on v7x): sequential GRU over time
    (x-projections precomputed; ONE fused (1,128)@(128,384) hidden matmul per step),
    with ONLINE-softmax attention pooling carried alongside the recurrence, then the
    final Linear.  No (T,B,H) hidden-state scratch and no second pass."""
    T = xg_ref.shape[1]
    whh = whh_ref[...]                                          # (128, 384) resident
    wa = wa_ref[...]                                            # (1, 128)

    m_scr[...] = jnp.full_like(m_scr, -1e30)
    l_scr[...] = jnp.zeros_like(l_scr)
    acc_scr[...] = jnp.zeros_like(acc_scr)

    def sigmoid(v):                                             # one EUP op per gate
        return 0.5 * (1.0 + jnp.tanh(0.5 * v))

    # TODO(synk): HighwayGRU definition not provided; standard GRU cell recurrence
    # (PyTorch gate order r,z,n); biases are zero per _init_weights and folded out.
    def step(t, h):
        gx = xg_ref[0, pl.ds(t, 1), :]                          # (1, 3*GP)
        gh = jnp.dot(h, whh, preferred_element_type=jnp.float32)
        r = sigmoid(gx[:, :GP] + gh[:, :GP])
        z = sigmoid(gx[:, GP:2 * GP] + gh[:, GP:2 * GP])
        n = jnp.tanh(gx[:, 2 * GP:] + r * gh[:, 2 * GP:])
        hn = (1.0 - z) * n + z * h                              # junk lanes stay 0
        # TODO(synk): AttentionLayer definition not provided; softmax(Linear(h), time)
        # weighted-sum pooling, here as an online softmax (bias is softmax-invariant).
        s = jnp.sum(hn * wa, axis=-1, keepdims=True)            # (1, 1)
        m_new = jnp.maximum(m_scr[...], s)
        alpha = jnp.exp(m_scr[...] - m_new)
        p = jnp.exp(s - m_new)
        l_scr[...] = alpha * l_scr[...] + p
        acc_scr[...] = alpha * acc_scr[...] + p * hn
        m_scr[...] = m_new
        return hn

    h = jnp.zeros((1, GP), jnp.float32)
    if T <= 128:
        for t in range(T):           # full unroll: max LLO scheduling visibility
            h = step(t, h)
    else:
        h = lax.fori_loop(0, T, step, h, unroll=8)

    ctx = acc_scr[...] / l_scr[...]                             # (1, 128)
    # dropout(0.3) is an eval-mode no-op
    out_ref[0] = (jnp.dot(ctx, wf_ref[...], preferred_element_type=jnp.float32)
                  + bf_ref[...])


# ======================= pallas_call wrappers =======================

def mel_db(frames2d, dft, fb, blk):
    r_pad = frames2d.shape[0]
    return pl.pallas_call(
        mel_db_kernel,
        out_shape=jax.ShapeDtypeStruct((r_pad, N_MELS), jnp.float32),
        grid_spec=pltpu.PrefetchScalarGridSpec(
            num_scalar_prefetch=0,
            grid=(r_pad // blk,),
            in_specs=[pl.BlockSpec((blk, N_FFT), lambda i: (i, 0)),
                      pl.BlockSpec((N_FFT, 2 * FREQ_PAD), lambda i: (0, 0)),
                      pl.BlockSpec((FREQ_PAD, N_MELS), lambda i: (0, 0))],
            out_specs=pl.BlockSpec((blk, N_MELS), lambda i: (i, 0)),
        ),
        compiler_params=pltpu.CompilerParams(dimension_semantics=("parallel",)),
    )(frames2d, dft, fb)


def conv_stack(feat, p):
    B, T, C = feat.shape
    return pl.pallas_call(
        conv_stack_kernel,
        out_shape=jax.ShapeDtypeStruct((B, T, 3 * GP), jnp.float32),
        grid_spec=pltpu.PrefetchScalarGridSpec(
            num_scalar_prefetch=0,
            grid=(B,),
            in_specs=[pl.BlockSpec((1, T, C), lambda b: (b, 0, 0)),
                      pl.BlockSpec((C, 3 * C), lambda b: (0, 0)),
                      pl.BlockSpec((1, C), lambda b: (0, 0)),
                      pl.BlockSpec((C, 3 * C), lambda b: (0, 0)),
                      pl.BlockSpec((1, C), lambda b: (0, 0)),
                      pl.BlockSpec((C, 3 * GP), lambda b: (0, 0))],
            out_specs=pl.BlockSpec((1, T, 3 * GP), lambda b: (b, 0, 0)),
        ),
        compiler_params=pltpu.CompilerParams(dimension_semantics=("parallel",)),
    )(feat, p['conv1_w'], p['conv1_b'], p['conv2_w'], p['conv2_b'], p['w_ih'])


def gru_attn_fc(xg, p):
    B, T, _ = xg.shape
    out = pl.pallas_call(
        gru_attn_fc_kernel,
        out_shape=jax.ShapeDtypeStruct((B, 1, OUT_PAD), jnp.float32),
        grid_spec=pltpu.PrefetchScalarGridSpec(
            num_scalar_prefetch=0,
            grid=(B,),
            in_specs=[pl.BlockSpec((1, T, 3 * GP), lambda b: (b, 0, 0)),
                      pl.BlockSpec((GP, 3 * GP), lambda b: (0, 0)),
                      pl.BlockSpec((1, GP), lambda b: (0, 0)),
                      pl.BlockSpec((GP, OUT_PAD), lambda b: (0, 0)),
                      pl.BlockSpec((1, OUT_PAD), lambda b: (0, 0))],
            out_specs=pl.BlockSpec((1, 1, OUT_PAD), lambda b: (b, 0, 0)),
            scratch_shapes=[pltpu.VMEM((1, GP), jnp.float32),
                            pltpu.VMEM((1, GP), jnp.float32),
                            pltpu.VMEM((1, GP), jnp.float32)],
        ),
        compiler_params=pltpu.CompilerParams(dimension_semantics=("parallel",)),
    )(xg, p['w_hh'], p['attn_w'], p['fc_w'], p['fc_b'])
    return out[:, 0, :NUM_CLASSES]


# ======================= constants & parameters =======================

def make_mel_constants():
    n = np.arange(N_FFT)
    k = np.arange(N_FREQS)
    ang = 2.0 * np.pi * np.outer(n, k) / N_FFT
    hann = 0.5 * (1.0 - np.cos(2.0 * np.pi * n / N_FFT))        # periodic Hann
    cos_p = np.zeros((N_FFT, FREQ_PAD), np.float32)
    sin_p = np.zeros((N_FFT, FREQ_PAD), np.float32)
    cos_p[:, :N_FREQS] = np.cos(ang) * hann[:, None]            # window folded in
    sin_p[:, :N_FREQS] = np.sin(ang) * hann[:, None]
    dft = np.concatenate([cos_p, sin_p], axis=1)                # (400, 512)
    # torchaudio melscale_fbanks: HTK mel scale, norm=None; rows padded 201 -> 256
    all_freqs = np.linspace(0.0, SR / 2, N_FREQS)
    hz2mel = lambda f: 2595.0 * np.log10(1.0 + f / 700.0)
    mel2hz = lambda m: 700.0 * (10.0 ** (m / 2595.0) - 1.0)
    m_pts = np.linspace(hz2mel(0.0), hz2mel(SR / 2), N_MELS + 2)
    f_pts = mel2hz(m_pts)
    f_diff = f_pts[1:] - f_pts[:-1]
    slopes = f_pts[None, :] - all_freqs[:, None]
    down = -slopes[:, :-2] / f_diff[:-1]
    up = slopes[:, 2:] / f_diff[1:]
    fb = np.maximum(0.0, np.minimum(down, up)).astype(np.float32)  # (201, 64)
    fb_p = np.zeros((FREQ_PAD, N_MELS), np.float32)
    fb_p[:N_FREQS] = fb
    return jnp.asarray(dft, jnp.bfloat16), jnp.asarray(fb_p, jnp.float32)


def init_params(key):
    ks = jax.random.split(key, 13)

    def uni(k, shape, bound):
        return jax.random.uniform(k, shape, jnp.float32, -bound, bound)

    C, H = N_MELS, HIDDEN
    p = {}
    cb = 1.0 / np.sqrt(3 * C)                     # PyTorch Conv1d default bound
    # conv weights in tap-stacked layout (Cin, 3*Cout), columns [tap0|tap1|tap2]
    p['conv1_w'] = uni(ks[0], (C, 3 * C), cb).astype(jnp.bfloat16)
    p['conv1_b'] = uni(ks[1], (1, C), cb)
    p['conv2_w'] = uni(ks[2], (C, 3 * C), cb).astype(jnp.bfloat16)
    p['conv2_b'] = uni(ks[3], (1, C), cb)
    # GRU: xavier_uniform on (3H, In)/(3H, H) matrices (per _init_weights); biases are
    # zero-initialized and folded out.  Gate-major, 128-lane-padded layout:
    # gate g (r,z,n) occupies columns [g*GP, g*GP + H); w_hh rows H:GP are zero.
    b_ih = np.sqrt(6.0 / (C + 3 * H))
    b_hh = np.sqrt(6.0 / (H + 3 * H))
    w_ih = jnp.zeros((C, 3 * GP), jnp.float32)
    w_hh = jnp.zeros((GP, 3 * GP), jnp.float32)
    for g in range(3):
        w_ih = w_ih.at[:, g * GP:g * GP + H].set(uni(ks[4 + g], (C, H), b_ih))
        w_hh = w_hh.at[:H, g * GP:g * GP + H].set(uni(ks[7 + g], (H, H), b_hh))
    p['w_ih'] = w_ih
    p['w_hh'] = w_hh
    # attention Linear(H, 1); its scalar bias is softmax-invariant and omitted.
    aw = jnp.zeros((1, GP), jnp.float32)
    p['attn_w'] = aw.at[:, :H].set(uni(ks[10], (1, H), 1.0 / np.sqrt(H)))
    # fc2: Linear(H, num_classes), padded to a lane-dense (128, 128) block.
    fw = jnp.zeros((GP, OUT_PAD), jnp.float32)
    p['fc_w'] = fw.at[:H, :NUM_CLASSES].set(uni(ks[11], (H, NUM_CLASSES),
                                                1.0 / np.sqrt(H)))
    fb_ = jnp.zeros((1, OUT_PAD), jnp.float32)
    p['fc_b'] = fb_.at[:, :NUM_CLASSES].set(uni(ks[12], (1, NUM_CLASSES),
                                                1.0 / np.sqrt(H)))
    return p


# ======================= forward pass =======================

def phi_hgru_forward(audio, params, consts):
    dft, fb = consts
    x = audio.astype(jnp.float32)                 # (B, samples); unsqueeze(1) is a no-op
    B, L = x.shape
    # ---- MelSpectrogram framing (XLA glue): center reflect-pad + window gather ----
    # TODO(synk): hop-strided overlapping-window extraction kept outside the kernel
    # (not expressible with a rectangular BlockSpec); the gather, bf16 cast and row
    # pad fuse into one XLA pass, and the Hann window is folded into the DFT matrix.
    pad = N_FFT // 2
    xp = jnp.pad(x, ((0, 0), (pad, pad)), mode='reflect')
    n_frames = 1 + (L // HOP)
    idx = np.arange(n_frames)[:, None] * HOP + np.arange(N_FFT)[None, :]
    rows = B * n_frames
    blk = MEL_ROW_BLK if rows >= MEL_ROW_BLK else _round_up(rows, 8)
    r_pad = _round_up(rows, blk)
    frames2d = xp[:, idx].astype(jnp.bfloat16).reshape(rows, N_FFT)
    frames2d = jnp.pad(frames2d, ((0, r_pad - rows), (0, 0)))
    # ---- Pallas: windowed DFT -> power -> mel -> dB (row-tiled, parallel grid) ----
    mel = mel_db(frames2d, dft, fb, blk)[:rows]   # (rows, 64) f32
    feat = mel.reshape(B, n_frames, N_MELS)       # (B, T, 64)
    # ---- Pallas: normalize + phi(conv1,conv2,skip) + GRU input projection ----
    xg = conv_stack(feat, params)                 # (B, T, 3*128) gate-major padded
    # ---- Pallas: GRU recurrence + online attention + dropout(eval) + fc2 ----
    return gru_attn_fc(xg, params)                # (B, num_classes)


if __name__ == "__main__":
    key = jax.random.PRNGKey(0)
    k_audio, k_params = jax.random.split(key)
    audio = jax.random.normal(k_audio, (2, 1600), jnp.float32)   # (batch, raw samples)
    consts = make_mel_constants()
    params = init_params(k_params)
    fwd = jax.jit(lambda a: phi_hgru_forward(a, params, consts))
    out = fwd(audio)
    jax.block_until_ready(out)
    assert out.shape == (2, NUM_CLASSES) and out.dtype == jnp.float32
    assert bool(jnp.all(jnp.isfinite(out)))
    print("KERNEL_OK")
</pallas_src>

<mosaic_0001>
module attributes {stable_mosaic.version = 11 : i64} {
  func.func @mel_db_kernel(%arg0: i32, %arg1: memref<24x400xbf16, #tpu.memory_space<vmem>>, %arg2: memref<400x512xbf16, #tpu.memory_space<vmem>>, %arg3: memref<256x64xf32, #tpu.memory_space<vmem>>, %arg4: memref<24x64xf32, #tpu.memory_space<vmem>>) attributes {dimension_semantics = [#tpu.dimension_semantics<parallel>], iteration_bounds = array<i64: 1>, scalar_prefetch = 0 : i64, scratch_operands = 0 : i64, tpu.core_type = #tpu.core_type<tc>, window_params = [{transform_indices = @transform_0, window_bounds = array<i64: 24, 400>}, {pipeline_mode = #tpu.pipeline_mode<synchronous>, transform_indices = @transform_1, window_bounds = array<i64: 400, 512>}, {pipeline_mode = #tpu.pipeline_mode<synchronous>, transform_indices = @transform_2, window_bounds = array<i64: 256, 64>}, {transform_indices = @transform_3, window_bounds = array<i64: 24, 64>}]} {
    %c0 = arith.constant 0 : index
    %c0_0 = arith.constant 0 : index
    %0 = vector.load %arg1[%c0, %c0_0] : memref<24x400xbf16, #tpu.memory_space<vmem>>, vector<24x400xbf16>
    %c0_1 = arith.constant 0 : index
    %c0_2 = arith.constant 0 : index
    %1 = vector.load %arg2[%c0_1, %c0_2] : memref<400x512xbf16, #tpu.memory_space<vmem>>, vector<400x512xbf16>
    %cst = arith.constant dense<0.000000e+00> : vector<24x512xf32>
    %2 = tpu.matmul %0, %1, %cst {dimension_numbers = #tpu.dot_dimension_numbers<[1], [0], [0], [1], [0, 0, 1, 1], [], []>} : vector<24x400xbf16>, vector<400x512xbf16>, vector<24x512xf32> -> vector<24x512xf32>
    %3 = vector.extract_strided_slice %2 {offsets = [0, 0], sizes = [24, 256], strides = [1, 1]} : vector<24x512xf32> to vector<24x256xf32>
    %4 = vector.extract_strided_slice %2 {offsets = [0, 256], sizes = [24, 256], strides = [1, 1]} : vector<24x512xf32> to vector<24x256xf32>
    %5 = arith.mulf %3, %3 : vector<24x256xf32>
    %6 = arith.mulf %4, %4 : vector<24x256xf32>
    %7 = arith.addf %5, %6 : vector<24x256xf32>
    %c0_3 = arith.constant 0 : index
    %c0_4 = arith.constant 0 : index
    %8 = vector.load %arg3[%c0_3, %c0_4] : memref<256x64xf32, #tpu.memory_space<vmem>>, vector<256x64xf32>
    %cst_5 = arith.constant dense<0.000000e+00> : vector<24x64xf32>
    %9 = tpu.matmul %7, %8, %cst_5 {dimension_numbers = #tpu.dot_dimension_numbers<[1], [0], [0], [1], [0, 0, 1, 1], [], []>} : vector<24x256xf32>, vector<256x64xf32>, vector<24x64xf32> -> vector<24x64xf32>
    %cst_6 = arith.constant 1.000000e-10 : f32
    %10 = vector.broadcast %cst_6 : f32 to vector<24x64xf32>
    %11 = arith.maximumf %9, %10 : vector<24x64xf32>
    %12 = math.log %11 : vector<24x64xf32>
    %cst_7 = arith.constant 0.434294492 : f32
    %13 = vector.broadcast %cst_7 : f32 to vector<24x64xf32>
    %14 = arith.mulf %12, %13 : vector<24x64xf32>
    %cst_8 = arith.constant 1.000000e+01 : f32
    %15 = vector.broadcast %cst_8 : f32 to vector<24x64xf32>
    %16 = arith.mulf %15, %14 : vector<24x64xf32>
    %c0_9 = arith.constant 0 : index
    %c0_10 = arith.constant 0 : index
    %17 = vector.load %arg4[%c0_9, %c0_10] : memref<24x64xf32, #tpu.memory_space<vmem>>, vector<24x64xf32>
    tpu.vector_store %arg4[%c0_9, %c0_10], %16 {strides = array<i32>} : memref<24x64xf32, #tpu.memory_space<vmem>>, vector<24x64xf32>,
    return
  }
  func.func @transform_0(%arg0: i32) -> (i32, i32) {
    %c0_i32 = arith.constant 0 : i32
    %c0_i32_0 = arith.constant 0 : i32
    return %arg0, %c0_i32 : i32, i32
  }
  func.func @transform_1(%arg0: i32) -> (i32, i32) {
    %c0_i32 = arith.constant 0 : i32
    %c0_i32_0 = arith.constant 0 : i32
    %c0_i32_1 = arith.constant 0 : i32
    return %c0_i32, %c0_i32_0 : i32, i32
  }
  func.func @transform_2(%arg0: i32) -> (i32, i32) {
    %c0_i32 = arith.constant 0 : i32
    %c0_i32_0 = arith.constant 0 : i32
    %c0_i32_1 = arith.constant 0 : i32
    return %c0_i32, %c0_i32_0 : i32, i32
  }
  func.func @transform_3(%arg0: i32) -> (i32, i32) {
    %c0_i32 = arith.constant 0 : i32
    %c0_i32_0 = arith.constant 0 : i32
    return %arg0, %c0_i32 : i32, i32
  }
}

module attributes {stable_mosaic.version = 11 : i64} {
  func.func @conv_stack_kernel(%arg0: i32, %arg1: memref<1x11x64xf32, #tpu.memory_space<vmem>>, %arg2: memref<64x192xbf16, #tpu.memory_space<vmem>>, %arg3: memref<1x64xf32, #tpu.memory_space<vmem>>, %arg4: memref<64x192xbf16, #tpu.memory_space<vmem>>, %arg5: memref<1x64xf32, #tpu.memory_space<vmem>>, %arg6: memref<64x384xf32, #tpu.memory_space<vmem>>, %arg7: memref<1x11x384xf32, #tpu.memory_space<vmem>>) attributes {dimension_semantics = [#tpu.dimension_semantics<parallel>], iteration_bounds = array<i64: 2>, scalar_prefetch = 0 : i64, scratch_operands = 0 : i64, tpu.core_type = #tpu.core_type<tc>, window_params = [{transform_indices = @transform_0, window_bounds = array<i64: 1, 11, 64>}, {pipeline_mode = #tpu.pipeline_mode<synchronous>, transform_indices = @transform_1, window_bounds = array<i64: 64, 192>}, {pipeline_mode = #tpu.pipeline_mode<synchronous>, transform_indices = @transform_2, window_bounds = array<i64: 1, 64>}, {pipeline_mode = #tpu.pipeline_mode<synchronous>, transform_indices = @transform_3, window_bounds = array<i64: 64, 192>}, {pipeline_mode = #tpu.pipeline_mode<synchronous>, transform_indices = @transform_4, window_bounds = array<i64: 1, 64>}, {pipeline_mode = #tpu.pipeline_mode<synchronous>, transform_indices = @transform_5, window_bounds = array<i64: 64, 384>}, {transform_indices = @transform_6, window_bounds = array<i64: 1, 11, 384>}]} {
    %c0 = arith.constant 0 : index
    %c0_0 = arith.constant 0 : index
    %c0_1 = arith.constant 0 : index
    %0 = vector.load %arg1[%c0, %c0_0, %c0_1] : memref<1x11x64xf32, #tpu.memory_space<vmem>>, vector<1x11x64xf32>
    %1 = vector.shape_cast %0 : vector<1x11x64xf32> to vector<11x64xf32>
    %cst = arith.constant dense<0.000000e+00> : vector<11xf32>
    %2 = vector.multi_reduction <add>, %1, %cst [1] : vector<11x64xf32> to vector<11xf32>
    %3 = vector.shape_cast %2 : vector<11xf32> to vector<11x1xf32>
    %cst_2 = arith.constant dense<0.000000e+00> : vector<1xf32>
    %4 = vector.multi_reduction <add>, %3, %cst_2 [0] : vector<11x1xf32> to vector<1xf32>
    %5 = vector.shape_cast %4 : vector<1xf32> to vector<1x1xf32>
    %cst_3 = arith.constant 7.040000e+02 : f32
    %6 = vector.broadcast %cst_3 : f32 to vector<1x1xf32>
    %7 = arith.divf %5, %6 : vector<1x1xf32>
    %8 = vector.broadcast %7 : vector<1x1xf32> to vector<11x64xf32>
    %9 = arith.subf %1, %8 : vector<11x64xf32>
    %10 = arith.mulf %9, %9 : vector<11x64xf32>
    %cst_4 = arith.constant dense<0.000000e+00> : vector<11xf32>
    %11 = vector.multi_reduction <add>, %10, %cst_4 [1] : vector<11x64xf32> to vector<11xf32>
    %12 = vector.shape_cast %11 : vector<11xf32> to vector<11x1xf32>
    %cst_5 = arith.constant dense<0.000000e+00> : vector<1xf32>
    %13 = vector.multi_reduction <add>, %12, %cst_5 [0] : vector<11x1xf32> to vector<1xf32>
    %14 = vector.shape_cast %13 : vector<1xf32> to vector<1x1xf32>
    %cst_6 = arith.constant 7.030000e+02 : f32
    %15 = vector.broadcast %cst_6 : f32 to vector<1x1xf32>
    %16 = arith.divf %14, %15 : vector<1x1xf32>
    %17 = math.sqrt %16 : vector<1x1xf32>
    %cst_7 = arith.constant 9.99999974E-6 : f32
    %18 = vector.broadcast %cst_7 : f32 to vector<1x1xf32>
    %19 = arith.addf %17, %18 : vector<1x1xf32>
    %cst_8 = arith.constant 1.000000e+00 : f32
    %20 = vector.broadcast %cst_8 : f32 to vector<1x1xf32>
    %21 = arith.divf %20, %19 : vector<1x1xf32>
    %22 = vector.broadcast %21 : vector<1x1xf32> to vector<11x64xf32>
    %23 = arith.mulf %9, %22 : vector<11x64xf32>
    %cst_9 = arith.constant 0.000000e+00 : f32
    %24 = vector.broadcast %cst_9 : f32 to vector<1x64xf32>
    %25 = arith.truncf %23 : vector<11x64xf32> to vector<11x64xbf16>
    %c0_10 = arith.constant 0 : index
    %c0_11 = arith.constant 0 : index
    %26 = vector.load %arg2[%c0_10, %c0_11] : memref<64x192xbf16, #tpu.memory_space<vmem>>, vector<64x192xbf16>
    %cst_12 = arith.constant dense<0.000000e+00> : vector<11x192xf32>
    %27 = tpu.matmul %25, %26, %cst_12 {dimension_numbers = #tpu.dot_dimension_numbers<[1], [0], [0], [1], [0, 0, 1, 1], [], []>} : vector<11x64xbf16>, vector<64x192xbf16>, vector<11x192xf32> -> vector<11x192xf32>
    %28 = vector.extract_strided_slice %27 {offsets = [0, 64], sizes = [11, 64], strides = [1, 1]} : vector<11x192xf32> to vector<11x64xf32>
    %29 = vector.extract_strided_slice %27 {offsets = [0, 0], sizes = [10, 64], strides = [1, 1]} : vector<11x192xf32> to vector<10x64xf32>
    %30 = tpu.concatenate %24, %29 in 0 : vector<1x64xf32>, vector<10x64xf32> -> vector<11x64xf32>
    %31 = arith.addf %28, %30 : vector<11x64xf32>
    %32 = vector.extract_strided_slice %27 {offsets = [1, 128], sizes = [10, 64], strides = [1, 1]} : vector<11x192xf32> to vector<10x64xf32>
    %33 = tpu.concatenate %32, %24 in 0 : vector<10x64xf32>, vector<1x64xf32> -> vector<11x64xf32>
    %34 = arith.addf %31, %33 : vector<11x64xf32>
    %c0_13 = arith.constant 0 : index
    %c0_14 = arith.constant 0 : index
    %35 = vector.load %arg3[%c0_13, %c0_14] : memref<1x64xf32, #tpu.memory_space<vmem>>, vector<1x64xf32>
    %36 = vector.broadcast %35 : vector<1x64xf32> to vector<11x64xf32>
    %37 = arith.addf %34, %36 : vector<11x64xf32>
    %cst_15 = arith.constant 0.000000e+00 : f32
    %38 = vector.broadcast %cst_15 : f32 to vector<11x64xf32>
    %39 = arith.maximumf %37, %38 : vector<11x64xf32>
    %40 = arith.truncf %39 : vector<11x64xf32> to vector<11x64xbf16>
    %c0_16 = arith.constant 0 : index
    %c0_17 = arith.constant 0 : index
    %41 = vector.load %arg4[%c0_16, %c0_17] : memref<64x192xbf16, #tpu.memory_space<vmem>>, vector<64x192xbf16>
    %cst_18 = arith.constant dense<0.000000e+00> : vector<11x192xf32>
    %42 = tpu.matmul %40, %41, %cst_18 {dimension_numbers = #tpu.dot_dimension_numbers<[1], [0], [0], [1], [0, 0, 1, 1], [], []>} : vector<11x64xbf16>, vector<64x192xbf16>, vector<11x192xf32> -> vector<11x192xf32>
    %43 = vector.extract_strided_slice %42 {offsets = [0, 64], sizes = [11, 64], strides = [1, 1]} : vector<11x192xf32> to vector<11x64xf32>
    %44 = vector.extract_strided_slice %42 {offsets = [0, 0], sizes = [10, 64], strides = [1, 1]} : vector<11x192xf32> to vector<10x64xf32>
    %45 = tpu.concatenate %24, %44 in 0 : vector<1x64xf32>, vector<10x64xf32> -> vector<11x64xf32>
    %46 = arith.addf %43, %45 : vector<11x64xf32>
    %47 = vector.extract_strided_slice %42 {offsets = [1, 128], sizes = [10, 64], strides = [1, 1]} : vector<11x192xf32> to vector<10x64xf32>
    %48 = tpu.concatenate %47, %24 in 0 : vector<10x64xf32>, vector<1x64xf32> -> vector<11x64xf32>
    %49 = arith.addf %46, %48 : vector<11x64xf32>
    %c0_19 = arith.constant 0 : index
    %c0_20 = arith.constant 0 : index
    %50 = vector.load %arg5[%c0_19, %c0_20] : memref<1x64xf32, #tpu.memory_space<vmem>>, vector<1x64xf32>
    %51 = vector.broadcast %50 : vector<1x64xf32> to vector<11x64xf32>
    %52 = arith.addf %49, %51 : vector<11x64xf32>
    %53 = arith.addf %52, %23 : vector<11x64xf32>
    %cst_21 = arith.constant 0.000000e+00 : f32
    %54 = vector.broadcast %cst_21 : f32 to vector<11x64xf32>
    %55 = arith.maximumf %53, %54 : vector<11x64xf32>
    %c0_22 = arith.constant 0 : index
    %c0_23 = arith.constant 0 : index
    %56 = vector.load %arg6[%c0_22, %c0_23] : memref<64x384xf32, #tpu.memory_space<vmem>>, vector<64x384xf32>
    %cst_24 = arith.constant dense<0.000000e+00> : vector<11x384xf32>
    %57 = tpu.matmul %55, %56, %cst_24 {dimension_numbers = #tpu.dot_dimension_numbers<[1], [0], [0], [1], [0, 0, 1, 1], [], []>} : vector<11x64xf32>, vector<64x384xf32>, vector<11x384xf32> -> vector<11x384xf32>
    %c0_25 = arith.constant 0 : index
    %c0_26 = arith.constant 0 : index
    %c0_27 = arith.constant 0 : index
    %58 = vector.load %arg7[%c0_25, %c0_26, %c0_27] : memref<1x11x384xf32, #tpu.memory_space<vmem>>, vector<1x11x384xf32>
    %59 = vector.shape_cast %58 : vector<1x11x384xf32> to vector<11x384xf32>
    %60 = vector.shape_cast %57 : vector<11x384xf32> to vector<1x11x384xf32>
    tpu.vector_store %arg7[%c0_25, %c0_26, %c0_27], %60 {strides = array<i32>} : memref<1x11x384xf32, #tpu.memory_space<vmem>>, vector<1x11x384xf32>,
    return
  }
  func.func @transform_0(%arg0: i32) -> (i32, i32, i32) {
    %c0_i32 = arith.constant 0 : i32
    %c0_i32_0 = arith.constant 0 : i32
    %c0_i32_1 = arith.constant 0 : i32
    return %arg0, %c0_i32, %c0_i32_0 : i32, i32, i32
  }
  func.func @transform_1(%arg0: i32) -> (i32, i32) {
    %c0_i32 = arith.constant 0 : i32
    %c0_i32_0 = arith.constant 0 : i32
    %c0_i32_1 = arith.constant 0 : i32
    return %c0_i32, %c0_i32_0 : i32, i32
  }
  func.func @transform_2(%arg0: i32) -> (i32, i32) {
    %c0_i32 = arith.constant 0 : i32
    %c0_i32_0 = arith.constant 0 : i32
    %c0_i32_1 = arith.constant 0 : i32
    return %c0_i32, %c0_i32_0 : i32, i32
  }
  func.func @transform_3(%arg0: i32) -> (i32, i32) {
    %c0_i32 = arith.constant 0 : i32
    %c0_i32_0 = arith.constant 0 : i32
    %c0_i32_1 = arith.constant 0 : i32
    return %c0_i32, %c0_i32_0 : i32, i32
  }
  func.func @transform_4(%arg0: i32) -> (i32, i32) {
    %c0_i32 = arith.constant 0 : i32
    %c0_i32_0 = arith.constant 0 : i32
    %c0_i32_1 = arith.constant 0 : i32
    return %c0_i32, %c0_i32_0 : i32, i32
  }
  func.func @transform_5(%arg0: i32) -> (i32, i32) {
    %c0_i32 = arith.constant 0 : i32
    %c0_i32_0 = arith.constant 0 : i32
    %c0_i32_1 = arith.constant 0 : i32
    return %c0_i32, %c0_i32_0 : i32, i32
  }
  func.func @transform_6(%arg0: i32) -> (i32, i32, i32) {
    %c0_i32 = arith.constant 0 : i32
    %c0_i32_0 = arith.constant 0 : i32
    %c0_i32_1 = arith.constant 0 : i32
    return %arg0, %c0_i32, %c0_i32_0 : i32, i32, i32
  }
}

module attributes {stable_mosaic.version = 11 : i64} {
  func.func @gru_attn_fc_kernel(%arg0: i32, %arg1: memref<1x11x384xf32, #tpu.memory_space<vmem>>, %arg2: memref<128x384xf32, #tpu.memory_space<vmem>>, %arg3: memref<1x128xf32, #tpu.memory_space<vmem>>, %arg4: memref<128x128xf32, #tpu.memory_space<vmem>>, %arg5: memref<1x128xf32, #tpu.memory_space<vmem>>, %arg6: memref<1x1x128xf32, #tpu.memory_space<vmem>>, %arg7: memref<1x128xf32, #tpu.memory_space<vmem>>, %arg8: memref<1x128xf32, #tpu.memory_space<vmem>>, %arg9: memref<1x128xf32, #tpu.memory_space<vmem>>) attributes {dimension_semantics = [#tpu.dimension_semantics<parallel>], iteration_bounds = array<i64: 2>, scalar_prefetch = 0 : i64, scratch_operands = 3 : i64, tpu.core_type = #tpu.core_type<tc>, window_params = [{transform_indices = @transform_0, window_bounds = array<i64: 1, 11, 384>}, {pipeline_mode = #tpu.pipeline_mode<synchronous>, transform_indices = @transform_1, window_bounds = array<i64: 128, 384>}, {pipeline_mode = #tpu.pipeline_mode<synchronous>, transform_indices = @transform_2, window_bounds = array<i64: 1, 128>}, {pipeline_mode = #tpu.pipeline_mode<synchronous>, transform_indices = @transform_3, window_bounds = array<i64: 128, 128>}, {pipeline_mode = #tpu.pipeline_mode<synchronous>, transform_indices = @transform_4, window_bounds = array<i64: 1, 128>}, {transform_indices = @transform_5, window_bounds = array<i64: 1, 1, 128>}]} {
    %c0 = arith.constant 0 : index
    %c0_0 = arith.constant 0 : index
    %0 = vector.load %arg2[%c0, %c0_0] : memref<128x384xf32, #tpu.memory_space<vmem>>, vector<128x384xf32>
    %c0_1 = arith.constant 0 : index
    %c0_2 = arith.constant 0 : index
    %1 = vector.load %arg3[%c0_1, %c0_2] : memref<1x128xf32, #tpu.memory_space<vmem>>, vector<1x128xf32>
    %cst = arith.constant -1.000000e+30 : f32
    %2 = vector.broadcast %cst : f32 to vector<1x128xf32>
    %c0_3 = arith.constant 0 : index
    %c0_4 = arith.constant 0 : index
    %3 = vector.load %arg7[%c0_3, %c0_4] : memref<1x128xf32, #tpu.memory_space<vmem>>, vector<1x128xf32>
    tpu.vector_store %arg7[%c0_3, %c0_4], %2 {strides = array<i32>} : memref<1x128xf32, #tpu.memory_space<vmem>>, vector<1x128xf32>,
    %cst_5 = arith.constant 0.000000e+00 : f32
    %4 = vector.broadcast %cst_5 : f32 to vector<1x128xf32>
    %c0_6 = arith.constant 0 : index
    %c0_7 = arith.constant 0 : index
    %5 = vector.load %arg8[%c0_6, %c0_7] : memref<1x128xf32, #tpu.memory_space<vmem>>, vector<1x128xf32>
    tpu.vector_store %arg8[%c0_6, %c0_7], %4 {strides = array<i32>} : memref<1x128xf32, #tpu.memory_space<vmem>>, vector<1x128xf32>,
    %cst_8 = arith.constant 0.000000e+00 : f32
    %6 = vector.broadcast %cst_8 : f32 to vector<1x128xf32>
    %c0_9 = arith.constant 0 : index
    %c0_10 = arith.constant 0 : index
    %7 = vector.load %arg9[%c0_9, %c0_10] : memref<1x128xf32, #tpu.memory_space<vmem>>, vector<1x128xf32>
    tpu.vector_store %arg9[%c0_9, %c0_10], %6 {strides = array<i32>} : memref<1x128xf32, #tpu.memory_space<vmem>>, vector<1x128xf32>,
    %cst_11 = arith.constant 0.000000e+00 : f32
    %8 = vector.broadcast %cst_11 : f32 to vector<1x128xf32>
    %c0_12 = arith.constant 0 : index
    %c0_13 = arith.constant 0 : index
    %c0_14 = arith.constant 0 : index
    %9 = vector.load %arg1[%c0_12, %c0_13, %c0_14] : memref<1x11x384xf32, #tpu.memory_space<vmem>>, vector<1x1x384xf32>
    %10 = vector.shape_cast %9 : vector<1x1x384xf32> to vector<1x384xf32>
    %cst_15 = arith.constant dense<0.000000e+00> : vector<1x384xf32>
    %11 = tpu.matmul %8, %0, %cst_15 {dimension_numbers = #tpu.dot_dimension_numbers<[1], [0], [0], [1], [0, 0, 1, 1], [], []>} : vector<1x128xf32>, vector<128x384xf32>, vector<1x384xf32> -> vector<1x384xf32>
    %12 = vector.extract_strided_slice %10 {offsets = [0, 0], sizes = [1, 128], strides = [1, 1]} : vector<1x384xf32> to vector<1x128xf32>
    %13 = vector.extract_strided_slice %11 {offsets = [0, 0], sizes = [1, 128], strides = [1, 1]} : vector<1x384xf32> to vector<1x128xf32>
    %14 = arith.addf %12, %13 : vector<1x128xf32>
    %cst_16 = arith.constant 5.000000e-01 : f32
    %15 = vector.broadcast %cst_16 : f32 to vector<1x128xf32>
    %16 = arith.mulf %15, %14 : vector<1x128xf32>
    %17 = math.tanh %16 : vector<1x128xf32>
    %cst_17 = arith.constant 1.000000e+00 : f32
    %18 = vector.broadcast %cst_17 : f32 to vector<1x128xf32>
    %19 = arith.addf %18, %17 : vector<1x128xf32>
    %cst_18 = arith.constant 5.000000e-01 : f32
    %20 = vector.broadcast %cst_18 : f32 to vector<1x128xf32>
    %21 = arith.mulf %20, %19 : vector<1x128xf32>
    %22 = vector.extract_strided_slice %10 {offsets = [0, 128], sizes = [1, 128], strides = [1, 1]} : vector<1x384xf32> to vector<1x128xf32>
    %23 = vector.extract_strided_slice %11 {offsets = [0, 128], sizes = [1, 128], strides = [1, 1]} : vector<1x384xf32> to vector<1x128xf32>
    %24 = arith.addf %22, %23 : vector<1x128xf32>
    %cst_19 = arith.constant 5.000000e-01 : f32
    %25 = vector.broadcast %cst_19 : f32 to vector<1x128xf32>
    %26 = arith.mulf %25, %24 : vector<1x128xf32>
    %27 = math.tanh %26 : vector<1x128xf32>
    %cst_20 = arith.constant 1.000000e+00 : f32
    %28 = vector.broadcast %cst_20 : f32 to vector<1x128xf32>
    %29 = arith.addf %28, %27 : vector<1x128xf32>
    %cst_21 = arith.constant 5.000000e-01 : f32
    %30 = vector.broadcast %cst_21 : f32 to vector<1x128xf32>
    %31 = arith.mulf %30, %29 : vector<1x128xf32>
    %32 = vector.extract_strided_slice %10 {offsets = [0, 256], sizes = [1, 128], strides = [1, 1]} : vector<1x384xf32> to vector<1x128xf32>
    %33 = vector.extract_strided_slice %11 {offsets = [0, 256], sizes = [1, 128], strides = [1, 1]} : vector<1x384xf32> to vector<1x128xf32>
    %34 = arith.mulf %21, %33 : vector<1x128xf32>
    %35 = arith.addf %32, %34 : vector<1x128xf32>
    %36 = math.tanh %35 : vector<1x128xf32>
    %cst_22 = arith.constant 1.000000e+00 : f32
    %37 = vector.broadcast %cst_22 : f32 to vector<1x128xf32>
    %38 = arith.subf %37, %31 : vector<1x128xf32>
    %39 = arith.mulf %38, %36 : vector<1x128xf32>
    %40 = arith.mulf %31, %8 : vector<1x128xf32>
    %41 = arith.addf %39, %40 : vector<1x128xf32>
    %42 = arith.mulf %41, %1 : vector<1x128xf32>
    %cst_23 = arith.constant dense<0.000000e+00> : vector<1xf32>
    %43 = vector.multi_reduction <add>, %42, %cst_23 [1] : vector<1x128xf32> to vector<1xf32>
    %44 = vector.shape_cast %43 : vector<1xf32> to vector<1x1xf32>
    %c0_24 = arith.constant 0 : index
    %c0_25 = arith.constant 0 : index
    %45 = vector.load %arg7[%c0_24, %c0_25] : memref<1x128xf32, #tpu.memory_space<vmem>>, vector<1x128xf32>
    %46 = vector.broadcast %44 : vector<1x1xf32> to vector<1x128xf32>
    %47 = arith.maximumf %45, %46 : vector<1x128xf32>
    %c0_26 = arith.constant 0 : index
    %c0_27 = arith.constant 0 : index
    %48 = vector.load %arg7[%c0_26, %c0_27] : memref<1x128xf32, #tpu.memory_space<vmem>>, vector<1x128xf32>
    %49 = arith.subf %48, %47 : vector<1x128xf32>
    %50 = math.exp %49 : vector<1x128xf32>
    %51 = vector.broadcast %44 : vector<1x1xf32> to vector<1x128xf32>
    %52 = arith.subf %51, %47 : vector<1x128xf32>
    %53 = math.exp %52 : vector<1x128xf32>
    %c0_28 = arith.constant 0 : index
    %c0_29 = arith.constant 0 : index
    %54 = vector.load %arg8[%c0_28, %c0_29] : memref<1x128xf32, #tpu.memory_space<vmem>>, vector<1x128xf32>
    %55 = arith.mulf %50, %54 : vector<1x128xf32>
    %56 = arith.addf %55, %53 : vector<1x128xf32>
    %c0_30 = arith.constant 0 : index
    %c0_31 = arith.constant 0 : index
    %57 = vector.load %arg8[%c0_30, %c0_31] : memref<1x128xf32, #tpu.memory_space<vmem>>, vector<1x128xf32>
    tpu.vector_store %arg8[%c0_30, %c0_31], %56 {strides = array<i32>} : memref<1x128xf32, #tpu.memory_space<vmem>>, vector<1x128xf32>,
    %c0_32 = arith.constant 0 : index
    %c0_33 = arith.constant 0 : index
    %58 = vector.load %arg9[%c0_32, %c0_33] : memref<1x128xf32, #tpu.memory_space<vmem>>, vector<1x128xf32>
    %59 = arith.mulf %50, %58 : vector<1x128xf32>
    %60 = arith.mulf %53, %41 : vector<1x128xf32>
    %61 = arith.addf %59, %60 : vector<1x128xf32>
    %c0_34 = arith.constant 0 : index
    %c0_35 = arith.constant 0 : index
    %62 = vector.load %arg9[%c0_34, %c0_35] : memref<1x128xf32, #tpu.memory_space<vmem>>, vector<1x128xf32>
    tpu.vector_store %arg9[%c0_34, %c0_35], %61 {strides = array<i32>} : memref<1x128xf32, #tpu.memory_space<vmem>>, vector<1x128xf32>,
    %c0_36 = arith.constant 0 : index
    %c0_37 = arith.constant 0 : index
    %63 = vector.load %arg7[%c0_36, %c0_37] : memref<1x128xf32, #tpu.memory_space<vmem>>, vector<1x128xf32>
    tpu.vector_store %arg7[%c0_36, %c0_37], %47 {strides = array<i32>} : memref<1x128xf32, #tpu.memory_space<vmem>>, vector<1x128xf32>,
    %c0_38 = arith.constant 0 : index
    %c1 = arith.constant 1 : index
    %c0_39 = arith.constant 0 : index
    %64 = vector.load %arg1[%c0_38, %c1, %c0_39] : memref<1x11x384xf32, #tpu.memory_space<vmem>>, vector<1x1x384xf32>
    %65 = vector.shape_cast %64 : vector<1x1x384xf32> to vector<1x384xf32>
    %cst_40 = arith.constant dense<0.000000e+00> : vector<1x384xf32>
    %66 = tpu.matmul %41, %0, %cst_40 {dimension_numbers = #tpu.dot_dimension_numbers<[1], [0], [0], [1], [0, 0, 1, 1], [], []>} : vector<1x128xf32>, vector<128x384xf32>, vector<1x384xf32> -> vector<1x384xf32>
    %67 = vector.extract_strided_slice %65 {offsets = [0, 0], sizes = [1, 128], strides = [1, 1]} : vector<1x384xf32> to vector<1x128xf32>
    %68 = vector.extract_strided_slice %66 {offsets = [0, 0], sizes = [1, 128], strides = [1, 1]} : vector<1x384xf32> to vector<1x128xf32>
    %69 = arith.addf %67, %68 : vector<1x128xf32>
    %cst_41 = arith.constant 5.000000e-01 : f32
    %70 = vector.broadcast %cst_41 : f32 to vector<1x128xf32>
    %71 = arith.mulf %70, %69 : vector<1x128xf32>
    %72 = math.tanh %71 : vector<1x128xf32>
    %cst_42 = arith.constant 1.000000e+00 : f32
    %73 = vector.broadcast %cst_42 : f32 to vector<1x128xf32>
    %74 = arith.addf %73, %72 : vector<1x128xf32>
    %cst_43 = arith.constant 5.000000e-01 : f32
    %75 = vector.broadcast %cst_43 : f32 to vector<1x128xf32>
    %76 = arith.mulf %75, %74 : vector<1x128xf32>
    %77 = vector.extract_strided_slice %65 {offsets = [0, 128], sizes = [1, 128], strides = [1, 1]} : vector<1x384xf32> to vector<1x128xf32>
    %78 = vector.extract_strided_slice %66 {offsets = [0, 128], sizes = [1, 128], strides = [1, 1]} : vector<1x384xf32> to vector<1x128xf32>
    %79 = arith.addf %77, %78 : vector<1x128xf32>
    %cst_44 = arith.constant 5.000000e-01 : f32
    %80 = vector.broadcast %cst_44 : f32 to vector<1x128xf32>
    %81 = arith.mulf %80, %79 : vector<1x128xf32>
    %82 = math.tanh %81 : vector<1x128xf32>
    %cst_45 = arith.constant 1.000000e+00 : f32
    %83 = vector.broadcast %cst_45 : f32 to vector<1x128xf32>
    %84 = arith.addf %83, %82 : vector<1x128xf32>
    %cst_46 = arith.constant 5.000000e-01 : f32
    %85 = vector.broadcast %cst_46 : f32 to vector<1x128xf32>
    %86 = arith.mulf %85, %84 : vector<1x128xf32>
    %87 = vector.extract_strided_slice %65 {offsets = [0, 256], sizes = [1, 128], strides = [1, 1]} : vector<1x384xf32> to vector<1x128xf32>
    %88 = vector.extract_strided_slice %66 {offsets = [0, 256], sizes = [1, 128], strides = [1, 1]} : vector<1x384xf32> to vector<1x128xf32>
    %89 = arith.mulf %76, %88 : vector<1x128xf32>
    %90 = arith.addf %87, %89 : vector<1x128xf32>
    %91 = math.tanh %90 : vector<1x128xf32>
    %cst_47 = arith.constant 1.000000e+00 : f32
    %92 = vector.broadcast %cst_47 : f32 to vector<1x128xf32>
    %93 = arith.subf %92, %86 : vector<1x128xf32>
    %94 = arith.mulf %93, %91 : vector<1x128xf32>
    %95 = arith.mulf %86, %41 : vector<1x128xf32>
    %96 = arith.addf %94, %95 : vector<1x128xf32>
    %97 = arith.mulf %96, %1 : vector<1x128xf32>
    %cst_48 = arith.constant dense<0.000000e+00> : vector<1xf32>
    %98 = vector.multi_reduction <add>, %97, %cst_48 [1] : vector<1x128xf32> to vector<1xf32>
    %99 = vector.shape_cast %98 : vector<1xf32> to vector<1x1xf32>
    %c0_49 = arith.constant 0 : index
    %c0_50 = arith.constant 0 : index
    %100 = vector.load %arg7[%c0_49, %c0_50] : memref<1x128xf32, #tpu.memory_space<vmem>>, vector<1x128xf32>
    %101 = vector.broadcast %99 : vector<1x1xf32> to vector<1x128xf32>
    %102 = arith.maximumf %100, %101 : vector<1x128xf32>
    %c0_51 = arith.constant 0 : index
    %c0_52 = arith.constant 0 : index
    %103 = vector.load %arg7[%c0_51, %c0_52] : memref<1x128xf32, #tpu.memory_space<vmem>>, vector<1x128xf32>
    %104 = arith.subf %103, %102 : vector<1x128xf32>
    %105 = math.exp %104 : vector<1x128xf32>
    %106 = vector.broadcast %99 : vector<1x1xf32> to vector<1x128xf32>
    %107 = arith.subf %106, %102 : vector<1x128xf32>
    %108 = math.exp %107 : vector<1x128xf32>
    %c0_53 = arith.constant 0 : index
    %c0_54 = arith.constant 0 : index
    %109 = vector.load %arg8[%c0_53, %c0_54] : memref<1x128xf32, #tpu.memory_space<vmem>>, vector<1x128xf32>
    %110 = arith.mulf %105, %109 : vector<1x128xf32>
    %111 = arith.addf %110, %108 : vector<1x128xf32>
    %c0_55 = arith.constant 0 : index
    %c0_56 = arith.constant 0 : index
    %112 = vector.load %arg8[%c0_55, %c0_56] : memref<1x128xf32, #tpu.memory_space<vmem>>, vector<1x128xf32>
    tpu.vector_store %arg8[%c0_55, %c0_56], %111 {strides = array<i32>} : memref<1x128xf32, #tpu.memory_space<vmem>>, vector<1x128xf32>,
    %c0_57 = arith.constant 0 : index
    %c0_58 = arith.constant 0 : index
    %113 = vector.load %arg9[%c0_57, %c0_58] : memref<1x128xf32, #tpu.memory_space<vmem>>, vector<1x128xf32>
    %114 = arith.mulf %105, %113 : vector<1x128xf32>
    %115 = arith.mulf %108, %96 : vector<1x128xf32>
    %116 = arith.addf %114, %115 : vector<1x128xf32>
    %c0_59 = arith.constant 0 : index
    %c0_60 = arith.constant 0 : index
    %117 = vector.load %arg9[%c0_59, %c0_60] : memref<1x128xf32, #tpu.memory_space<vmem>>, vector<1x128xf32>
    tpu.vector_store %arg9[%c0_59, %c0_60], %116 {strides = array<i32>} : memref<1x128xf32, #tpu.memory_space<vmem>>, vector<1x128xf32>,
    %c0_61 = arith.constant 0 : index
    %c0_62 = arith.constant 0 : index
    %118 = vector.load %arg7[%c0_61, %c0_62] : memref<1x128xf32, #tpu.memory_space<vmem>>, vector<1x128xf32>
    tpu.vector_store %arg7[%c0_61, %c0_62], %102 {strides = array<i32>} : memref<1x128xf32, #tpu.memory_space<vmem>>, vector<1x128xf32>,
    %c0_63 = arith.constant 0 : index
    %c2 = arith.constant 2 : index
    %c0_64 = arith.constant 0 : index
    %119 = vector.load %arg1[%c0_63, %c2, %c0_64] : memref<1x11x384xf32, #tpu.memory_space<vmem>>, vector<1x1x384xf32>
    %120 = vector.shape_cast %119 : vector<1x1x384xf32> to vector<1x384xf32>
    %cst_65 = arith.constant dense<0.000000e+00> : vector<1x384xf32>
    %121 = tpu.matmul %96, %0, %cst_65 {dimension_numbers = #tpu.dot_dimension_numbers<[1], [0], [0], [1], [0, 0, 1, 1], [], []>} : vector<1x128xf32>, vector<128x384xf32>, vector<1x384xf32> -> vector<1x384xf32>
    %122 = vector.extract_strided_slice %120 {offsets = [0, 0], sizes = [1, 128], strides = [1, 1]} : vector<1x384xf32> to vector<1x128xf32>
    %123 = vector.extract_strided_slice %121 {offsets = [0, 0], sizes = [1, 128], strides = [1, 1]} : vector<1x384xf32> to vector<1x128xf32>
    %124 = arith.addf %122, %123 : vector<1x128xf32>
    %cst_66 = arith.constant 5.000000e-01 : f32
    %125 = vector.broadcast %cst_66 : f32 to vector<1x128xf32>
    %126 = arith.mulf %125, %124 : vector<1x128xf32>
    %127 = math.tanh %126 : vector<1x128xf32>
    %cst_67 = arith.constant 1.000000e+00 : f32
    %128 = vector.broadcast %cst_67 : f32 to vector<1x128xf32>
    %129 = arith.addf %128, %127 : vector<1x128xf32>
    %cst_68 = arith.constant 5.000000e-01 : f32
    %130 = vector.broadcast %cst_68 : f32 to vector<1x128xf32>
    %131 = arith.mulf %130, %129 : vector<1x128xf32>
    %132 = vector.extract_strided_slice %120 {offsets = [0, 128], sizes = [1, 128], strides = [1, 1]} : vector<1x384xf32> to vector<1x128xf32>
    %133 = vector.extract_strided_slice %121 {offsets = [0, 128], sizes = [1, 128], strides = [1, 1]} : vector<1x384xf32> to vector<1x128xf32>
    %134 = arith.addf %132, %133 : vector<1x128xf32>
    %cst_69 = arith.constant 5.000000e-01 : f32
    %135 = vector.broadcast %cst_69 : f32 to vector<1x128xf32>
    %136 = arith.mulf %135, %134 : vector<1x128xf32>
    %137 = math.tanh %136 : vector<1x128xf32>
    %cst_70 = arith.constant 1.000000e+00 : f32
    %138 = vector.broadcast %cst_70 : f32 to vector<1x128xf32>
    %139 = arith.addf %138, %137 : vector<1x128xf32>
    %cst_71 = arith.constant 5.000000e-01 : f32
    %140 = vector.broadcast %cst_71 : f32 to vector<1x128xf32>
    %141 = arith.mulf %140, %139 : vector<1x128xf32>
    %142 = vector.extract_strided_slice %120 {offsets = [0, 256], sizes = [1, 128], strides = [1, 1]} : vector<1x384xf32> to vector<1x128xf32>
    %143 = vector.extract_strided_slice %121 {offsets = [0, 256], sizes = [1, 128], strides = [1, 1]} : vector<1x384xf32> to vector<1x128xf32>
    %144 = arith.mulf %131, %143 : vector<1x128xf32>
    %145 = arith.addf %142, %144 : vector<1x128xf32>
    %146 = math.tanh %145 : vector<1x128xf32>
    %cst_72 = arith.constant 1.000000e+00 : f32
    %147 = vector.broadcast %cst_72 : f32 to vector<1x128xf32>
    %148 = arith.subf %147, %141 : vector<1x128xf32>
    %149 = arith.mulf %148, %146 : vector<1x128xf32>
    %150 = arith.mulf %141, %96 : vector<1x128xf32>
    %151 = arith.addf %149, %150 : vector<1x128xf32>
    %152 = arith.mulf %151, %1 : vector<1x128xf32>
    %cst_73 = arith.constant dense<0.000000e+00> : vector<1xf32>
    %153 = vector.multi_reduction <add>, %152, %cst_73 [1] : vector<1x128xf32> to vector<1xf32>
    %154 = vector.shape_cast %153 : vector<1xf32> to vector<1x1xf32>
    %c0_74 = arith.constant 0 : index
    %c0_75 = arith.constant 0 : index
    %155 = vector.load %arg7[%c0_74, %c0_75] : memref<1x128xf32, #tpu.memory_space<vmem>>, vector<1x128xf32>
    %156 = vector.broadcast %154 : vector<1x1xf32> to vector<1x128xf32>
    %157 = arith.maximumf %155, %156 : vector<1x128xf32>
    %c0_76 = arith.constant 0 : index
    %c0_77 = arith.constant 0 : index
    %158 = vector.load %arg7[%c0_76, %c0_77] : memref<1x128xf32, #tpu.memory_space<vmem>>, vector<1x128xf32>
    %159 = arith.subf %158, %157 : vector<1x128xf32>
    %160 = math.exp %159 : vector<1x128xf32>
    %161 = vector.broadcast %154 : vector<1x1xf32> to vector<1x128xf32>
    %162 = arith.subf %161, %157 : vector<1x128xf32>
    %163 = math.exp %162 : vector<1x128xf32>
    %c0_78 = arith.constant 0 : index
    %c0_79 = arith.constant 0 : index
    %164 = vector.load %arg8[%c0_78, %c0_79] : memref<1x128xf32, #tpu.memory_space<vmem>>, vector<1x128xf32>
    %165 = arith.mulf %160, %164 : vector<1x128xf32>
    %166 = arith.addf %165, %163 : vector<1x128xf32>
    %c0_80 = arith.constant 0 : index
    %c0_81 = arith.constant 0 : index
    %167 = vector.load %arg8[%c0_80, %c0_81] : memref<1x128xf32, #tpu.memory_space<vmem>>, vector<1x128xf32>
    tpu.vector_store %arg8[%c0_80, %c0_81], %166 {strides = array<i32>} : memref<1x128xf32, #tpu.memory_space<vmem>>, vector<1x128xf32>,
    %c0_82 = arith.constant 0 : index
    %c0_83 = arith.constant 0 : index
    %168 = vector.load %arg9[%c0_82, %c0_83] : memref<1x128xf32, #tpu.memory_space<vmem>>, vector<1x128xf32>
    %169 = arith.mulf %160, %168 : vector<1x128xf32>
    %170 = arith.mulf %163, %151 : vector<1x128xf32>
    %171 = arith.addf %169, %170 : vector<1x128xf32>
    %c0_84 = arith.constant 0 : index
    %c0_85 = arith.constant 0 : index
    %172 = vector.load %arg9[%c0_84, %c0_85] : memref<1x128xf32, #tpu.memory_space<vmem>>, vector<1x128xf32>
    tpu.vector_store %arg9[%c0_84, %c0_85], %171 {strides = array<i32>} : memref<1x128xf32, #tpu.memory_space<vmem>>, vector<1x128xf32>,
    %c0_86 = arith.constant 0 : index
    %c0_87 = arith.constant 0 : index
    %173 = vector.load %arg7[%c0_86, %c0_87] : memref<1x128xf32, #tpu.memory_space<vmem>>, vector<1x128xf32>
    tpu.vector_store %arg7[%c0_86, %c0_87], %157 {strides = array<i32>} : memref<1x128xf32, #tpu.memory_space<vmem>>, vector<1x128xf32>,
    %c0_88 = arith.constant 0 : index
    %c3 = arith.constant 3 : index
    %c0_89 = arith.constant 0 : index
    %174 = vector.load %arg1[%c0_88, %c3, %c0_89] : memref<1x11x384xf32, #tpu.memory_space<vmem>>, vector<1x1x384xf32>
    %175 = vector.shape_cast %174 : vector<1x1x384xf32> to vector<1x384xf32>
    %cst_90 = arith.constant dense<0.000000e+00> : vector<1x384xf32>
    %176 = tpu.matmul %151, %0, %cst_90 {dimension_numbers = #tpu.dot_dimension_numbers<[1], [0], [0], [1], [0, 0, 1, 1], [], []>} : vector<1x128xf32>, vector<128x384xf32>, vector<1x384xf32> -> vector<1x384xf32>
    %177 = vector.extract_strided_slice %175 {offsets = [0, 0], sizes = [1, 128], strides = [1, 1]} : vector<1x384xf32> to vector<1x128xf32>
    %178 = vector.extract_strided_slice %176 {offsets = [0, 0], sizes = [1, 128], strides = [1, 1]} : vector<1x384xf32> to vector<1x128xf32>
    %179 = arith.addf %177, %178 : vector<1x128xf32>
    %cst_91 = arith.constant 5.000000e-01 : f32
    %180 = vector.broadcast %cst_91 : f32 to vector<1x128xf32>
    %181 = arith.mulf %180, %179 : vector<1x128xf32>
    %182 = math.tanh %181 : vector<1x128xf32>
    %cst_92 = arith.constant 1.000000e+00 : f32
    %183 = vector.broadcast %cst_92 : f32 to vector<1x128xf32>
    %184 = arith.addf %183, %182 : vector<1x128xf32>
    %cst_93 = arith.constant 5.000000e-01 : f32
    %185 = vector.broadcast %cst_93 : f32 to vector<1x128xf32>
    %186 = arith.mulf %185, %184 : vector<1x128xf32>
    %187 = vector.extract_strided_slice %175 {offsets = [0, 128], sizes = [1, 128], strides = [1, 1]} : vector<1x384xf32> to vector<1x128xf32>
    %188 = vector.extract_strided_slice %176 {offsets = [0, 128], sizes = [1, 128], strides = [1, 1]} : vector<1x384xf32> to vector<1x128xf32>
    %189 = arith.addf %187, %188 : vector<1x128xf32>
    %cst_94 = arith.constant 5.000000e-01 : f32
    %190 = vector.broadcast %cst_94 : f32 to vector<1x128xf32>
    %191 = arith.mulf %190, %189 : vector<1x128xf32>
    %192 = math.tanh %191 : vector<1x128xf32>
    %cst_95 = arith.constant 1.000000e+00 : f32
    %193 = vector.broadcast %cst_95 : f32 to vector<1x128xf32>
    %194 = arith.addf %193, %192 : vector<1x128xf32>
    %cst_96 = arith.constant 5.000000e-01 : f32
    %195 = vector.broadcast %cst_96 : f32 to vector<1x128xf32>
    %196 = arith.mulf %195, %194 : vector<1x128xf32>
    %197 = vector.extract_strided_slice %175 {offsets = [0, 256], sizes = [1, 128], strides = [1, 1]} : vector<1x384xf32> to vector<1x128xf32>
    %198 = vector.extract_strided_slice %176 {offsets = [0, 256], sizes = [1, 128], strides = [1, 1]} : vector<1x384xf32> to vector<1x128xf32>
    %199 = arith.mulf %186, %198 : vector<1x128xf32>
    %200 = arith.addf %197, %199 : vector<1x128xf32>
    %201 = math.tanh %200 : vector<1x128xf32>
    %cst_97 = arith.constant 1.000000e+00 : f32
    %202 = vector.broadcast %cst_97 : f32 to vector<1x128xf32>
    %203 = arith.subf %202, %196 : vector<1x128xf32>
    %204 = arith.mulf %203, %201 : vector<1x128xf32>
    %205 = arith.mulf %196, %151 : vector<1x128xf32>
    %206 = arith.addf %204, %205 : vector<1x128xf32>
    %207 = arith.mulf %206, %1 : vector<1x128xf32>
    %cst_98 = arith.constant dense<0.000000e+00> : vector<1xf32>
    %208 = vector.multi_reduction <add>, %207, %cst_98 [1] : vector<1x128xf32> to vector<1xf32>
    %209 = vector.shape_cast %208 : vector<1xf32> to vector<1x1xf32>
    %c0_99 = arith.constant 0 : index
    %c0_100 = arith.constant 0 : index
    %210 = vector.load %arg7[%c0_99, %c0_100] : memref<1x128xf32, #tpu.memory_space<vmem>>, vector<1x128xf32>
    %211 = vector.broadcast %209 : vector<1x1xf32> to vector<1x128xf32>
    %212 = arith.maximumf %210, %211 : vector<1x128xf32>
    %c0_101 = arith.constant 0 : index
    %c0_102 = arith.constant 0 : index
    %213 = vector.load %arg7[%c0_101, %c0_102] : memref<1x128xf32, #tpu.memory_space<vmem>>, vector<1x128xf32>
    %214 = arith.subf %213, %212 : vector<1x128xf32>
    %215 = math.exp %214 : vector<1x128xf32>
    %216 = vector.broadcast %209 : vector<1x1xf32> to vector<1x128xf32>
    %217 = arith.subf %216, %212 : vector<1x128xf32>
    %218 = math.exp %217 : vector<1x128xf32>
    %c0_103 = arith.constant 0 : index
    %c0_104 = arith.constant 0 : index
    %219 = vector.load %arg8[%c0_103, %c0_104] : memref<1x128xf32, #tpu.memory_space<vmem>>, vector<1x128xf32>
    %220 = arith.mulf %215, %219 : vector<1x128xf32>
    %221 = arith.addf %220, %218 : vector<1x128xf32>
    %c0_105 = arith.constant 0 : index
    %c0_106 = arith.constant 0 : index
    %222 = vector.load %arg8[%c0_105, %c0_106] : memref<1x128xf32, #tpu.memory_space<vmem>>, vector<1x128xf32>
    tpu.vector_store %arg8[%c0_105, %c0_106], %221 {strides = array<i32>} : memref<1x128xf32, #tpu.memory_space<vmem>>, vector<1x128xf32>,
    %c0_107 = arith.constant 0 : index
    %c0_108 = arith.constant 0 : index
    %223 = vector.load %arg9[%c0_107, %c0_108] : memref<1x128xf32, #tpu.memory_space<vmem>>, vector<1x128xf32>
    %224 = arith.mulf %215, %223 : vector<1x128xf32>
    %225 = arith.mulf %218, %206 : vector<1x128xf32>
    %226 = arith.addf %224, %225 : vector<1x128xf32>
    %c0_109 = arith.constant 0 : index
    %c0_110 = arith.constant 0 : index
    %227 = vector.load %arg9[%c0_109, %c0_110] : memref<1x128xf32, #tpu.memory_space<vmem>>, vector<1x128xf32>
    tpu.vector_store %arg9[%c0_109, %c0_110], %226 {strides = array<i32>} : memref<1x128xf32, #tpu.memory_space<vmem>>, vector<1x128xf32>,
    %c0_111 = arith.constant 0 : index
    %c0_112 = arith.constant 0 : index
    %228 = vector.load %arg7[%c0_111, %c0_112] : memref<1x128xf32, #tpu.memory_space<vmem>>, vector<1x128xf32>
    tpu.vector_store %arg7[%c0_111, %c0_112], %212 {strides = array<i32>} : memref<1x128xf32, #tpu.memory_space<vmem>>, vector<1x128xf32>,
    %c0_113 = arith.constant 0 : index
    %c4 = arith.constant 4 : index
    %c0_114 = arith.constant 0 : index
    %229 = vector.load %arg1[%c0_113, %c4, %c0_114] : memref<1x11x384xf32, #tpu.memory_space<vmem>>, vector<1x1x384xf32>
    %230 = vector.shape_cast %229 : vector<1x1x384xf32> to vector<1x384xf32>
    %cst_115 = arith.constant dense<0.000000e+00> : vector<1x384xf32>
    %231 = tpu.matmul %206, %0, %cst_115 {dimension_numbers = #tpu.dot_dimension_numbers<[1], [0], [0], [1], [0, 0, 1, 1], [], []>} : vector<1x128xf32>, vector<128x384xf32>, vector<1x384xf32> -> vector<1x384xf32>
    %232 = vector.extract_strided_slice %230 {offsets = [0, 0], sizes = [1, 128], strides = [1, 1]} : vector<1x384xf32> to vector<1x128xf32>
    %233 = vector.extract_strided_slice %231 {offsets = [0, 0], sizes = [1, 128], strides = [1, 1]} : vector<1x384xf32> to vector<1x128xf32>
    %234 = arith.addf %232, %233 : vector<1x128xf32>
    %cst_116 = arith.constant 5.000000e-01 : f32
    %235 = vector.broadcast %cst_116 : f32 to vector<1x128xf32>
    %236 = arith.mulf %235, %234 : vector<1x128xf32>
    %237 = math.tanh %236 : vector<1x128xf32>
    %cst_117 = arith.constant 1.000000e+00 : f32
    %238 = vector.broadcast %cst_117 : f32 to vector<1x128xf32>
    %239 = arith.addf %238, %237 : vector<1x128xf32>
    %cst_118 = arith.constant 5.000000e-01 : f32
    %240 = vector.broadcast %cst_118 : f32 to vector<1x128xf32>
    %241 = arith.mulf %240, %239 : vector<1x128xf32>
    %242 = vector.extract_strided_slice %230 {offsets = [0, 128], sizes = [1, 128], strides = [1, 1]} : vector<1x384xf32> to vector<1x128xf32>
    %243 = vector.extract_strided_slice %231 {offsets = [0, 128], sizes = [1, 128], strides = [1, 1]} : vector<1x384xf32> to vector<1x128xf32>
    %244 = arith.addf %242, %243 : vector<1x128xf32>
    %cst_119 = arith.constant 5.000000e-01 : f32
    %245 = vector.broadcast %cst_119 : f32 to vector<1x128xf32>
    %246 = arith.mulf %245, %244 : vector<1x128xf32>
    %247 = math.tanh %246 : vector<1x128xf32>
    %cst_120 = arith.constant 1.000000e+00 : f32
    %248 = vector.broadcast %cst_120 : f32 to vector<1x128xf32>
    %249 = arith.addf %248, %247 : vector<1x128xf32>
    %cst_121 = arith.constant 5.000000e-01 : f32
    %250 = vector.broadcast %cst_121 : f32 to vector<1x128xf32>
    %251 = arith.mulf %250, %249 : vector<1x128xf32>
    %252 = vector.extract_strided_slice %230 {offsets = [0, 256], sizes = [1, 128], strides = [1, 1]} : vector<1x384xf32> to vector<1x128xf32>
    %253 = vector.extract_strided_slice %231 {offsets = [0, 256], sizes = [1, 128], strides = [1, 1]} : vector<1x384xf32> to vector<1x128xf32>
    %254 = arith.mulf %241, %253 : vector<1x128xf32>
    %255 = arith.addf %252, %254 : vector<1x128xf32>
    %256 = math.tanh %255 : vector<1x128xf32>
    %cst_122 = arith.constant 1.000000e+00 : f32
    %257 = vector.broadcast %cst_122 : f32 to vector<1x128xf32>
    %258 = arith.subf %257, %251 : vector<1x128xf32>
    %259 = arith.mulf %258, %256 : vector<1x128xf32>
    %260 = arith.mulf %251, %206 : vector<1x128xf32>
    %261 = arith.addf %259, %260 : vector<1x128xf32>
    %262 = arith.mulf %261, %1 : vector<1x128xf32>
    %cst_123 = arith.constant dense<0.000000e+00> : vector<1xf32>
    %263 = vector.multi_reduction <add>, %262, %cst_123 [1] : vector<1x128xf32> to vector<1xf32>
    %264 = vector.shape_cast %263 : vector<1xf32> to vector<1x1xf32>
    %c0_124 = arith.constant 0 : index
    %c0_125 = arith.constant 0 : index
    %265 = vector.load %arg7[%c0_124, %c0_125] : memref<1x128xf32, #tpu.memory_space<vmem>>, vector<1x128xf32>
    %266 = vector.broadcast %264 : vector<1x1xf32> to vector<1x128xf32>
    %267 = arith.maximumf %265, %266 : vector<1x128xf32>
    %c0_126 = arith.constant 0 : index
    %c0_127 = arith.constant 0 : index
    %268 = vector.load %arg7[%c0_126, %c0_127] : memref<1x128xf32, #tpu.memory_space<vmem>>, vector<1x128xf32>
    %269 = arith.subf %268, %267 : vector<1x128xf32>
    %270 = math.exp %269 : vector<1x128xf32>
    %271 = vector.broadcast %264 : vector<1x1xf32> to vector<1x128xf32>
    %272 = arith.subf %271, %267 : vector<1x128xf32>
    %273 = math.exp %272 : vector<1x128xf32>
    %c0_128 = arith.constant 0 : index
    %c0_129 = arith.constant 0 : index
    %274 = vector.load %arg8[%c0_128, %c0_129] : memref<1x128xf32, #tpu.memory_space<vmem>>, vector<1x128xf32>
    %275 = arith.mulf %270, %274 : vector<1x128xf32>
    %276 = arith.addf %275, %273 : vector<1x128xf32>
    %c0_130 = arith.constant 0 : index
    %c0_131 = arith.constant 0 : index
    %277 = vector.load %arg8[%c0_130, %c0_131] : memref<1x128xf32, #tpu.memory_space<vmem>>, vector<1x128xf32>
    tpu.vector_store %arg8[%c0_130, %c0_131], %276 {strides = array<i32>} : memref<1x128xf32, #tpu.memory_space<vmem>>, vector<1x128xf32>,
    %c0_132 = arith.constant 0 : index
    %c0_133 = arith.constant 0 : index
    %278 = vector.load %arg9[%c0_132, %c0_133] : memref<1x128xf32, #tpu.memory_space<vmem>>, vector<1x128xf32>
    %279 = arith.mulf %270, %278 : vector<1x128xf32>
    %280 = arith.mulf %273, %261 : vector<1x128xf32>
    %281 = arith.addf %279, %280 : vector<1x128xf32>
    %c0_134 = arith.constant 0 : index
    %c0_135 = arith.constant 0 : index
    %282 = vector.load %arg9[%c0_134, %c0_135] : memref<1x128xf32, #tpu.memory_space<vmem>>, vector<1x128xf32>
    tpu.vector_store %arg9[%c0_134, %c0_135], %281 {strides = array<i32>} : memref<1x128xf32, #tpu.memory_space<vmem>>, vector<1x128xf32>,
    %c0_136 = arith.constant 0 : index
    %c0_137 = arith.constant 0 : index
    %283 = vector.load %arg7[%c0_136, %c0_137] : memref<1x128xf32, #tpu.memory_space<vmem>>, vector<1x128xf32>
    tpu.vector_store %arg7[%c0_136, %c0_137], %267 {strides = array<i32>} : memref<1x128xf32, #tpu.memory_space<vmem>>, vector<1x128xf32>,
    %c0_138 = arith.constant 0 : index
    %c5 = arith.constant 5 : index
    %c0_139 = arith.constant 0 : index
    %284 = vector.load %arg1[%c0_138, %c5, %c0_139] : memref<1x11x384xf32, #tpu.memory_space<vmem>>, vector<1x1x384xf32>
    %285 = vector.shape_cast %284 : vector<1x1x384xf32> to vector<1x384xf32>
    %cst_140 = arith.constant dense<0.000000e+00> : vector<1x384xf32>
    %286 = tpu.matmul %261, %0, %cst_140 {dimension_numbers = #tpu.dot_dimension_numbers<[1], [0], [0], [1], [0, 0, 1, 1], [], []>} : vector<1x128xf32>, vector<128x384xf32>, vector<1x384xf32> -> vector<1x384xf32>
    %287 = vector.extract_strided_slice %285 {offsets = [0, 0], sizes = [1, 128], strides = [1, 1]} : vector<1x384xf32> to vector<1x128xf32>
    %288 = vector.extract_strided_slice %286 {offsets = [0, 0], sizes = [1, 128], strides = [1, 1]} : vector<1x384xf32> to vector<1x128xf32>
    %289 = arith.addf %287, %288 : vector<1x128xf32>
    %cst_141 = arith.constant 5.000000e-01 : f32
    %290 = vector.broadcast %cst_141 : f32 to vector<1x128xf32>
    %291 = arith.mulf %290, %289 : vector<1x128xf32>
    %292 = math.tanh %291 : vector<1x128xf32>
    %cst_142 = arith.constant 1.000000e+00 : f32
    %293 = vector.broadcast %cst_142 : f32 to vector<1x128xf32>
    %294 = arith.addf %293, %292 : vector<1x128xf32>
    %cst_143 = arith.constant 5.000000e-01 : f32
    %295 = vector.broadcast %cst_143 : f32 to vector<1x128xf32>
    %296 = arith.mulf %295, %294 : vector<1x128xf32>
    %297 = vector.extract_strided_slice %285 {offsets = [0, 128], sizes = [1, 128], strides = [1, 1]} : vector<1x384xf32> to vector<1x128xf32>
    %298 = vector.extract_strided_slice %286 {offsets = [0, 128], sizes = [1, 128], strides = [1, 1]} : vector<1x384xf32> to vector<1x128xf32>
    %299 = arith.addf %297, %298 : vector<1x128xf32>
    %cst_144 = arith.constant 5.000000e-01 : f32
    %300 = vector.broadcast %cst_144 : f32 to vector<1x128xf32>
    %301 = arith.mulf %300, %299 : vector<1x128xf32>
    %302 = math.tanh %301 : vector<1x128xf32>
    %cst_145 = arith.constant 1.000000e+00 : f32
    %303 = vector.broadcast %cst_145 : f32 to vector<1x128xf32>
    %304 = arith.addf %303, %302 : vector<1x128xf32>
    %cst_146 = arith.constant 5.000000e-01 : f32
    %305 = vector.broadcast %cst_146 : f32 to vector<1x128xf32>
    %306 = arith.mulf %305, %304 : vector<1x128xf32>
    %307 = vector.extract_strided_slice %285 {offsets = [0, 256], sizes = [1, 128], strides = [1, 1]} : vector<1x384xf32> to vector<1x128xf32>
    %308 = vector.extract_strided_slice %286 {offsets = [0, 256], sizes = [1, 128], strides = [1, 1]} : vector<1x384xf32> to vector<1x128xf32>
    %309 = arith.mulf %296, %308 : vector<1x128xf32>
    %310 = arith.addf %307, %309 : vector<1x128xf32>
    %311 = math.tanh %310 : vector<1x128xf32>
    %cst_147 = arith.constant 1.000000e+00 : f32
    %312 = vector.broadcast %cst_147 : f32 to vector<1x128xf32>
    %313 = arith.subf %312, %306 : vector<1x128xf32>
    %314 = arith.mulf %313, %311 : vector<1x128xf32>
    %315 = arith.mulf %306, %261 : vector<1x128xf32>
    %316 = arith.addf %314, %315 : vector<1x128xf32>
    %317 = arith.mulf %316, %1 : vector<1x128xf32>
    %cst_148 = arith.constant dense<0.000000e+00> : vector<1xf32>
    %318 = vector.multi_reduction <add>, %317, %cst_148 [1] : vector<1x128xf32> to vector<1xf32>
    %319 = vector.shape_cast %318 : vector<1xf32> to vector<1x1xf32>
    %c0_149 = arith.constant 0 : index
    %c0_150 = arith.constant 0 : index
    %320 = vector.load %arg7[%c0_149, %c0_150] : memref<1x128xf32, #tpu.memory_space<vmem>>, vector<1x128xf32>
    %321 = vector.broadcast %319 : vector<1x1xf32> to vector<1x128xf32>
    %322 = arith.maximumf %320, %321 : vector<1x128xf32>
    %c0_151 = arith.constant 0 : index
    %c0_152 = arith.constant 0 : index
    %323 = vector.load %arg7[%c0_151, %c0_152] : memref<1x128xf32, #tpu.memory_space<vmem>>, vector<1x128xf32>
    %324 = arith.subf %323, %322 : vector<1x128xf32>
    %325 = math.exp %324 : vector<1x128xf32>
    %326 = vector.broadcast %319 : vector<1x1xf32> to vector<1x128xf32>
    %327 = arith.subf %326, %322 : vector<1x128xf32>
    %328 = math.exp %327 : vector<1x128xf32>
    %c0_153 = arith.constant 0 : index
    %c0_154 = arith.constant 0 : index
    %329 = vector.load %arg8[%c0_153, %c0_154] : memref<1x128xf32, #tpu.memory_space<vmem>>, vector<1x128xf32>
    %330 = arith.mulf %325, %329 : vector<1x128xf32>
    %331 = arith.addf %330, %328 : vector<1x128xf32>
    %c0_155 = arith.constant 0 : index
    %c0_156 = arith.constant 0 : index
    %332 = vector.load %arg8[%c0_155, %c0_156] : memref<1x128xf32, #tpu.memory_space<vmem>>, vector<1x128xf32>
    tpu.vector_store %arg8[%c0_155, %c0_156], %331 {strides = array<i32>} : memref<1x128xf32, #tpu.memory_space<vmem>>, vector<1x128xf32>,
    %c0_157 = arith.constant 0 : index
    %c0_158 = arith.constant 0 : index
    %333 = vector.load %arg9[%c0_157, %c0_158] : memref<1x128xf32, #tpu.memory_space<vmem>>, vector<1x128xf32>
    %334 = arith.mulf %325, %333 : vector<1x128xf32>
    %335 = arith.mulf %328, %316 : vector<1x128xf32>
    %336 = arith.addf %334, %335 : vector<1x128xf32>
    %c0_159 = arith.constant 0 : index
    %c0_160 = arith.constant 0 : index
    %337 = vector.load %arg9[%c0_159, %c0_160] : memref<1x128xf32, #tpu.memory_space<vmem>>, vector<1x128xf32>
    tpu.vector_store %arg9[%c0_159, %c0_160], %336 {strides = array<i32>} : memref<1x128xf32, #tpu.memory_space<vmem>>, vector<1x128xf32>,
    %c0_161 = arith.constant 0 : index
    %c0_162 = arith.constant 0 : index
    %338 = vector.load %arg7[%c0_161, %c0_162] : memref<1x128xf32, #tpu.memory_space<vmem>>, vector<1x128xf32>
    tpu.vector_store %arg7[%c0_161, %c0_162], %322 {strides = array<i32>} : memref<1x128xf32, #tpu.memory_space<vmem>>, vector<1x128xf32>,
    %c0_163 = arith.constant 0 : index
    %c6 = arith.constant 6 : index
    %c0_164 = arith.constant 0 : index
    %339 = vector.load %arg1[%c0_163, %c6, %c0_164] : memref<1x11x384xf32, #tpu.memory_space<vmem>>, vector<1x1x384xf32>
    %340 = vector.shape_cast %339 : vector<1x1x384xf32> to vector<1x384xf32>
    %cst_165 = arith.constant dense<0.000000e+00> : vector<1x384xf32>
    %341 = tpu.matmul %316, %0, %cst_165 {dimension_numbers = #tpu.dot_dimension_numbers<[1], [0], [0], [1], [0, 0, 1, 1], [], []>} : vector<1x128xf32>, vector<128x384xf32>, vector<1x384xf32> -> vector<1x384xf32>
    %342 = vector.extract_strided_slice %340 {offsets = [0, 0], sizes = [1, 128], strides = [1, 1]} : vector<1x384xf32> to vector<1x128xf32>
    %343 = vector.extract_strided_slice %341 {offsets = [0, 0], sizes = [1, 128], strides = [1, 1]} : vector<1x384xf32> to vector<1x128xf32>
    %344 = arith.addf %342, %343 : vector<1x128xf32>
    %cst_166 = arith.constant 5.000000e-01 : f32
    %345 = vector.broadcast %cst_166 : f32 to vector<1x128xf32>
    %346 = arith.mulf %345, %344 : vector<1x128xf32>
    %347 = math.tanh %346 : vector<1x128xf32>
    %cst_167 = arith.constant 1.000000e+00 : f32
    %348 = vector.broadcast %cst_167 : f32 to vector<1x128xf32>
    %349 = arith.addf %348, %347 : vector<1x128xf32>
    %cst_168 = arith.constant 5.000000e-01 : f32
    %350 = vector.broadcast %cst_168 : f32 to vector<1x128xf32>
    %351 = arith.mulf %350, %349 : vector<1x128xf32>
    %352 = vector.extract_strided_slice %340 {offsets = [0, 128], sizes = [1, 128], strides = [1, 1]} : vector<1x384xf32> to vector<1x128xf32>
    %353 = vector.extract_strided_slice %341 {offsets = [0, 128], sizes = [1, 128], strides = [1, 1]} : vector<1x384xf32> to vector<1x128xf32>
    %354 = arith.addf %352, %353 : vector<1x128xf32>
    %cst_169 = arith.constant 5.000000e-01 : f32
    %355 = vector.broadcast %cst_169 : f32 to vector<1x128xf32>
    %356 = arith.mulf %355, %354 : vector<1x128xf32>
    %357 = math.tanh %356 : vector<1x128xf32>
    %cst_170 = arith.constant 1.000000e+00 : f32
    %358 = vector.broadcast %cst_170 : f32 to vector<1x128xf32>
    %359 = arith.addf %358, %357 : vector<1x128xf32>
    %cst_171 = arith.constant 5.000000e-01 : f32
    %360 = vector.broadcast %cst_171 : f32 to vector<1x128xf32>
    %361 = arith.mulf %360, %359 : vector<1x128xf32>
    %362 = vector.extract_strided_slice %340 {offsets = [0, 256], sizes = [1, 128], strides = [1, 1]} : vector<1x384xf32> to vector<1x128xf32>
    %363 = vector.extract_strided_slice %341 {offsets = [0, 256], sizes = [1, 128], strides = [1, 1]} : vector<1x384xf32> to vector<1x128xf32>
    %364 = arith.mulf %351, %363 : vector<1x128xf32>
    %365 = arith.addf %362, %364 : vector<1x128xf32>
    %366 = math.tanh %365 : vector<1x128xf32>
    %cst_172 = arith.constant 1.000000e+00 : f32
    %367 = vector.broadcast %cst_172 : f32 to vector<1x128xf32>
    %368 = arith.subf %367, %361 : vector<1x128xf32>
    %369 = arith.mulf %368, %366 : vector<1x128xf32>
    %370 = arith.mulf %361, %316 : vector<1x128xf32>
    %371 = arith.addf %369, %370 : vector<1x128xf32>
    %372 = arith.mulf %371, %1 : vector<1x128xf32>
    %cst_173 = arith.constant dense<0.000000e+00> : vector<1xf32>
    %373 = vector.multi_reduction <add>, %372, %cst_173 [1] : vector<1x128xf32> to vector<1xf32>
    %374 = vector.shape_cast %373 : vector<1xf32> to vector<1x1xf32>
    %c0_174 = arith.constant 0 : index
    %c0_175 = arith.constant 0 : index
    %375 = vector.load %arg7[%c0_174, %c0_175] : memref<1x128xf32, #tpu.memory_space<vmem>>, vector<1x128xf32>
    %376 = vector.broadcast %374 : vector<1x1xf32> to vector<1x128xf32>
    %377 = arith.maximumf %375, %376 : vector<1x128xf32>
    %c0_176 = arith.constant 0 : index
    %c0_177 = arith.constant 0 : index
    %378 = vector.load %arg7[%c0_176, %c0_177] : memref<1x128xf32, #tpu.memory_space<vmem>>, vector<1x128xf32>
    %379 = arith.subf %378, %377 : vector<1x128xf32>
    %380 = math.exp %379 : vector<1x128xf32>
    %381 = vector.broadcast %374 : vector<1x1xf32> to vector<1x128xf32>
    %382 = arith.subf %381, %377 : vector<1x128xf32>
    %383 = math.exp %382 : vector<1x128xf32>
    %c0_178 = arith.constant 0 : index
    %c0_179 = arith.constant 0 : index
    %384 = vector.load %arg8[%c0_178, %c0_179] : memref<1x128xf32, #tpu.memory_space<vmem>>, vector<1x128xf32>
    %385 = arith.mulf %380, %384 : vector<1x128xf32>
    %386 = arith.addf %385, %383 : vector<1x128xf32>
    %c0_180 = arith.constant 0 : index
    %c0_181 = arith.constant 0 : index
    %387 = vector.load %arg8[%c0_180, %c0_181] : memref<1x128xf32, #tpu.memory_space<vmem>>, vector<1x128xf32>
    tpu.vector_store %arg8[%c0_180, %c0_181], %386 {strides = array<i32>} : memref<1x128xf32, #tpu.memory_space<vmem>>, vector<1x128xf32>,
    %c0_182 = arith.constant 0 : index
    %c0_183 = arith.constant 0 : index
    %388 = vector.load %arg9[%c0_182, %c0_183] : memref<1x128xf32, #tpu.memory_space<vmem>>, vector<1x128xf32>
    %389 = arith.mulf %380, %388 : vector<1x128xf32>
    %390 = arith.mulf %383, %371 : vector<1x128xf32>
    %391 = arith.addf %389, %390 : vector<1x128xf32>
    %c0_184 = arith.constant 0 : index
    %c0_185 = arith.constant 0 : index
    %392 = vector.load %arg9[%c0_184, %c0_185] : memref<1x128xf32, #tpu.memory_space<vmem>>, vector<1x128xf32>
    tpu.vector_store %arg9[%c0_184, %c0_185], %391 {strides = array<i32>} : memref<1x128xf32, #tpu.memory_space<vmem>>, vector<1x128xf32>,
    %c0_186 = arith.constant 0 : index
    %c0_187 = arith.constant 0 : index
    %393 = vector.load %arg7[%c0_186, %c0_187] : memref<1x128xf32, #tpu.memory_space<vmem>>, vector<1x128xf32>
    tpu.vector_store %arg7[%c0_186, %c0_187], %377 {strides = array<i32>} : memref<1x128xf32, #tpu.memory_space<vmem>>, vector<1x128xf32>,
    %c0_188 = arith.constant 0 : index
    %c7 = arith.constant 7 : index
    %c0_189 = arith.constant 0 : index
    %394 = vector.load %arg1[%c0_188, %c7, %c0_189] : memref<1x11x384xf32, #tpu.memory_space<vmem>>, vector<1x1x384xf32>
    %395 = vector.shape_cast %394 : vector<1x1x384xf32> to vector<1x384xf32>
    %cst_190 = arith.constant dense<0.000000e+00> : vector<1x384xf32>
    %396 = tpu.matmul %371, %0, %cst_190 {dimension_numbers = #tpu.dot_dimension_numbers<[1], [0], [0], [1], [0, 0, 1, 1], [], []>} : vector<1x128xf32>, vector<128x384xf32>, vector<1x384xf32> -> vector<1x384xf32>
    %397 = vector.extract_strided_slice %395 {offsets = [0, 0], sizes = [1, 128], strides = [1, 1]} : vector<1x384xf32> to vector<1x128xf32>
    %398 = vector.extract_strided_slice %396 {offsets = [0, 0], sizes = [1, 128], strides = [1, 1]} : vector<1x384xf32> to vector<1x128xf32>
    %399 = arith.addf %397, %398 : vector<1x128xf32>
    %cst_191 = arith.constant 5.000000e-01 : f32
    %400 = vector.broadcast %cst_191 : f32 to vector<1x128xf32>
    %401 = arith.mulf %400, %399 : vector<1x128xf32>
    %402 = math.tanh %401 : vector<1x128xf32>
    %cst_192 = arith.constant 1.000000e+00 : f32
    %403 = vector.broadcast %cst_192 : f32 to vector<1x128xf32>
    %404 = arith.addf %403, %402 : vector<1x128xf32>
    %cst_193 = arith.constant 5.000000e-01 : f32
    %405 = vector.broadcast %cst_193 : f32 to vector<1x128xf32>
    %406 = arith.mulf %405, %404 : vector<1x128xf32>
    %407 = vector.extract_strided_slice %395 {offsets = [0, 128], sizes = [1, 128], strides = [1, 1]} : vector<1x384xf32> to vector<1x128xf32>
    %408 = vector.extract_strided_slice %396 {offsets = [0, 128], sizes = [1, 128], strides = [1, 1]} : vector<1x384xf32> to vector<1x128xf32>
    %409 = arith.addf %407, %408 : vector<1x128xf32>
    %cst_194 = arith.constant 5.000000e-01 : f32
    %410 = vector.broadcast %cst_194 : f32 to vector<1x128xf32>
    %411 = arith.mulf %410, %409 : vector<1x128xf32>
    %412 = math.tanh %411 : vector<1x128xf32>
    %cst_195 = arith.constant 1.000000e+00 : f32
    %413 = vector.broadcast %cst_195 : f32 to vector<1x128xf32>
    %414 = arith.addf %413, %412 : vector<1x128xf32>
    %cst_196 = arith.constant 5.000000e-01 : f32
    %415 = vector.broadcast %cst_196 : f32 to vector<1x128xf32>
    %416 = arith.mulf %415, %414 : vector<1x128xf32>
    %417 = vector.extract_strided_slice %395 {offsets = [0, 256], sizes = [1, 128], strides = [1, 1]} : vector<1x384xf32> to vector<1x128xf32>
    %418 = vector.extract_strided_slice %396 {offsets = [0, 256], sizes = [1, 128], strides = [1, 1]} : vector<1x384xf32> to vector<1x128xf32>
    %419 = arith.mulf %406, %418 : vector<1x128xf32>
    %420 = arith.addf %417, %419 : vector<1x128xf32>
    %421 = math.tanh %420 : vector<1x128xf32>
    %cst_197 = arith.constant 1.000000e+00 : f32
    %422 = vector.broadcast %cst_197 : f32 to vector<1x128xf32>
    %423 = arith.subf %422, %416 : vector<1x128xf32>
    %424 = arith.mulf %423, %421 : vector<1x128xf32>
    %425 = arith.mulf %416, %371 : vector<1x128xf32>
    %426 = arith.addf %424, %425 : vector<1x128xf32>
    %427 = arith.mulf %426, %1 : vector<1x128xf32>
    %cst_198 = arith.constant dense<0.000000e+00> : vector<1xf32>
    %428 = vector.multi_reduction <add>, %427, %cst_198 [1] : vector<1x128xf32> to vector<1xf32>
    %429 = vector.shape_cast %428 : vector<1xf32> to vector<1x1xf32>
    %c0_199 = arith.constant 0 : index
    %c0_200 = arith.constant 0 : index
    %430 = vector.load %arg7[%c0_199, %c0_200] : memref<1x128xf32, #tpu.memory_space<vmem>>, vector<1x128xf32>
    %431 = vector.broadcast %429 : vector<1x1xf32> to vector<1x128xf32>
    %432 = arith.maximumf %430, %431 : vector<1x128xf32>
    %c0_201 = arith.constant 0 : index
    %c0_202 = arith.constant 0 : index
    %433 = vector.load %arg7[%c0_201, %c0_202] : memref<1x128xf32, #tpu.memory_space<vmem>>, vector<1x128xf32>
    %434 = arith.subf %433, %432 : vector<1x128xf32>
    %435 = math.exp %434 : vector<1x128xf32>
    %436 = vector.broadcast %429 : vector<1x1xf32> to vector<1x128xf32>
    %437 = arith.subf %436, %432 : vector<1x128xf32>
    %438 = math.exp %437 : vector<1x128xf32>
    %c0_203 = arith.constant 0 : index
    %c0_204 = arith.constant 0 : index
    %439 = vector.load %arg8[%c0_203, %c0_204] : memref<1x128xf32, #tpu.memory_space<vmem>>, vector<1x128xf32>
    %440 = arith.mulf %435, %439 : vector<1x128xf32>
    %441 = arith.addf %440, %438 : vector<1x128xf32>
    %c0_205 = arith.constant 0 : index
    %c0_206 = arith.constant 0 : index
    %442 = vector.load %arg8[%c0_205, %c0_206] : memref<1x128xf32, #tpu.memory_space<vmem>>, vector<1x128xf32>
    tpu.vector_store %arg8[%c0_205, %c0_206], %441 {strides = array<i32>} : memref<1x128xf32, #tpu.memory_space<vmem>>, vector<1x128xf32>,
    %c0_207 = arith.constant 0 : index
    %c0_208 = arith.constant 0 : index
    %443 = vector.load %arg9[%c0_207, %c0_208] : memref<1x128xf32, #tpu.memory_space<vmem>>, vector<1x128xf32>
    %444 = arith.mulf %435, %443 : vector<1x128xf32>
    %445 = arith.mulf %438, %426 : vector<1x128xf32>
    %446 = arith.addf %444, %445 : vector<1x128xf32>
    %c0_209 = arith.constant 0 : index
    %c0_210 = arith.constant 0 : index
    %447 = vector.load %arg9[%c0_209, %c0_210] : memref<1x128xf32, #tpu.memory_space<vmem>>, vector<1x128xf32>
    tpu.vector_store %arg9[%c0_209, %c0_210], %446 {strides = array<i32>} : memref<1x128xf32, #tpu.memory_space<vmem>>, vector<1x128xf32>,
    %c0_211 = arith.constant 0 : index
    %c0_212 = arith.constant 0 : index
    %448 = vector.load %arg7[%c0_211, %c0_212] : memref<1x128xf32, #tpu.memory_space<vmem>>, vector<1x128xf32>
    tpu.vector_store %arg7[%c0_211, %c0_212], %432 {strides = array<i32>} : memref<1x128xf32, #tpu.memory_space<vmem>>, vector<1x128xf32>,
    %c0_213 = arith.constant 0 : index
    %c8 = arith.constant 8 : index
    %c0_214 = arith.constant 0 : index
    %449 = vector.load %arg1[%c0_213, %c8, %c0_214] : memref<1x11x384xf32, #tpu.memory_space<vmem>>, vector<1x1x384xf32>
    %450 = vector.shape_cast %449 : vector<1x1x384xf32> to vector<1x384xf32>
    %cst_215 = arith.constant dense<0.000000e+00> : vector<1x384xf32>
    %451 = tpu.matmul %426, %0, %cst_215 {dimension_numbers = #tpu.dot_dimension_numbers<[1], [0], [0], [1], [0, 0, 1, 1], [], []>} : vector<1x128xf32>, vector<128x384xf32>, vector<1x384xf32> -> vector<1x384xf32>
    %452 = vector.extract_strided_slice %450 {offsets = [0, 0], sizes = [1, 128], strides = [1, 1]} : vector<1x384xf32> to vector<1x128xf32>
    %453 = vector.extract_strided_slice %451 {offsets = [0, 0], sizes = [1, 128], strides = [1, 1]} : vector<1x384xf32> to vector<1x128xf32>
    %454 = arith.addf %452, %453 : vector<1x128xf32>
    %cst_216 = arith.constant 5.000000e-01 : f32
    %455 = vector.broadcast %cst_216 : f32 to vector<1x128xf32>
    %456 = arith.mulf %455, %454 : vector<1x128xf32>
    %457 = math.tanh %456 : vector<1x128xf32>
    %cst_217 = arith.constant 1.000000e+00 : f32
    %458 = vector.broadcast %cst_217 : f32 to vector<1x128xf32>
    %459 = arith.addf %458, %457 : vector<1x128xf32>
    %cst_218 = arith.constant 5.000000e-01 : f32
    %460 = vector.broadcast %cst_218 : f32 to vector<1x128xf32>
    %461 = arith.mulf %460, %459 : vector<1x128xf32>
    %462 = vector.extract_strided_slice %450 {offsets = [0, 128], sizes = [1, 128], strides = [1, 1]} : vector<1x384xf32> to vector<1x128xf32>
    %463 = vector.extract_strided_slice %451 {offsets = [0, 128], sizes = [1, 128], strides = [1, 1]} : vector<1x384xf32> to vector<1x128xf32>
    %464 = arith.addf %462, %463 : vector<1x128xf32>
    %cst_219 = arith.constant 5.000000e-01 : f32
    %465 = vector.broadcast %cst_219 : f32 to vector<1x128xf32>
    %466 = arith.mulf %465, %464 : vector<1x128xf32>
    %467 = math.tanh %466 : vector<1x128xf32>
    %cst_220 = arith.constant 1.000000e+00 : f32
    %468 = vector.broadcast %cst_220 : f32 to vector<1x128xf32>
    %469 = arith.addf %468, %467 : vector<1x128xf32>
    %cst_221 = arith.constant 5.000000e-01 : f32
    %470 = vector.broadcast %cst_221 : f32 to vector<1x128xf32>
    %471 = arith.mulf %470, %469 : vector<1x128xf32>
    %472 = vector.extract_strided_slice %450 {offsets = [0, 256], sizes = [1, 128], strides = [1, 1]} : vector<1x384xf32> to vector<1x128xf32>
    %473 = vector.extract_strided_slice %451 {offsets = [0, 256], sizes = [1, 128], strides = [1, 1]} : vector<1x384xf32> to vector<1x128xf32>
    %474 = arith.mulf %461, %473 : vector<1x128xf32>
    %475 = arith.addf %472, %474 : vector<1x128xf32>
    %476 = math.tanh %475 : vector<1x128xf32>
    %cst_222 = arith.constant 1.000000e+00 : f32
    %477 = vector.broadcast %cst_222 : f32 to vector<1x128xf32>
    %478 = arith.subf %477, %471 : vector<1x128xf32>
    %479 = arith.mulf %478, %476 : vector<1x128xf32>
    %480 = arith.mulf %471, %426 : vector<1x128xf32>
    %481 = arith.addf %479, %480 : vector<1x128xf32>
    %482 = arith.mulf %481, %1 : vector<1x128xf32>
    %cst_223 = arith.constant dense<0.000000e+00> : vector<1xf32>
    %483 = vector.multi_reduction <add>, %482, %cst_223 [1] : vector<1x128xf32> to vector<1xf32>
    %484 = vector.shape_cast %483 : vector<1xf32> to vector<1x1xf32>
    %c0_224 = arith.constant 0 : index
    %c0_225 = arith.constant 0 : index
    %485 = vector.load %arg7[%c0_224, %c0_225] : memref<1x128xf32, #tpu.memory_space<vmem>>, vector<1x128xf32>
    %486 = vector.broadcast %484 : vector<1x1xf32> to vector<1x128xf32>
    %487 = arith.maximumf %485, %486 : vector<1x128xf32>
    %c0_226 = arith.constant 0 : index
    %c0_227 = arith.constant 0 : index
    %488 = vector.load %arg7[%c0_226, %c0_227] : memref<1x128xf32, #tpu.memory_space<vmem>>, vector<1x128xf32>
    %489 = arith.subf %488, %487 : vector<1x128xf32>
    %490 = math.exp %489 : vector<1x128xf32>
    %491 = vector.broadcast %484 : vector<1x1xf32> to vector<1x128xf32>
    %492 = arith.subf %491, %487 : vector<1x128xf32>
    %493 = math.exp %492 : vector<1x128xf32>
    %c0_228 = arith.constant 0 : index
    %c0_229 = arith.constant 0 : index
    %494 = vector.load %arg8[%c0_228, %c0_229] : memref<1x128xf32, #tpu.memory_space<vmem>>, vector<1x128xf32>
    %495 = arith.mulf %490, %494 : vector<1x128xf32>
    %496 = arith.addf %495, %493 : vector<1x128xf32>
    %c0_230 = arith.constant 0 : index
    %c0_231 = arith.constant 0 : index
    %497 = vector.load %arg8[%c0_230, %c0_231] : memref<1x128xf32, #tpu.memory_space<vmem>>, vector<1x128xf32>
    tpu.vector_store %arg8[%c0_230, %c0_231], %496 {strides = array<i32>} : memref<1x128xf32, #tpu.memory_space<vmem>>, vector<1x128xf32>,
    %c0_232 = arith.constant 0 : index
    %c0_233 = arith.constant 0 : index
    %498 = vector.load %arg9[%c0_232, %c0_233] : memref<1x128xf32, #tpu.memory_space<vmem>>, vector<1x128xf32>
    %499 = arith.mulf %490, %498 : vector<1x128xf32>
    %500 = arith.mulf %493, %481 : vector<1x128xf32>
    %501 = arith.addf %499, %500 : vector<1x128xf32>
    %c0_234 = arith.constant 0 : index
    %c0_235 = arith.constant 0 : index
    %502 = vector.load %arg9[%c0_234, %c0_235] : memref<1x128xf32, #tpu.memory_space<vmem>>, vector<1x128xf32>
    tpu.vector_store %arg9[%c0_234, %c0_235], %501 {strides = array<i32>} : memref<1x128xf32, #tpu.memory_space<vmem>>, vector<1x128xf32>,
    %c0_236 = arith.constant 0 : index
    %c0_237 = arith.constant 0 : index
    %503 = vector.load %arg7[%c0_236, %c0_237] : memref<1x128xf32, #tpu.memory_space<vmem>>, vector<1x128xf32>
    tpu.vector_store %arg7[%c0_236, %c0_237], %487 {strides = array<i32>} : memref<1x128xf32, #tpu.memory_space<vmem>>, vector<1x128xf32>,
    %c0_238 = arith.constant 0 : index
    %c9 = arith.constant 9 : index
    %c0_239 = arith.constant 0 : index
    %504 = vector.load %arg1[%c0_238, %c9, %c0_239] : memref<1x11x384xf32, #tpu.memory_space<vmem>>, vector<1x1x384xf32>
    %505 = vector.shape_cast %504 : vector<1x1x384xf32> to vector<1x384xf32>
    %cst_240 = arith.constant dense<0.000000e+00> : vector<1x384xf32>
    %506 = tpu.matmul %481, %0, %cst_240 {dimension_numbers = #tpu.dot_dimension_numbers<[1], [0], [0], [1], [0, 0, 1, 1], [], []>} : vector<1x128xf32>, vector<128x384xf32>, vector<1x384xf32> -> vector<1x384xf32>
    %507 = vector.extract_strided_slice %505 {offsets = [0, 0], sizes = [1, 128], strides = [1, 1]} : vector<1x384xf32> to vector<1x128xf32>
    %508 = vector.extract_strided_slice %506 {offsets = [0, 0], sizes = [1, 128], strides = [1, 1]} : vector<1x384xf32> to vector<1x128xf32>
    %509 = arith.addf %507, %508 : vector<1x128xf32>
    %cst_241 = arith.constant 5.000000e-01 : f32
    %510 = vector.broadcast %cst_241 : f32 to vector<1x128xf32>
    %511 = arith.mulf %510, %509 : vector<1x128xf32>
    %512 = math.tanh %511 : vector<1x128xf32>
    %cst_242 = arith.constant 1.000000e+00 : f32
    %513 = vector.broadcast %cst_242 : f32 to vector<1x128xf32>
    %514 = arith.addf %513, %512 : vector<1x128xf32>
    %cst_243 = arith.constant 5.000000e-01 : f32
    %515 = vector.broadcast %cst_243 : f32 to vector<1x128xf32>
    %516 = arith.mulf %515, %514 : vector<1x128xf32>
    %517 = vector.extract_strided_slice %505 {offsets = [0, 128], sizes = [1, 128], strides = [1, 1]} : vector<1x384xf32> to vector<1x128xf32>
    %518 = vector.extract_strided_slice %506 {offsets = [0, 128], sizes = [1, 128], strides = [1, 1]} : vector<1x384xf32> to vector<1x128xf32>
    %519 = arith.addf %517, %518 : vector<1x128xf32>
    %cst_244 = arith.constant 5.000000e-01 : f32
    %520 = vector.broadcast %cst_244 : f32 to vector<1x128xf32>
    %521 = arith.mulf %520, %519 : vector<1x128xf32>
    %522 = math.tanh %521 : vector<1x128xf32>
    %cst_245 = arith.constant 1.000000e+00 : f32
    %523 = vector.broadcast %cst_245 : f32 to vector<1x128xf32>
    %524 = arith.addf %523, %522 : vector<1x128xf32>
    %cst_246 = arith.constant 5.000000e-01 : f32
    %525 = vector.broadcast %cst_246 : f32 to vector<1x128xf32>
    %526 = arith.mulf %525, %524 : vector<1x128xf32>
    %527 = vector.extract_strided_slice %505 {offsets = [0, 256], sizes = [1, 128], strides = [1, 1]} : vector<1x384xf32> to vector<1x128xf32>
    %528 = vector.extract_strided_slice %506 {offsets = [0, 256], sizes = [1, 128], strides = [1, 1]} : vector<1x384xf32> to vector<1x128xf32>
    %529 = arith.mulf %516, %528 : vector<1x128xf32>
    %530 = arith.addf %527, %529 : vector<1x128xf32>
    %531 = math.tanh %530 : vector<1x128xf32>
    %cst_247 = arith.constant 1.000000e+00 : f32
    %532 = vector.broadcast %cst_247 : f32 to vector<1x128xf32>
    %533 = arith.subf %532, %526 : vector<1x128xf32>
    %534 = arith.mulf %533, %531 : vector<1x128xf32>
    %535 = arith.mulf %526, %481 : vector<1x128xf32>
    %536 = arith.addf %534, %535 : vector<1x128xf32>
    %537 = arith.mulf %536, %1 : vector<1x128xf32>
    %cst_248 = arith.constant dense<0.000000e+00> : vector<1xf32>
    %538 = vector.multi_reduction <add>, %537, %cst_248 [1] : vector<1x128xf32> to vector<1xf32>
    %539 = vector.shape_cast %538 : vector<1xf32> to vector<1x1xf32>
    %c0_249 = arith.constant 0 : index
    %c0_250 = arith.constant 0 : index
    %540 = vector.load %arg7[%c0_249, %c0_250] : memref<1x128xf32, #tpu.memory_space<vmem>>, vector<1x128xf32>
    %541 = vector.broadcast %539 : vector<1x1xf32> to vector<1x128xf32>
    %542 = arith.maximumf %540, %541 : vector<1x128xf32>
    %c0_251 = arith.constant 0 : index
    %c0_252 = arith.constant 0 : index
    %543 = vector.load %arg7[%c0_251, %c0_252] : memref<1x128xf32, #tpu.memory_space<vmem>>, vector<1x128xf32>
    %544 = arith.subf %543, %542 : vector<1x128xf32>
    %545 = math.exp %544 : vector<1x128xf32>
    %546 = vector.broadcast %539 : vector<1x1xf32> to vector<1x128xf32>
    %547 = arith.subf %546, %542 : vector<1x128xf32>
    %548 = math.exp %547 : vector<1x128xf32>
    %c0_253 = arith.constant 0 : index
    %c0_254 = arith.constant 0 : index
    %549 = vector.load %arg8[%c0_253, %c0_254] : memref<1x128xf32, #tpu.memory_space<vmem>>, vector<1x128xf32>
    %550 = arith.mulf %545, %549 : vector<1x128xf32>
    %551 = arith.addf %550, %548 : vector<1x128xf32>
    %c0_255 = arith.constant 0 : index
    %c0_256 = arith.constant 0 : index
    %552 = vector.load %arg8[%c0_255, %c0_256] : memref<1x128xf32, #tpu.memory_space<vmem>>, vector<1x128xf32>
    tpu.vector_store %arg8[%c0_255, %c0_256], %551 {strides = array<i32>} : memref<1x128xf32, #tpu.memory_space<vmem>>, vector<1x128xf32>,
    %c0_257 = arith.constant 0 : index
    %c0_258 = arith.constant 0 : index
    %553 = vector.load %arg9[%c0_257, %c0_258] : memref<1x128xf32, #tpu.memory_space<vmem>>, vector<1x128xf32>
    %554 = arith.mulf %545, %553 : vector<1x128xf32>
    %555 = arith.mulf %548, %536 : vector<1x128xf32>
    %556 = arith.addf %554, %555 : vector<1x128xf32>
    %c0_259 = arith.constant 0 : index
    %c0_260 = arith.constant 0 : index
    %557 = vector.load %arg9[%c0_259, %c0_260] : memref<1x128xf32, #tpu.memory_space<vmem>>, vector<1x128xf32>
    tpu.vector_store %arg9[%c0_259, %c0_260], %556 {strides = array<i32>} : memref<1x128xf32, #tpu.memory_space<vmem>>, vector<1x128xf32>,
    %c0_261 = arith.constant 0 : index
    %c0_262 = arith.constant 0 : index
    %558 = vector.load %arg7[%c0_261, %c0_262] : memref<1x128xf32, #tpu.memory_space<vmem>>, vector<1x128xf32>
    tpu.vector_store %arg7[%c0_261, %c0_262], %542 {strides = array<i32>} : memref<1x128xf32, #tpu.memory_space<vmem>>, vector<1x128xf32>,
    %c0_263 = arith.constant 0 : index
    %c10 = arith.constant 10 : index
    %c0_264 = arith.constant 0 : index
    %559 = vector.load %arg1[%c0_263, %c10, %c0_264] : memref<1x11x384xf32, #tpu.memory_space<vmem>>, vector<1x1x384xf32>
    %560 = vector.shape_cast %559 : vector<1x1x384xf32> to vector<1x384xf32>
    %cst_265 = arith.constant dense<0.000000e+00> : vector<1x384xf32>
    %561 = tpu.matmul %536, %0, %cst_265 {dimension_numbers = #tpu.dot_dimension_numbers<[1], [0], [0], [1], [0, 0, 1, 1], [], []>} : vector<1x128xf32>, vector<128x384xf32>, vector<1x384xf32> -> vector<1x384xf32>
    %562 = vector.extract_strided_slice %560 {offsets = [0, 0], sizes = [1, 128], strides = [1, 1]} : vector<1x384xf32> to vector<1x128xf32>
    %563 = vector.extract_strided_slice %561 {offsets = [0, 0], sizes = [1, 128], strides = [1, 1]} : vector<1x384xf32> to vector<1x128xf32>
    %564 = arith.addf %562, %563 : vector<1x128xf32>
    %cst_266 = arith.constant 5.000000e-01 : f32
    %565 = vector.broadcast %cst_266 : f32 to vector<1x128xf32>
    %566 = arith.mulf %565, %564 : vector<1x128xf32>
    %567 = math.tanh %566 : vector<1x128xf32>
    %cst_267 = arith.constant 1.000000e+00 : f32
    %568 = vector.broadcast %cst_267 : f32 to vector<1x128xf32>
    %569 = arith.addf %568, %567 : vector<1x128xf32>
    %cst_268 = arith.constant 5.000000e-01 : f32
    %570 = vector.broadcast %cst_268 : f32 to vector<1x128xf32>
    %571 = arith.mulf %570, %569 : vector<1x128xf32>
    %572 = vector.extract_strided_slice %560 {offsets = [0, 128], sizes = [1, 128], strides = [1, 1]} : vector<1x384xf32> to vector<1x128xf32>
    %573 = vector.extract_strided_slice %561 {offsets = [0, 128], sizes = [1, 128], strides = [1, 1]} : vector<1x384xf32> to vector<1x128xf32>
    %574 = arith.addf %572, %573 : vector<1x128xf32>
    %cst_269 = arith.constant 5.000000e-01 : f32
    %575 = vector.broadcast %cst_269 : f32 to vector<1x128xf32>
    %576 = arith.mulf %575, %574 : vector<1x128xf32>
    %577 = math.tanh %576 : vector<1x128xf32>
    %cst_270 = arith.constant 1.000000e+00 : f32
    %578 = vector.broadcast %cst_270 : f32 to vector<1x128xf32>
    %579 = arith.addf %578, %577 : vector<1x128xf32>
    %cst_271 = arith.constant 5.000000e-01 : f32
    %580 = vector.broadcast %cst_271 : f32 to vector<1x128xf32>
    %581 = arith.mulf %580, %579 : vector<1x128xf32>
    %582 = vector.extract_strided_slice %560 {offsets = [0, 256], sizes = [1, 128], strides = [1, 1]} : vector<1x384xf32> to vector<1x128xf32>
    %583 = vector.extract_strided_slice %561 {offsets = [0, 256], sizes = [1, 128], strides = [1, 1]} : vector<1x384xf32> to vector<1x128xf32>
    %584 = arith.mulf %571, %583 : vector<1x128xf32>
    %585 = arith.addf %582, %584 : vector<1x128xf32>
    %586 = math.tanh %585 : vector<1x128xf32>
    %cst_272 = arith.constant 1.000000e+00 : f32
    %587 = vector.broadcast %cst_272 : f32 to vector<1x128xf32>
    %588 = arith.subf %587, %581 : vector<1x128xf32>
    %589 = arith.mulf %588, %586 : vector<1x128xf32>
    %590 = arith.mulf %581, %536 : vector<1x128xf32>
    %591 = arith.addf %589, %590 : vector<1x128xf32>
    %592 = arith.mulf %591, %1 : vector<1x128xf32>
    %cst_273 = arith.constant dense<0.000000e+00> : vector<1xf32>
    %593 = vector.multi_reduction <add>, %592, %cst_273 [1] : vector<1x128xf32> to vector<1xf32>
    %594 = vector.shape_cast %593 : vector<1xf32> to vector<1x1xf32>
    %c0_274 = arith.constant 0 : index
    %c0_275 = arith.constant 0 : index
    %595 = vector.load %arg7[%c0_274, %c0_275] : memref<1x128xf32, #tpu.memory_space<vmem>>, vector<1x128xf32>
    %596 = vector.broadcast %594 : vector<1x1xf32> to vector<1x128xf32>
    %597 = arith.maximumf %595, %596 : vector<1x128xf32>
    %c0_276 = arith.constant 0 : index
    %c0_277 = arith.constant 0 : index
    %598 = vector.load %arg7[%c0_276, %c0_277] : memref<1x128xf32, #tpu.memory_space<vmem>>, vector<1x128xf32>
    %599 = arith.subf %598, %597 : vector<1x128xf32>
    %600 = math.exp %599 : vector<1x128xf32>
    %601 = vector.broadcast %594 : vector<1x1xf32> to vector<1x128xf32>
    %602 = arith.subf %601, %597 : vector<1x128xf32>
    %603 = math.exp %602 : vector<1x128xf32>
    %c0_278 = arith.constant 0 : index
    %c0_279 = arith.constant 0 : index
    %604 = vector.load %arg8[%c0_278, %c0_279] : memref<1x128xf32, #tpu.memory_space<vmem>>, vector<1x128xf32>
    %605 = arith.mulf %600, %604 : vector<1x128xf32>
    %606 = arith.addf %605, %603 : vector<1x128xf32>
    %c0_280 = arith.constant 0 : index
    %c0_281 = arith.constant 0 : index
    %607 = vector.load %arg8[%c0_280, %c0_281] : memref<1x128xf32, #tpu.memory_space<vmem>>, vector<1x128xf32>
    tpu.vector_store %arg8[%c0_280, %c0_281], %606 {strides = array<i32>} : memref<1x128xf32, #tpu.memory_space<vmem>>, vector<1x128xf32>,
    %c0_282 = arith.constant 0 : index
    %c0_283 = arith.constant 0 : index
    %608 = vector.load %arg9[%c0_282, %c0_283] : memref<1x128xf32, #tpu.memory_space<vmem>>, vector<1x128xf32>
    %609 = arith.mulf %600, %608 : vector<1x128xf32>
    %610 = arith.mulf %603, %591 : vector<1x128xf32>
    %611 = arith.addf %609, %610 : vector<1x128xf32>
    %c0_284 = arith.constant 0 : index
    %c0_285 = arith.constant 0 : index
    %612 = vector.load %arg9[%c0_284, %c0_285] : memref<1x128xf32, #tpu.memory_space<vmem>>, vector<1x128xf32>
    tpu.vector_store %arg9[%c0_284, %c0_285], %611 {strides = array<i32>} : memref<1x128xf32, #tpu.memory_space<vmem>>, vector<1x128xf32>,
    %c0_286 = arith.constant 0 : index
    %c0_287 = arith.constant 0 : index
    %613 = vector.load %arg7[%c0_286, %c0_287] : memref<1x128xf32, #tpu.memory_space<vmem>>, vector<1x128xf32>
    tpu.vector_store %arg7[%c0_286, %c0_287], %597 {strides = array<i32>} : memref<1x128xf32, #tpu.memory_space<vmem>>, vector<1x128xf32>,
    %c0_288 = arith.constant 0 : index
    %c0_289 = arith.constant 0 : index
    %614 = vector.load %arg9[%c0_288, %c0_289] : memref<1x128xf32, #tpu.memory_space<vmem>>, vector<1x128xf32>
    %c0_290 = arith.constant 0 : index
    %c0_291 = arith.constant 0 : index
    %615 = vector.load %arg8[%c0_290, %c0_291] : memref<1x128xf32, #tpu.memory_space<vmem>>, vector<1x128xf32>
    %616 = arith.divf %614, %615 : vector<1x128xf32>
    %c0_292 = arith.constant 0 : index
    %c0_293 = arith.constant 0 : index
    %617 = vector.load %arg4[%c0_292, %c0_293] : memref<128x128xf32, #tpu.memory_space<vmem>>, vector<128x128xf32>
    %cst_294 = arith.constant dense<0.000000e+00> : vector<1x128xf32>
    %618 = tpu.matmul %616, %617, %cst_294 {dimension_numbers = #tpu.dot_dimension_numbers<[1], [0], [0], [1], [0, 0, 1, 1], [], []>} : vector<1x128xf32>, vector<128x128xf32>, vector<1x128xf32> -> vector<1x128xf32>
    %c0_295 = arith.constant 0 : index
    %c0_296 = arith.constant 0 : index
    %619 = vector.load %arg5[%c0_295, %c0_296] : memref<1x128xf32, #tpu.memory_space<vmem>>, vector<1x128xf32>
    %620 = arith.addf %618, %619 : vector<1x128xf32>
    %c0_297 = arith.constant 0 : index
    %c0_298 = arith.constant 0 : index
    %c0_299 = arith.constant 0 : index
    %621 = vector.load %arg6[%c0_297, %c0_298, %c0_299] : memref<1x1x128xf32, #tpu.memory_space<vmem>>, vector<1x1x128xf32>
    %622 = vector.shape_cast %621 : vector<1x1x128xf32> to vector<1x128xf32>
    %623 = vector.shape_cast %620 : vector<1x128xf32> to vector<1x1x128xf32>
    tpu.vector_store %arg6[%c0_297, %c0_298, %c0_299], %623 {strides = array<i32>} : memref<1x1x128xf32, #tpu.memory_space<vmem>>, vector<1x1x128xf32>,
    return
  }
  func.func @transform_0(%arg0: i32) -> (i32, i32, i32) {
    %c0_i32 = arith.constant 0 : i32
    %c0_i32_0 = arith.constant 0 : i32
    %c0_i32_1 = arith.constant 0 : i32
    return %arg0, %c0_i32, %c0_i32_0 : i32, i32, i32
  }
  func.func @transform_1(%arg0: i32) -> (i32, i32) {
    %c0_i32 = arith.constant 0 : i32
    %c0_i32_0 = arith.constant 0 : i32
    %c0_i32_1 = arith.constant 0 : i32
    return %c0_i32, %c0_i32_0 : i32, i32
  }
  func.func @transform_2(%arg0: i32) -> (i32, i32) {
    %c0_i32 = arith.constant 0 : i32
    %c0_i32_0 = arith.constant 0 : i32
    %c0_i32_1 = arith.constant 0 : i32
    return %c0_i32, %c0_i32_0 : i32, i32
  }
  func.func @transform_3(%arg0: i32) -> (i32, i32) {
    %c0_i32 = arith.constant 0 : i32
    %c0_i32_0 = arith.constant 0 : i32
    %c0_i32_1 = arith.constant 0 : i32
    return %c0_i32, %c0_i32_0 : i32, i32
  }
  func.func @transform_4(%arg0: i32) -> (i32, i32) {
    %c0_i32 = arith.constant 0 : i32
    %c0_i32_0 = arith.constant 0 : i32
    %c0_i32_1 = arith.constant 0 : i32
    return %c0_i32, %c0_i32_0 : i32, i32
  }
  func.func @transform_5(%arg0: i32) -> (i32, i32, i32) {
    %c0_i32 = arith.constant 0 : i32
    %c0_i32_0 = arith.constant 0 : i32
    %c0_i32_1 = arith.constant 0 : i32
    return %arg0, %c0_i32, %c0_i32_0 : i32, i32, i32
  }
}

</mosaic_0001>

<bundles_post_ra>
// kernel: reverse
= control target key start
LH: loop header
LB: loop body
LE: loop exit
PB: predicated region body
PF: predicated region fallthrough
CT: control target
= control target key end

     0   :  { %v2_v0 = vlaneseq  ;;  %s305_s0 = inlined_call_operand.vmem [shape: bf16[2,256], index: 0, kind: input, shape index: {}]   ;;  %s306_s1 = inlined_call_operand.vmem [shape: bf16[2,256], index: 1, kind: output, shape index: {}]  }
   0x2   :  { %v3_v1 = vsub.s32 127, %v2_v0 }
   0x4   :  { %4 = vset.pattern.permute.xlu0 %v3_v1 }
   0x5   :  { %s265_s6 = smov 0   ;;  %s267_s7 = smov 0  }
   0x6   :  { %s269_s8 = smov 0  }
   0x7 LB: > { %s199_s9 = sadd.s32 4294967295, %s252_s8   ;;  %s19_s10 = sadd.s32 1, %s248_s7  ;;  %s252_s8 = sphi %s269_s8, %s10_s8   ;;  %s248_s7 = sphi %s267_s7, %s308_s7   ;;  %s244_s6 = sphi %s265_s6, %s307_s6  }
   0x8   : > { %p20_p0 = scmp.ge.s32.totalorder %s19_s10, 2  ;;  %p201_p1 = scmp.ge.s32.totalorder %s252_s8, 2 }
   0x9   : > { %s38_s11 = sand.u32 (!%p201_p1), 1, %s252_s8   ;;  %s40_s12 = ssub.s32 (!%p201_p1), 1, %s248_s7 }
   0xa   : > { %s310_s10 = smov (%p20_p0, %s19_s10), 0  ;;  %36 = sbr.rel (%p201_p1) target bundleno = 17 (0x11), region = 16 }
   0xb   : > { %s43_s15 = scalar_lea.vmem (!%p201_p1), %s305_s0, %s40_s12  ;;  %s39_s16 = scalar_lea.vmem (!%p201_p1), [#allocation1], %s38_s11 }
   0xc   : > { %v59_v2 = vld [vmem:[%s43_s15] sm:$0x1] (!%p201_p1) }
   0xd   : > { %60 = vst [vmem:[%s39_s16] sm:$0x1] (!%p201_p1), %v59_v2 }
  0x11 PF: > { %p202_p2 = scmp.ge.s32.totalorder %s252_s8, 1  ;;  %p76_p3 = scmp.lt.s32.totalorder %s252_s8, 3 }
  0x13   : > { %p77_p4 = pnand %p202_p2, %p76_p3 }
  0x14   : > { %s86_s17 = sand.u32 (!%p77_p4), 1, %s199_s9   ;;  %v254_v8 = vmov (!%p77_p4), 0.0   ;;  %s125_s22 = scalar_lea.vmem (!%p77_p4), %s306_s1, %s244_s6 }
  0x15   : > { %80 = sbr.rel (%p77_p4) target bundleno = 180 (0xb4), region = 50  ;;  %s87_s18 = scalar_lea.vmem (!%p77_p4), [#allocation1], %s86_s17 }
  0x16   : > { %v103_v3 = vld [vmem:[%s87_s18] sm:$0x1] (!%p77_p4)  ;;  %s90_s19 = scalar_lea.vmem (!%p77_p4), [#allocation3], %s86_s17 }
  0x17   : > { %v104_v4 = vunpack.c.l.bf16 (!%p77_p4), %v103_v3 }
  0x19   : > { %106 = vst [vmem:[#allocation0] sm:$0x3] (!%p77_p4), %v104_v4 }
  0x20   : > { %v108_v5 = vld [vmem:[#allocation0] sm:$0xff] }
  0x21   : > { %109 = vperm.xlu0 %4, %v108_v5  }
  0xa0   : > { %v110_v6 = vpop.permute.xlu0 %109 }
  0xa1   : > { %111 = vst [vmem:[#allocation2] sm:$0xff] %v110_v6 }
  0xa8   : > { %v116_v7 = vld [vmem:[#allocation2] sm:$0x3] }
  0xa9   : > { %v117_v9 = vpack.c.bf16 %v254_v8, %v116_v7 }
  0xab   : > { %119 = vst [vmem:[%s90_s19] sm:$0x1] %v117_v9 }
  0xb2   : > { %v141_v10 = vld [vmem:[%s90_s19] sm:$0x1] }
  0xb3   : > { %142 = vst [vmem:[%s125_s22] sm:$0x1] %v141_v10 }
  0xb4 PF: > { %s10_s8 = sadd.s32 1, %s252_s8   ;;  %s307_s6 = smov %s248_s7 }
  0xb5   : > { %p7_p5 = scmp.ge.s32.totalorder %s10_s8, 4   ;;  %s308_s7 = smov %s310_s10 }
  0xb7   :  { %9 = sbr.rel (!%p7_p5) target bundleno = 7 (0x7), region = 110 }

// kernel: _lambda_.4
= control target key start
LH: loop header
LB: loop body
LE: loop exit
PB: predicated region body
PF: predicated region fallthrough
CT: control target
= control target key end

     0   :  { %s1031_s21 = smov 0   ;;  %s1231_s0 = inlined_call_operand.vmem [shape: f32[2,11,64], index: 0, kind: input, shape index: {}]   ;;  %s1232_s1 = inlined_call_operand.vmem [shape: bf16[64,192], index: 1, kind: input, shape index: {}]   ;;  %s1233_s2 = inlined_call_operand.vmem [shape: f32[1,64], index: 2, kind: input, shape index: {}]   ;;  %s1234_s3 = inlined_call_operand.vmem [shape: bf16[64,192], index: 3, kind: input, shape index: {}]   ;;  %s1235_s4 = inlined_call_operand.vmem [shape: f32[1,64], index: 4, kind: input, shape index: {}]   ;;  %s1236_s5 = inlined_call_operand.vmem [shape: f32[64,384], index: 5, kind: input, shape index: {}]   ;;  %s1237_s6 = inlined_call_operand.vmem [shape: f32[2,11,384], index: 6, kind: output, shape index: {}]  }
   0x1 LB: > { %s849_s22 = sadd.s32 4294967295, %s991_s21   ;;  %p853_p0 = scmp.ge.s32.totalorder %s991_s21, 1  ;;  %s991_s21 = sphi %s1031_s21, %s16_s21  }
   0x2   : > { %p212_p1 = scmp.lt.s32.totalorder %s991_s21, 3 }
   0x4   : > { %p213_p2 = pnand %p853_p0, %p212_p1 }
   0x5   : > { %p242_p3 = scmp.lt.s32.totalorder (!%p213_p2), %s849_s22, 1  ;;  %vm259_vm0 = vcmask (!%p213_p2), 518144   ;;  %vm255_vm1 = vcmask (!%p213_p2), 523264   ;;  %vm263_vm2 = vcmask (!%p213_p2), 1042432   ;;  %v957_v21 = vld [vmem:[%s1232_s1 + $0x4] ss:$8 sps:$4 sm:$0xff] (!%p213_p2)  }
   0x6   : > { %216 = sbr.rel (%p213_p2) target bundleno = 1517 (0x5ed), region = 44  ;;  %v959_v22 = vld [vmem:[%s1232_s1] ss:$8 sps:$4 sm:$0xff] (!%p213_p2)   ;;  %v960_v23 = vld [vmem:[%s1232_s1 + $0x14] ss:$8 sps:$4 sm:$0xff] (!%p213_p2)   ;;  %358 = vmatprep.subr.bf16.mxu0 (!%p213_p2), %v957_v21  ;;  %v993_v25 = vmov (!%p213_p2), 0  }
   0x7   : > { %359 = vmatpush1.bf16.msra.mxu0 (!%p213_p2), %v959_v22  ;;  %v962_v24 = vld [vmem:[%s1232_s1 + $0x10] ss:$8 sps:$4 sm:$0xff] (!%p213_p2)   ;;  %390 = vmatprep.mubr.bf16.mxu0 (!%p213_p2), %v993_v25  ;;  %v963_v26 = vld [vmem:[%s1232_s1 + $0x24] ss:$8 sps:$4 sm:$0xff] (!%p213_p2)   ;;  %v965_v27 = vld [vmem:[%s1232_s1 + $0x20] ss:$8 sps:$4 sm:$0xff] (!%p213_p2)  }
   0x8   : > { %360 = vmatprep.subr.bf16.mxu0 (!%p213_p2), %v960_v23  ;;  %536 = vmatprep.mubr.bf16.mxu1 (!%p213_p2), %v993_v25  ;;  %v966_v28 = vld [vmem:[%s1232_s1 + $0x34] ss:$8 sps:$4 sm:$0xff] (!%p213_p2)   ;;  %v968_v29 = vld [vmem:[%s1232_s1 + $0x30] ss:$8 sps:$4 sm:$0xff] (!%p213_p2)   ;;  %vm403_vm5 = vcmask (!%p213_p2), 1040384   ;;  %vm420_vm6 = vcmask (!%p213_p2), 1046528  }
   0x9   : > { %s994_s19 = smov (!%p213_p2), 64   ;;  %v866_v61 = vld [vmem:[%s1233_s2] ss:$0 sm:$0xff] (!%p213_p2)  ;;  %v969_v63 = vld [vmem:[%s1234_s3 + $0x4] ss:$8 sps:$4 sm:$0xff] (!%p213_p2)   ;;  %vm425_vm7 = vcmask (!%p213_p2), 1041408  }
   0xa   : > { %504 = vmatprep.subr.bf16.mxu1 (!%p213_p2), %v969_v63  ;;  %v876_v23 = vld [vmem:[%s1235_s4] ss:$0 sm:$0xff] (!%p213_p2)  ;;  %v616_v63 = vld [vmem:[%s1236_s5 + $0x70] sm:$0xff] (!%p213_p2) }
   0xb   : > { %361 = vmatpush1.bf16.msra.mxu0 (!%p213_p2), %v962_v24 }
   0xc   : > { %362 = vmatprep.subr.bf16.mxu0 (!%p213_p2), %v963_v26 }
   0xd   : > { %s1239_s22 = smov (!%p242_p3, %s849_s22), 1 }
   0xe   : > { %s883_s23 = sshll.u32 %s1239_s22, 4  ;;  %s945_s27 = smul.u32 48, %s1239_s22 }
   0xf   : > { %s246_s26 = scalar_lea.vmem %s1231_s0, %s883_s23  ;;  %363 = vmatpush1.bf16.msra.mxu0 %v965_v27 }
  0x10   : > { %v254_v0 = vld [vmem:[%s246_s26 + $0x8] sm:$0x7]  ;;  %v253_v1 = vld [vmem:[%s246_s26] sm:$0xff]  ;;  %364 = vmatprep.subr.bf16.mxu0 %v966_v28  ;;  %s251_s30 = scalar_lea.vmem %s1237_s6, %s945_s27 }
  0x11   : > { %v260_v2 = vsel %vm259_vm0, %v254_v0, 0.0  ;;  %v256_v3 = vsel %vm255_vm1, %v253_v1, 0.0 }
  0x12   : > { %261 = vadd.xlane.f32.xlu0 %v260_v2  ;;  %v974_v2 = vld [vmem:[%s1234_s3 + $0x10] ss:$8 sps:$4 sm:$0xff]  }
  0x13   : > { %365 = vmatpush1.bf16.msra.mxu0 %v968_v29 }
  0x16   : > { %257 = vadd.xlane.f32.xlu0 %v256_v3 }
  0x9f   : > { %v262_v4 = vpop.xlane.xlu0 %261 }
  0xa0   : > { %v264_v5 = vsel %vm263_vm2, %v262_v4, 0.0  ;;  %v975_v4 = vld [vmem:[%s1234_s3 + $0x24] ss:$8 sps:$4 sm:$0xff]  }
  0xa3   : > { %v258_v6 = vpop.xlane.xlu0 %257 }
  0xa4   : > { %v265_v7 = vadd.f32 %v264_v5, %v258_v6  ;;  %v977_v5 = vld [vmem:[%s1234_s3 + $0x20] ss:$8 sps:$4 sm:$0xff]   ;;  %v978_v6 = vld [vmem:[%s1234_s3 + $0x34] ss:$8 sps:$4 sm:$0xff]  }
  0xa6   : > { %v266_v8 = vrot.slane %v265_v7, 4 }
  0xa8   : > { %v267_v9 = vadd.f32 %v266_v8, %v265_v7  ;;  %v980_v7 = vld [vmem:[%s1234_s3 + $0x30] ss:$8 sps:$4 sm:$0xff]  }
  0xaa   : > { %v268_v10 = vrot.slane %v267_v9, 2 }
  0xac   : > { %v269_v11 = vadd.f32 %v268_v10, %v267_v9 }
  0xae   : > { %v270_v12 = vrot.slane %v269_v11, 1 }
  0xb0   : > { %v271_v13 = vadd.f32 %v270_v12, %v269_v11 }
  0xb2   : > { %v273_v14 = vmul.f32 0.0014204546, %v271_v13 }
  0xb4   : > { %v275_v15 = vsub.f32 %v254_v0, %v273_v14  ;;  %v274_v16 = vsub.f32 %v253_v1, %v273_v14  ;;  %v971_v0 = vld [vmem:[%s1234_s3] ss:$8 sps:$4 sm:$0xff]   ;;  %v972_v1 = vld [vmem:[%s1234_s3 + $0x14] ss:$8 sps:$4 sm:$0xff]  }
  0xb5   : > { %505 = vmatpush1.bf16.msra.mxu1 %v971_v0  ;;  %v619_v0 = vld [vmem:[%s1236_s5 + $0x88] sm:$0xff] }
  0xb6   : > { %v277_v17 = vmul.f32 %v275_v15, %v275_v15  ;;  %v276_v19 = vmul.f32 %v274_v16, %v274_v16  ;;  %506 = vmatprep.subr.bf16.mxu1 %v972_v1 }
  0xb8   : > { %v281_v18 = vsel %vm259_vm0, %v277_v17, 0.0  ;;  %v278_v20 = vsel %vm255_vm1, %v276_v19, 0.0 }
  0xb9   : > { %282 = vadd.xlane.f32.xlu1 %v281_v18  ;;  %507 = vmatpush1.bf16.msra.mxu1 %v974_v2  ;;  %v937_v2 = vpack.c.bf16 %v619_v0, %v616_v63 }
  0xba   : > { %508 = vmatprep.subr.bf16.mxu1 %v975_v4  ;;  %v620_v4 = vld [vmem:[%s1236_s5 + $0x90] sm:$0xff] }
  0xbd   : > { %279 = vadd.xlane.f32.xlu1 %v278_v20  ;;  %509 = vmatpush1.bf16.msra.mxu1 %v977_v5  ;;  %v623_v5 = vld [vmem:[%s1236_s5 + $0xa8] sm:$0xff] }
  0xbe   : > { %510 = vmatprep.subr.bf16.mxu1 %v978_v6  ;;  %v927_v6 = vpack.c.bf16 %v623_v5, %v620_v4 }
  0xc1   : > { %511 = vmatpush1.bf16.msra.mxu1 %v980_v7 }
 0x146   : > { %v283_v30 = vpop.xlane.xlu1 %282 }
 0x147   : > { %v284_v31 = vsel %vm263_vm2, %v283_v30, 0.0 }
 0x14a   : > { %v280_v32 = vpop.xlane.xlu1 %279 }
 0x14b   : > { %v285_v33 = vadd.f32 %v284_v31, %v280_v32 }
 0x14d   : > { %v286_v34 = vrot.slane %v285_v33, 4 }
 0x14f   : > { %v287_v35 = vadd.f32 %v286_v34, %v285_v33 }
 0x151   : > { %v288_v36 = vrot.slane %v287_v35, 2 }
 0x153   : > { %v289_v37 = vadd.f32 %v288_v36, %v287_v35  ;;  %v603_v35 = vld [vmem:[%s1236_s5 + $0x8] sm:$0xff]  ;;  %v606_v36 = vld [vmem:[%s1236_s5 + $0x20] sm:$0xff] }
 0x155   : > { %v290_v38 = vrot.slane %v289_v37, 1 }
 0x157   : > { %v291_v39 = vadd.f32 %v290_v38, %v289_v37  ;;  %v602_v37 = vld [vmem:[%s1236_s5] sm:$0xff]  ;;  %v913_v38 = vpack.c.bf16 %v606_v36, %v603_v35 }
 0x159   : > { %v293_v40 = vmul.f32 0.0014224751, %v291_v39  ;;  %v605_v39 = vld [vmem:[%s1236_s5 + $0x18] sm:$0xff]  ;;  %914 = vmatprep.subr.bf16.mxu0 %v913_v38 }
 0x15b   : > { %981 = vrsqrt.f32 %v293_v40  ;;  %vm296_vm3 = vcmp.eq.f32.partialorder %v293_v40, inf  ;;  %v299_v43 = vand.u32 2147483648, %v293_v40  ;;  %vm298_vm4 = vcmp.eq.f32.partialorder %v293_v40, 0.0 }
 0x165   : > { %v982_v41 = vpop.eup %981 }
 0x166   : > { %v295_v42 = vmul.f32 %v982_v41, %v293_v40  ;;  %v612_v41 = vld [vmem:[%s1236_s5 + $0x50] sm:$0xff] }
 0x168   : > { %v297_v44 = vsel %vm296_vm3, %v293_v40, %v295_v42  ;;  %v609_v40 = vld [vmem:[%s1236_s5 + $0x38] sm:$0xff]  ;;  %v995_v42 = vmov 0.0  }
 0x169   : > { %v300_v45 = vsel %vm298_vm4, %v299_v43, %v297_v44  ;;  %v915_v43 = vpack.c.bf16 %v605_v39, %v602_v37  ;;  %v917_v44 = vpack.c.bf16 %v612_v41, %v609_v40 }
 0x16a   : > { %v301_v46 = vadd.f32 1e-05, %v300_v45  ;;  %v608_v45 = vld [vmem:[%s1236_s5 + $0x30] sm:$0xff] }
 0x16c   : > { %983 = vrcp.f32 %v301_v46  ;;  %v611_v46 = vld [vmem:[%s1236_s5 + $0x48] sm:$0xff] }
 0x176   : > { %v984_v47 = vpop.eup %983 }
 0x177   : > { %v1075_v48 = vmul.f32 %v984_v47, %v274_v16  ;;  %v1077_v49 = vmul.f32 %v984_v47, %v275_v15  ;;  %v604_v47 = vld [vmem:[%s1236_s5 + $0x10] sm:$0xff] }
 0x179   : > { %v306_v50 = vpack.c.bf16 %v1077_v49, %v1075_v48 }
 0x17b   : > { %865 = vmatmul.mubr.msk.bf16.vlgmr.msra.gmra.mrb[0].mxu0 %vm255_vm1, %v306_v50  ;;  %v607_v50 = vld [vmem:[%s1236_s5 + $0x28] sm:$0xff] }
 0x17c   : > { %700 = vmatprep.mubr.f32.mxu0 %v995_v42  ;;  %916 = vmatpush1.bf16.msra.mxu0 %v915_v43 }
 0x17d   : > { %918 = vmatprep.subr.bf16.mxu0 %v917_v44 }
 0x24e   : > { %v392_v51 = vpop.f32.mrb[0].mxu0 }
 0x24f   : > { %v404_v52 = vrot.slane %v392_v51, 7  ;;  %v394_v53 = vpop.f32.mrb[1].mxu0 }
 0x250   : > { %v396_v54 = vpop.f32.mrb[2].mxu0  ;;  %v421_v58 = vrot.slane %v394_v53, 1 }
 0x251   : > { %v405_v55 = vrot.slane %v396_v54, 7  ;;  %v398_v56 = vpop.f32.mrb[3].mxu0  ;;  %v408_v57 = vsel %vm403_vm5, 0.0, %v404_v52 }
 0x252   : > { %v422_v59 = vrot.slane %v398_v56, 1  ;;  %410 = vrot.lane.b32.xlu0 %v408_v57, %s994_s19  ;;  %v610_v56 = vld [vmem:[%s1236_s5 + $0x40] sm:$0xff] }
 0x253   : > { %v406_v60 = vsel %vm403_vm5, %v404_v52, %v405_v55  ;;  %v618_v52 = vld [vmem:[%s1236_s5 + $0x80] sm:$0xff]  ;;  %v929_v55 = vpack.c.bf16 %v607_v50, %v604_v47 }
 0x254   : > { %412 = vrot.lane.b32.xlu1 %v406_v60, %s994_s19  ;;  %v423_v62 = vsel %vm420_vm6, %v421_v58, %v422_v59  ;;  %v426_v3 = vsel %vm425_vm7, %v422_v59, 0.0  ;;  %v614_v58 = vld [vmem:[%s1236_s5 + $0x60] sm:$0xff]  ;;  %v613_v59 = vld [vmem:[%s1236_s5 + $0x58] sm:$0xff] }
 0x255   : > { %930 = vmatprep.subr.bf16.mxu1 %v929_v55  ;;  %v933_v60 = vpack.c.bf16 %v613_v59, %v610_v56 }
 0x256   : > { %442 = vrot.lane.b32.xlu0 %v866_v61, %s994_s19  ;;  %v621_v61 = vld [vmem:[%s1236_s5 + $0x98] sm:$0xff] }
 0x258   : > { %428 = vrot.lane.b32.xlu1 %v423_v62, %s994_s19  ;;  %v624_v62 = vld [vmem:[%s1236_s5 + $0xb0] sm:$0xff] }
 0x25c   : > { %430 = vrot.lane.b32.xlu1 %v426_v3, %s994_s19  ;;  %v925_v3 = vpack.c.bf16 %v624_v62, %v621_v61 }
 0x2c4   : > { %v411_v8 = vpop.permute.xlu0 %410 }
 0x2c5   : > { %v416_v10 = vadd.f32 %v411_v8, %v392_v51  ;;  %v615_v51 = vld [vmem:[%s1236_s5 + $0x68] sm:$0xff]  ;;  %v625_v8 = vld [vmem:[%s1236_s5 + $0xb8] sm:$0xff] }
 0x2c6   : > { %v413_v9 = vpop.permute.xlu1 %412  ;;  %v921_v57 = vpack.c.bf16 %v618_v52, %v615_v51 }
 0x2c7   : > { %v417_v14 = vadd.f32 %v413_v9, %v396_v54  ;;  %v919_v54 = vpack.c.bf16 %v611_v46, %v608_v45 }
 0x2c8   : > { %v443_v13 = vpop.permute.xlu0 %442 }
 0x2c9   : > { %920 = vmatpush1.bf16.msra.mxu0 %v919_v54 }
 0x2ca   : > { %v429_v11 = vpop.permute.xlu1 %428  ;;  %922 = vmatprep.subr.bf16.mxu0 %v921_v57 }
 0x2cb   : > { %v434_v12 = vadd.f32 %v429_v11, %v416_v10 }
 0x2cd   : > { %v445_v16 = vadd.f32 %v443_v13, %v434_v12 }
 0x2ce   : > { %v431_v15 = vpop.permute.xlu1 %430 }
 0x2cf   : > { %v435_v17 = vadd.f32 %v431_v15, %v417_v14  ;;  %v447_v19 = vmax.f32 %v445_v16, 0.0 }
 0x2d1   : > { %v446_v18 = vadd.f32 %v443_v13, %v435_v17 }
 0x2d3   : > { %v448_v20 = vmax.f32 %v446_v18, 0.0 }
 0x2d5   : > { %v449_v21 = vpack.c.bf16 %v448_v20, %v447_v19 }
 0x2d7   : > { %459 = vrot.lane.b32.xlu1 %v449_v21, %s994_s19 }
 0x2db   : > { %585 = vrot.lane.b32.xlu1 %v876_v23, %s994_s19 }
 0x349   : > { %v460_v22 = vpop.permute.xlu1 %459 }
 0x34a   : > { %875 = vmatmul.mubr.msk.bf16.vlgmr.msra.gmra.mrb[0].mxu1 %vm255_vm1, %v460_v22 }
 0x34b   : > { %932 = vmatpush3.bf16.msra.mxu1 %v929_v55 }
 0x34c   : > { %934 = vmatprep.subr.bf16.mxu1 %v933_v60 }
 0x34d   : > { %v586_v7 = vpop.permute.xlu1 %585 }
 0x34f   : > { %936 = vmatpush3.bf16.msra.mxu1 %v933_v60 }
 0x350   : > { %938 = vmatprep.subr.bf16.mxu1 %v937_v2 }
 0x353   : > { %940 = vmatpush3.bf16.msra.mxu1 %v937_v2 }
 0x41d   : > { %v1124_v24 = vpop.f32.mrb[0].mxu1 }
 0x41e   : > { %v549_v25 = vrot.slane %v1124_v24, 7  ;;  %v540_v26 = vpop.f32.mrb[1].mxu1 }
 0x41f   : > { %v1127_v27 = vpop.f32.mrb[2].mxu1  ;;  %v565_v31 = vrot.slane %v540_v26, 1 }
 0x420   : > { %v550_v28 = vrot.slane %v1127_v27, 7  ;;  %v544_v29 = vpop.f32.mrb[3].mxu1  ;;  %v553_v30 = vsel %vm403_vm5, 0.0, %v549_v25 }
 0x421   : > { %v566_v32 = vrot.slane %v544_v29, 1  ;;  %555 = vrot.lane.b32.xlu0 %v553_v30, %s994_s19 }
 0x422   : > { %v551_v33 = vsel %vm403_vm5, %v549_v25, %v550_v28 }
 0x423   : > { %v567_v34 = vsel %vm420_vm6, %v565_v31, %v566_v32  ;;  %v569_v53 = vsel %vm425_vm7, %v566_v32, 0.0 }
 0x424   : > { %571 = vrot.lane.b32.xlu1 %v567_v34, %s994_s19 }
 0x425   : > { %557 = vrot.lane.b32.xlu0 %v551_v33, %s994_s19 }
 0x428   : > { %592 = vrot.lane.b32.xlu1 %v1075_v48, %s994_s19  ;;  %v617_v48 = vld [vmem:[%s1236_s5 + $0x78] sm:$0xff] }
 0x429   : > { %573 = vrot.lane.b32.xlu0 %v569_v53, %s994_s19  ;;  %v923_v1 = vpack.c.bf16 %v617_v48, %v614_v58 }
 0x42b   : > { %924 = vmatpush1.bf16.msra.mxu0 %v923_v1 }
 0x42c   : > { %926 = vmatprep.subr.bf16.mxu0 %v925_v3 }
 0x42d   : > { %594 = vrot.lane.b32.xlu0 %v1077_v49, %s994_s19  ;;  %v622_v49 = vld [vmem:[%s1236_s5 + $0xa0] sm:$0xff] }
 0x42e   : > { %v941_v9 = vpack.c.bf16 %v625_v8, %v622_v49 }
 0x42f   : > { %928 = vmatpush1.bf16.msra.mxu0 %v927_v6 }
 0x430   : > { %942 = vmatprep.subr.bf16.mxu1 %v941_v9 }
 0x431   : > { %944 = vmatpush3.bf16.msra.mxu1 %v941_v9 }
 0x493   : > { %v556_v10 = vpop.permute.xlu0 %555 }
 0x494   : > { %v561_v11 = vadd.f32 %v556_v10, %v1124_v24 }
 0x496   : > { %v572_v12 = vpop.permute.xlu1 %571 }
 0x497   : > { %v577_v13 = vadd.f32 %v572_v12, %v561_v11  ;;  %v558_v14 = vpop.permute.xlu0 %557 }
 0x498   : > { %v562_v16 = vadd.f32 %v558_v14, %v1127_v27 }
 0x499   : > { %v588_v15 = vadd.f32 %v586_v7, %v577_v13 }
 0x49a   : > { %v593_v17 = vpop.permute.xlu1 %592 }
 0x49b   : > { %v598_v18 = vadd.f32 %v593_v17, %v588_v15  ;;  %v574_v19 = vpop.permute.xlu0 %573 }
 0x49c   : > { %v578_v20 = vadd.f32 %v574_v19, %v562_v16 }
 0x49d   : > { %v600_v21 = vmax.f32 %v598_v18, 0.0 }
 0x49e   : > { %v589_v22 = vadd.f32 %v586_v7, %v578_v20 }
 0x49f   : > { %v595_v23 = vpop.permute.xlu0 %594  ;;  %628 = vrot.lane.b32.xlu1 %v600_v21, %s994_s19 }
 0x4a0   : > { %v599_v25 = vadd.f32 %v595_v23, %v589_v22 }
 0x4a2   : > { %v601_v26 = vmax.f32 %v599_v25, 0.0 }
 0x4a4   : > { %630 = vrot.lane.b32.xlu0 %v601_v26, %s994_s19 }
 0x511   : > { %v629_v24 = vpop.permute.xlu1 %628 }
 0x512   : > { %877 = vmatmul.mubr.msk.f32.vlgmr.msra.gmra.mrb[4].mxu0 %vm255_vm1, %v629_v24  ;;  %910 = vmatprep.mubr.msk.f32.mxu1 %vm255_vm1, %v629_v24 }
 0x513   : > { %706 = vmatprep.mubr.f32.mxu0 %v995_v42 }
 0x516   : > { %v631_v27 = vpop.permute.xlu0 %630 }
 0x517   : > { %878 = vmatmul.mubr.msk.f32.gmra.mrb[6].mxu0 %vm255_vm1, %v631_v27  ;;  %911 = vmatmul.mubr.msk.f32.vlgmr.msra.gmra.mrb[4].mxu1 %vm255_vm1, %v631_v27 }
 0x5e5   : > { %v702_v28 = vpop.f32.mrb[4].mxu0 }
 0x5e6   : > { %788 = vst [vmem:[%s251_s30] sm:$0xff] %v702_v28  ;;  %v704_v29 = vpop.f32.mrb[5].mxu0 }
 0x5e7   : > { %789 = vst [vmem:[%s251_s30 + $0x8] sm:$0xff] %v704_v29 }
 0x5ea   : > { %v708_v30 = vpop.f32.mrb[6].mxu0  ;;  %v912_v31 = vpop.f32.mrb[4].mxu1 }
 0x5eb   : > { %791 = vst [vmem:[%s251_s30 + $0x18] sm:$0x7] %v708_v30  ;;  %793 = vst [vmem:[%s251_s30 + $0x28] sm:$0x7] %v912_v31  ;;  %v710_v32 = vpop.f32.mrb[7].mxu0  ;;  %v779_v33 = vpop.f32.mrb[5].mxu1 }
 0x5ec   : > { %792 = vst [vmem:[%s251_s30 + $0x20] sm:$0x7] %v710_v32  ;;  %790 = vst [vmem:[%s251_s30 + $0x10] sm:$0xff] %v779_v33 }
 0x5ed PF: > { %s16_s21 = sadd.s32 1, %s991_s21  }
 0x5ee   : > { %p13_p4 = scmp.ge.s32.totalorder %s16_s21, 4  }
 0x5f0   :  { %15 = sbr.rel (!%p13_p4) target bundleno = 1 (0x1), region = 74 }

// kernel: _lambda_.3
= control target key start
LH: loop header
LB: loop body
LE: loop exit
PB: predicated region body
PF: predicated region fallthrough
CT: control target
= control target key end

     0   :  { %vm653_vm0 = vcmask 130048   ;;  %vm1009_vm1 = vcmask 523264   ;;  %s1847_s1 = inlined_call_operand.vmem [shape: bf16[400,512], index: 1, kind: input, shape index: {}]   ;;  %s1848_s0 = inlined_call_operand.vmem [shape: bf16[24,400], index: 0, kind: input, shape index: {}]   ;;  %s1849_s2 = inlined_call_operand.vmem [shape: f32[256,64], index: 2, kind: input, shape index: {}]   ;;  %s1850_s3 = inlined_call_operand.vmem [shape: f32[24,64], index: 3, kind: output, shape index: {}]  }
   0x1   :  { %v1234_v0 = vld [vmem:[%s1847_s1 + $0x4] ss:$16 sps:$4 sm:$0xff]   ;;  %v1236_v1 = vld [vmem:[%s1847_s1 + $0xc] ss:$16 sps:$4 sm:$0xff]   ;;  %v1238_v2 = vld [vmem:[%s1847_s1] ss:$16 sps:$4 sm:$0xff]  }
   0x2   :  { %660 = vmatprep.subr.bf16.mxu0 %v1234_v0  ;;  %v1239_v3 = vld [vmem:[%s1847_s1 + $0x8] ss:$16 sps:$4 sm:$0xff]   ;;  %762 = vmatprep.subr.bf16.mxu1 %v1236_v1  ;;  %v1240_v4 = vld [vmem:[%s1847_s1 + $0x24] ss:$16 sps:$4 sm:$0xff]   ;;  %v1242_v5 = vld [vmem:[%s1847_s1 + $0x2c] ss:$16 sps:$4 sm:$0xff]  }
   0x3   :  { %661 = vmatpush1.bf16.msra.mxu0 %v1238_v2  ;;  %763 = vmatpush1.bf16.msra.mxu1 %v1239_v3  ;;  %v1244_v6 = vld [vmem:[%s1847_s1 + $0x20] ss:$16 sps:$4 sm:$0xff]   ;;  %v1245_v7 = vld [vmem:[%s1847_s1 + $0x28] ss:$16 sps:$4 sm:$0xff]   ;;  %v1246_v8 = vld [vmem:[%s1847_s1 + $0x44] ss:$16 sps:$4 sm:$0xff]  }
   0x4   :  { %662 = vmatprep.subr.bf16.mxu0 %v1240_v4  ;;  %764 = vmatprep.subr.bf16.mxu1 %v1242_v5  ;;  %v1248_v9 = vld [vmem:[%s1847_s1 + $0x4c] ss:$16 sps:$4 sm:$0xff]   ;;  %v1250_v10 = vld [vmem:[%s1847_s1 + $0x40] ss:$16 sps:$4 sm:$0xff]   ;;  %v1251_v11 = vld [vmem:[%s1847_s1 + $0x48] ss:$16 sps:$4 sm:$0xff]  }
   0x5   :  { %v1252_v12 = vld [vmem:[%s1847_s1 + $0x64] ss:$16 sps:$4 sm:$0xff]   ;;  %v1254_v13 = vld [vmem:[%s1847_s1 + $0x6c] ss:$16 sps:$4 sm:$0xff]   ;;  %v1256_v14 = vld [vmem:[%s1847_s1 + $0x60] ss:$16 sps:$4 sm:$0xff]  }
   0x6   :  { %v1257_v15 = vld [vmem:[%s1847_s1 + $0x68] ss:$16 sps:$4 sm:$0xff]   ;;  %v1258_v16 = vld [vmem:[%s1847_s1 + $0x84] ss:$16 sps:$4 sm:$0xff]   ;;  %v1260_v17 = vld [vmem:[%s1847_s1 + $0x8c] ss:$16 sps:$4 sm:$0xff]  }
   0x7   :  { %663 = vmatpush1.bf16.msra.mxu0 %v1244_v6  ;;  %765 = vmatpush1.bf16.msra.mxu1 %v1245_v7  ;;  %v1262_v18 = vld [vmem:[%s1847_s1 + $0x80] ss:$16 sps:$4 sm:$0xff]   ;;  %v1263_v19 = vld [vmem:[%s1847_s1 + $0x88] ss:$16 sps:$4 sm:$0xff]   ;;  %v1264_v20 = vld [vmem:[%s1847_s1 + $0xa4] ss:$16 sps:$4 sm:$0xff]  }
   0x8   :  { %664 = vmatprep.subr.bf16.mxu0 %v1246_v8  ;;  %766 = vmatprep.subr.bf16.mxu1 %v1248_v9  ;;  %v1266_v21 = vld [vmem:[%s1847_s1 + $0xac] ss:$16 sps:$4 sm:$0xff]   ;;  %v1268_v22 = vld [vmem:[%s1847_s1 + $0xa0] ss:$16 sps:$4 sm:$0xff]   ;;  %v1269_v23 = vld [vmem:[%s1847_s1 + $0xa8] ss:$16 sps:$4 sm:$0xff]  }
   0x9   :  { %v1270_v24 = vld [vmem:[%s1847_s1 + $0xc4] ss:$16 sps:$4 sm:$0xff]   ;;  %v1272_v25 = vld [vmem:[%s1847_s1 + $0xcc] ss:$16 sps:$4 sm:$0xff]   ;;  %v1274_v26 = vld [vmem:[%s1847_s1 + $0xc0] ss:$16 sps:$4 sm:$0xff]  }
   0xa   :  { %v1275_v27 = vld [vmem:[%s1847_s1 + $0xc8] ss:$16 sps:$4 sm:$0xff]   ;;  %v1276_v28 = vld [vmem:[%s1847_s1 + $0xe4] ss:$16 sps:$4 sm:$0xff]   ;;  %v1278_v29 = vld [vmem:[%s1847_s1 + $0xec] ss:$16 sps:$4 sm:$0xff]  }
   0xb   :  { %665 = vmatpush1.bf16.msra.mxu0 %v1250_v10  ;;  %767 = vmatpush1.bf16.msra.mxu1 %v1251_v11  ;;  %v1280_v30 = vld [vmem:[%s1847_s1 + $0xe0] ss:$16 sps:$4 sm:$0xff]   ;;  %v1281_v31 = vld [vmem:[%s1847_s1 + $0xe8] ss:$16 sps:$4 sm:$0xff]   ;;  %v1282_v32 = vld [vmem:[%s1847_s1 + $0x104] ss:$16 sps:$4 sm:$0xff]  }
   0xc   :  { %666 = vmatprep.subr.bf16.mxu0 %v1252_v12  ;;  %768 = vmatprep.subr.bf16.mxu1 %v1254_v13  ;;  %v1284_v33 = vld [vmem:[%s1847_s1 + $0x10c] ss:$16 sps:$4 sm:$0xff]   ;;  %v1286_v34 = vld [vmem:[%s1847_s1 + $0x100] ss:$16 sps:$4 sm:$0xff]   ;;  %v1287_v35 = vld [vmem:[%s1847_s1 + $0x108] ss:$16 sps:$4 sm:$0xff]  }
   0xd   :  { %v1288_v36 = vld [vmem:[%s1847_s1 + $0x124] ss:$16 sps:$4 sm:$0xff]   ;;  %v1290_v37 = vld [vmem:[%s1847_s1 + $0x12c] ss:$16 sps:$4 sm:$0xff]   ;;  %v1292_v38 = vld [vmem:[%s1847_s1 + $0x120] ss:$16 sps:$4 sm:$0xff]  }
   0xe   :  { %v1293_v39 = vld [vmem:[%s1847_s1 + $0x128] ss:$16 sps:$4 sm:$0xff]   ;;  %v1294_v40 = vld [vmem:[%s1847_s1 + $0x144] ss:$16 sps:$4 sm:$0xff]   ;;  %v1296_v41 = vld [vmem:[%s1847_s1 + $0x14c] ss:$16 sps:$4 sm:$0xff]  }
   0xf   :  { %667 = vmatpush1.bf16.msra.mxu0 %v1256_v14  ;;  %769 = vmatpush1.bf16.msra.mxu1 %v1257_v15  ;;  %v1298_v42 = vld [vmem:[%s1847_s1 + $0x140] ss:$16 sps:$4 sm:$0xff]   ;;  %v1299_v43 = vld [vmem:[%s1847_s1 + $0x148] ss:$16 sps:$4 sm:$0xff]   ;;  %v1300_v44 = vld [vmem:[%s1847_s1 + $0x164] ss:$16 sps:$4 sm:$0xff]  }
  0x10   :  { %668 = vmatprep.subr.bf16.mxu0 %v1258_v16  ;;  %770 = vmatprep.subr.bf16.mxu1 %v1260_v17  ;;  %v1302_v45 = vld [vmem:[%s1847_s1 + $0x16c] ss:$16 sps:$4 sm:$0xff]   ;;  %v1304_v46 = vld [vmem:[%s1847_s1 + $0x160] ss:$16 sps:$4 sm:$0xff]   ;;  %v1305_v47 = vld [vmem:[%s1847_s1 + $0x168] ss:$16 sps:$4 sm:$0xff]  }
  0x11   :  { %v1332_v48 = vld [vmem:[%s1848_s0 + $0x4] ss:$16 sps:$4 sm:$0xff]   ;;  %v1308_v50 = vld [vmem:[%s1847_s1 + $0x18c] ss:$16 sps:$4 sm:$0xff]   ;;  %v1310_v51 = vld [vmem:[%s1847_s1 + $0x180] ss:$16 sps:$4 sm:$0xff]  }
  0x12   :  { %v1306_v49 = vld [vmem:[%s1847_s1 + $0x184] ss:$16 sps:$4 sm:$0xff]   ;;  %692 = vmatprep.mubr.bf16.mxu0 %v1332_v48  ;;  %794 = vmatprep.mubr.bf16.mxu1 %v1332_v48  ;;  %v1311_v52 = vld [vmem:[%s1847_s1 + $0x188] ss:$16 sps:$4 sm:$0xff]   ;;  %v1314_v54 = vld [vmem:[%s1847_s1 + $0x1ac] ss:$16 sps:$4 sm:$0xff]  }
  0x13   :  { %669 = vmatpush1.bf16.msra.mxu0 %v1262_v18  ;;  %771 = vmatpush1.bf16.msra.mxu1 %v1263_v19  ;;  %v1312_v53 = vld [vmem:[%s1847_s1 + $0x1a4] ss:$16 sps:$4 sm:$0xff]   ;;  %v1316_v55 = vld [vmem:[%s1847_s1 + $0x1a0] ss:$16 sps:$4 sm:$0xff]   ;;  %v1317_v56 = vld [vmem:[%s1847_s1 + $0x1a8] ss:$16 sps:$4 sm:$0xff]  }
  0x14   :  { %670 = vmatprep.subr.bf16.mxu0 %v1264_v20  ;;  %772 = vmatprep.subr.bf16.mxu1 %v1266_v21  ;;  %v1318_v57 = vld [vmem:[%s1847_s1 + $0x1c4] ss:$16 sps:$4 sm:$0xff]   ;;  %v1320_v58 = vld [vmem:[%s1847_s1 + $0x1cc] ss:$16 sps:$4 sm:$0xff]   ;;  %v1322_v59 = vld [vmem:[%s1847_s1 + $0x1c0] ss:$16 sps:$4 sm:$0xff]  }
  0x15   :  { %v1323_v60 = vld [vmem:[%s1847_s1 + $0x1c8] ss:$16 sps:$4 sm:$0xff]   ;;  %v1324_v61 = vld [vmem:[%s1847_s1 + $0x1e4] ss:$16 sps:$4 sm:$0xff]   ;;  %v1326_v62 = vld [vmem:[%s1847_s1 + $0x1ec] ss:$16 sps:$4 sm:$0xff]  }
  0x16   :  { %v1328_v63 = vld [vmem:[%s1847_s1 + $0x1e0] ss:$16 sps:$4 sm:$0xff]   ;;  %v1329_v0 = vld [vmem:[%s1847_s1 + $0x1e8] ss:$16 sps:$4 sm:$0xff]   ;;  %v1335_v1 = vld [vmem:[%s1847_s1 + $0x204] ss:$16 sps:$4 sm:$0xff]  }
  0x17   :  { %671 = vmatpush1.bf16.msra.mxu0 %v1268_v22  ;;  %773 = vmatpush1.bf16.msra.mxu1 %v1269_v23  ;;  %v1338_v2 = vld [vmem:[%s1847_s1 + $0x20c] ss:$16 sps:$4 sm:$0xff]   ;;  %v1330_v3 = vld [vmem:[%s1848_s0] ss:$16 sps:$4 sm:$0xff]   ;;  %v1336_v6 = vld [vmem:[%s1847_s1 + $0x208] ss:$16 sps:$4 sm:$0xff]  }
  0x18   :  { %672 = vmatprep.subr.bf16.mxu0 %v1270_v24  ;;  %774 = vmatprep.subr.bf16.mxu1 %v1272_v25  ;;  %v1333_v4 = vld [vmem:[%s1847_s1 + $0x200] ss:$16 sps:$4 sm:$0xff]   ;;  %v1341_v7 = vld [vmem:[%s1847_s1 + $0x224] ss:$16 sps:$4 sm:$0xff]   ;;  %v1344_v8 = vld [vmem:[%s1847_s1 + $0x22c] ss:$16 sps:$4 sm:$0xff]  }
  0x19   :  { %v19_v5 = vld [vmem:[%s1848_s0 + $0x20] sm:$0xff]  ;;  %v1342_v11 = vld [vmem:[%s1847_s1 + $0x228] ss:$16 sps:$4 sm:$0xff]   ;;  %v1350_v13 = vld [vmem:[%s1847_s1 + $0x24c] ss:$16 sps:$4 sm:$0xff]  }
  0x1a   :  { %v1022_v9 = vcombine.high %v19_v5, %v19_v5  ;;  %v1339_v10 = vld [vmem:[%s1847_s1 + $0x220] ss:$16 sps:$4 sm:$0xff]   ;;  %v1347_v12 = vld [vmem:[%s1847_s1 + $0x244] ss:$16 sps:$4 sm:$0xff]   ;;  %v1021_v14 = vcombine.low %v19_v5, %v19_v5  ;;  %v1348_v16 = vld [vmem:[%s1847_s1 + $0x248] ss:$16 sps:$4 sm:$0xff]  }
  0x1b   :  { %673 = vmatpush1.bf16.msra.mxu0 %v1274_v26  ;;  %775 = vmatpush1.bf16.msra.mxu1 %v1275_v27  ;;  %v1345_v15 = vld [vmem:[%s1847_s1 + $0x240] ss:$16 sps:$4 sm:$0xff]   ;;  %v1353_v17 = vld [vmem:[%s1847_s1 + $0x264] ss:$16 sps:$4 sm:$0xff]   ;;  %v1356_v18 = vld [vmem:[%s1847_s1 + $0x26c] ss:$16 sps:$4 sm:$0xff]  }
  0x1c   :  { %674 = vmatprep.subr.bf16.mxu0 %v1276_v28  ;;  %776 = vmatprep.subr.bf16.mxu1 %v1278_v29  ;;  %v1391_v19 = vld [vmem:[%s1848_s0 + $0xc] ss:$16 sps:$4 sm:$0xff]   ;;  %v1351_v20 = vld [vmem:[%s1847_s1 + $0x260] ss:$16 sps:$4 sm:$0xff]   ;;  %v1354_v21 = vld [vmem:[%s1847_s1 + $0x268] ss:$16 sps:$4 sm:$0xff]  }
  0x1d   :  { %v1359_v22 = vld [vmem:[%s1847_s1 + $0x284] ss:$16 sps:$4 sm:$0xff]   ;;  %v1362_v23 = vld [vmem:[%s1847_s1 + $0x28c] ss:$16 sps:$4 sm:$0xff]   ;;  %v1357_v24 = vld [vmem:[%s1847_s1 + $0x280] ss:$16 sps:$4 sm:$0xff]  }
  0x1e   :  { %v1360_v25 = vld [vmem:[%s1847_s1 + $0x288] ss:$16 sps:$4 sm:$0xff]   ;;  %v1365_v26 = vld [vmem:[%s1847_s1 + $0x2a4] ss:$16 sps:$4 sm:$0xff]   ;;  %v1368_v27 = vld [vmem:[%s1847_s1 + $0x2ac] ss:$16 sps:$4 sm:$0xff]  }
  0x1f   :  { %675 = vmatpush1.bf16.msra.mxu0 %v1280_v30  ;;  %777 = vmatpush1.bf16.msra.mxu1 %v1281_v31  ;;  %v1363_v28 = vld [vmem:[%s1847_s1 + $0x2a0] ss:$16 sps:$4 sm:$0xff]   ;;  %v1366_v29 = vld [vmem:[%s1847_s1 + $0x2a8] ss:$16 sps:$4 sm:$0xff]   ;;  %v1371_v30 = vld [vmem:[%s1847_s1 + $0x2c4] ss:$16 sps:$4 sm:$0xff]  }
  0x20   :  { %676 = vmatprep.subr.bf16.mxu0 %v1282_v32  ;;  %778 = vmatprep.subr.bf16.mxu1 %v1284_v33  ;;  %v1374_v31 = vld [vmem:[%s1847_s1 + $0x2cc] ss:$16 sps:$4 sm:$0xff]   ;;  %v1369_v32 = vld [vmem:[%s1847_s1 + $0x2c0] ss:$16 sps:$4 sm:$0xff]   ;;  %v1372_v33 = vld [vmem:[%s1847_s1 + $0x2c8] ss:$16 sps:$4 sm:$0xff]  }
  0x21   :  { %v1389_v48 = vld [vmem:[%s1848_s0 + $0x8] ss:$16 sps:$4 sm:$0xff]   ;;  %v906_v5 = vld [vmem:[%s1849_s2 + $0xc0] sm:$0xff] }
  0x23   :  { %677 = vmatpush1.bf16.msra.mxu0 %v1286_v34  ;;  %779 = vmatpush1.bf16.msra.mxu1 %v1287_v35  ;;  %v1379_v34 = vld [vmem:[%s1847_s1 + $0x2e4] ss:$16 sps:$4 sm:$0xff]   ;;  %v1382_v35 = vld [vmem:[%s1847_s1 + $0x2ec] ss:$16 sps:$4 sm:$0xff]  }
  0x24   :  { %678 = vmatprep.subr.bf16.mxu0 %v1288_v36  ;;  %780 = vmatprep.subr.bf16.mxu1 %v1290_v37  ;;  %v1377_v36 = vld [vmem:[%s1847_s1 + $0x2e0] ss:$16 sps:$4 sm:$0xff]   ;;  %v1380_v37 = vld [vmem:[%s1847_s1 + $0x2e8] ss:$16 sps:$4 sm:$0xff]  }
  0x27   :  { %679 = vmatpush1.bf16.msra.mxu0 %v1292_v38  ;;  %781 = vmatpush1.bf16.msra.mxu1 %v1293_v39  ;;  %v1385_v38 = vld [vmem:[%s1847_s1 + $0x304] ss:$16 sps:$4 sm:$0xff]   ;;  %v1388_v39 = vld [vmem:[%s1847_s1 + $0x30c] ss:$16 sps:$4 sm:$0xff]  }
  0x28   :  { %680 = vmatprep.subr.bf16.mxu0 %v1294_v40  ;;  %782 = vmatprep.subr.bf16.mxu1 %v1296_v41  ;;  %v898_v40 = vld [vmem:[%s1849_s2 + $0x80] sm:$0xff]  ;;  %v899_v41 = vld [vmem:[%s1849_s2 + $0x88] sm:$0xff] }
  0x2b   :  { %681 = vmatpush1.bf16.msra.mxu0 %v1298_v42  ;;  %783 = vmatpush1.bf16.msra.mxu1 %v1299_v43  ;;  %v1383_v42 = vld [vmem:[%s1847_s1 + $0x300] ss:$16 sps:$4 sm:$0xff]   ;;  %v1386_v43 = vld [vmem:[%s1847_s1 + $0x308] ss:$16 sps:$4 sm:$0xff]  }
  0x2c   :  { %682 = vmatprep.subr.bf16.mxu0 %v1300_v44  ;;  %784 = vmatprep.subr.bf16.mxu1 %v1302_v45  ;;  %v20_v44 = vld [vmem:[%s1848_s0 + $0x28] sm:$0xff]  ;;  %v1170_v45 = vpack.c.bf16 %v899_v41, %v898_v40 }
  0x2f   :  { %683 = vmatpush1.bf16.msra.mxu0 %v1304_v46  ;;  %785 = vmatpush1.bf16.msra.mxu1 %v1305_v47  ;;  %v882_v46 = vld [vmem:[%s1849_s2] sm:$0xff]  ;;  %v883_v47 = vld [vmem:[%s1849_s2 + $0x8] sm:$0xff] }
  0x30   :  { %684 = vmatprep.subr.bf16.mxu0 %v1306_v49  ;;  %786 = vmatprep.subr.bf16.mxu1 %v1308_v50  ;;  %v900_v49 = vld [vmem:[%s1849_s2 + $0x90] sm:$0xff]  ;;  %v901_v50 = vld [vmem:[%s1849_s2 + $0x98] sm:$0xff] }
  0x33   :  { %685 = vmatpush1.bf16.msra.mxu0 %v1310_v51  ;;  %787 = vmatpush1.bf16.msra.mxu1 %v1311_v52  ;;  %v1024_v51 = vcombine.high %v20_v44, %v20_v44  ;;  %v1172_v52 = vpack.c.bf16 %v883_v47, %v882_v46 }
  0x34   :  { %686 = vmatprep.subr.bf16.mxu0 %v1312_v53  ;;  %788 = vmatprep.subr.bf16.mxu1 %v1314_v54  ;;  %v1174_v53 = vpack.c.bf16 %v901_v50, %v900_v49  ;;  %v884_v54 = vld [vmem:[%s1849_s2 + $0x10] sm:$0xff] }
  0x37   :  { %687 = vmatpush1.bf16.msra.mxu0 %v1316_v55  ;;  %789 = vmatpush1.bf16.msra.mxu1 %v1317_v56  ;;  %v885_v55 = vld [vmem:[%s1849_s2 + $0x18] sm:$0xff]  ;;  %v902_v56 = vld [vmem:[%s1849_s2 + $0xa0] sm:$0xff] }
  0x38   :  { %688 = vmatprep.subr.bf16.mxu0 %v1318_v57  ;;  %790 = vmatprep.subr.bf16.mxu1 %v1320_v58  ;;  %v903_v57 = vld [vmem:[%s1849_s2 + $0xa8] sm:$0xff]  ;;  %v1176_v58 = vpack.c.bf16 %v885_v55, %v884_v54 }
  0x3b   :  { %689 = vmatpush1.bf16.msra.mxu0 %v1322_v59  ;;  %791 = vmatpush1.bf16.msra.mxu1 %v1323_v60  ;;  %v1178_v59 = vpack.c.bf16 %v903_v57, %v902_v56  ;;  %v886_v60 = vld [vmem:[%s1849_s2 + $0x20] sm:$0xff] }
  0x3c   :  { %690 = vmatprep.subr.bf16.mxu0 %v1324_v61  ;;  %792 = vmatprep.subr.bf16.mxu1 %v1326_v62  ;;  %v887_v61 = vld [vmem:[%s1849_s2 + $0x28] sm:$0xff]  ;;  %v1023_v62 = vcombine.low %v20_v44, %v20_v44 }
  0x3f   :  { %691 = vmatpush1.bf16.msra.mxu0 %v1328_v63  ;;  %793 = vmatpush1.bf16.msra.mxu1 %v1329_v0  ;;  %v904_v63 = vld [vmem:[%s1849_s2 + $0xb0] sm:$0xff]  ;;  %v905_v0 = vld [vmem:[%s1849_s2 + $0xb8] sm:$0xff] }
  0x40   :  { %711 = vmatprep.subr.bf16.mxu0 %v1335_v1  ;;  %813 = vmatprep.subr.bf16.mxu1 %v1338_v2  ;;  %v1180_v1 = vpack.c.bf16 %v887_v61, %v886_v60  ;;  %v1182_v2 = vpack.c.bf16 %v905_v0, %v904_v63 }
  0x42   :  { %693 = vmatmul.mubr.bf16.vlgmr.msra.gmra.mrb[0].mxu0 %v1330_v3  ;;  %795 = vmatmul.mubr.bf16.vlgmr.msra.gmra.mrb[0].mxu1 %v1330_v3  ;;  %v888_v3 = vld [vmem:[%s1849_s2 + $0x30] sm:$0xff] }
  0x43   :  { %712 = vmatpush1.bf16.msra.mxu0 %v1333_v4  ;;  %814 = vmatpush1.bf16.msra.mxu1 %v1336_v6  ;;  %v889_v4 = vld [vmem:[%s1849_s2 + $0x38] sm:$0xff]  ;;  %v907_v6 = vld [vmem:[%s1849_s2 + $0xc8] sm:$0xff] }
  0x44   :  { %713 = vmatprep.subr.bf16.mxu0 %v1341_v7  ;;  %815 = vmatprep.subr.bf16.mxu1 %v1344_v8  ;;  %v1184_v7 = vpack.c.bf16 %v889_v4, %v888_v3  ;;  %v1186_v8 = vpack.c.bf16 %v907_v6, %v906_v5 }
  0x45   :  { %702 = vmatprep.mubr.bf16.mxu0 %v1022_v9  ;;  %804 = vmatprep.mubr.bf16.mxu1 %v1022_v9  ;;  %v890_v9 = vld [vmem:[%s1849_s2 + $0x40] sm:$0xff] }
  0x47   :  { %714 = vmatpush1.bf16.msra.mxu0 %v1339_v10  ;;  %816 = vmatpush1.bf16.msra.mxu1 %v1342_v11  ;;  %v891_v10 = vld [vmem:[%s1849_s2 + $0x48] sm:$0xff]  ;;  %v908_v11 = vld [vmem:[%s1849_s2 + $0xd0] sm:$0xff] }
  0x48   :  { %715 = vmatprep.subr.bf16.mxu0 %v1347_v12  ;;  %817 = vmatprep.subr.bf16.mxu1 %v1350_v13  ;;  %v909_v12 = vld [vmem:[%s1849_s2 + $0xd8] sm:$0xff]  ;;  %v1188_v13 = vpack.c.bf16 %v891_v10, %v890_v9 }
  0x4a   :  { %703 = vmatmul.mubr.bf16.gmra.mrb[4].mxu0 %v1021_v14  ;;  %805 = vmatmul.mubr.bf16.gmra.mrb[4].mxu1 %v1021_v14  ;;  %v1190_v14 = vpack.c.bf16 %v909_v12, %v908_v11 }
  0x4b   :  { %716 = vmatpush1.bf16.msra.mxu0 %v1345_v15  ;;  %818 = vmatpush1.bf16.msra.mxu1 %v1348_v16  ;;  %v892_v15 = vld [vmem:[%s1849_s2 + $0x50] sm:$0xff]  ;;  %v893_v16 = vld [vmem:[%s1849_s2 + $0x58] sm:$0xff] }
  0x4c   :  { %717 = vmatprep.subr.bf16.mxu0 %v1353_v17  ;;  %819 = vmatprep.subr.bf16.mxu1 %v1356_v18  ;;  %v910_v17 = vld [vmem:[%s1849_s2 + $0xe0] sm:$0xff]  ;;  %v911_v18 = vld [vmem:[%s1849_s2 + $0xe8] sm:$0xff] }
  0x4d   :  { %1125 = vmatprep.mubr.msk.bf16.mxu0 %vm653_vm0, %v1391_v19  ;;  %1127 = vmatprep.mubr.msk.bf16.mxu1 %vm653_vm0, %v1391_v19  ;;  %v1192_v19 = vpack.c.bf16 %v893_v16, %v892_v15 }
  0x4f   :  { %718 = vmatpush1.bf16.msra.mxu0 %v1351_v20  ;;  %820 = vmatpush1.bf16.msra.mxu1 %v1354_v21  ;;  %v1194_v20 = vpack.c.bf16 %v911_v18, %v910_v17  ;;  %v894_v21 = vld [vmem:[%s1849_s2 + $0x60] sm:$0xff] }
  0x50   :  { %719 = vmatprep.subr.bf16.mxu0 %v1359_v22  ;;  %821 = vmatprep.subr.bf16.mxu1 %v1362_v23  ;;  %v895_v22 = vld [vmem:[%s1849_s2 + $0x68] sm:$0xff] }
  0x51   :  { %v1196_v23 = vpack.c.bf16 %v895_v22, %v894_v21 }
  0x53   :  { %720 = vmatpush1.bf16.msra.mxu0 %v1357_v24  ;;  %822 = vmatpush1.bf16.msra.mxu1 %v1360_v25  ;;  %v912_v24 = vld [vmem:[%s1849_s2 + $0xf0] sm:$0xff]  ;;  %v913_v25 = vld [vmem:[%s1849_s2 + $0xf8] sm:$0xff] }
  0x54   :  { %721 = vmatprep.subr.bf16.mxu0 %v1365_v26  ;;  %823 = vmatprep.subr.bf16.mxu1 %v1368_v27  ;;  %v1198_v26 = vpack.c.bf16 %v913_v25, %v912_v24  ;;  %v896_v27 = vld [vmem:[%s1849_s2 + $0x70] sm:$0xff] }
  0x57   :  { %722 = vmatpush1.bf16.msra.mxu0 %v1363_v28  ;;  %824 = vmatpush1.bf16.msra.mxu1 %v1366_v29  ;;  %v897_v28 = vld [vmem:[%s1849_s2 + $0x78] sm:$0xff] }
  0x58   :  { %723 = vmatprep.subr.bf16.mxu0 %v1371_v30  ;;  %825 = vmatprep.subr.bf16.mxu1 %v1374_v31  ;;  %v1200_v29 = vpack.c.bf16 %v897_v28, %v896_v27 }
  0x5b   :  { %724 = vmatpush1.bf16.msra.mxu0 %v1369_v32  ;;  %826 = vmatpush1.bf16.msra.mxu1 %v1372_v33 }
  0x5c   :  { %725 = vmatprep.subr.bf16.mxu0 %v1379_v34  ;;  %827 = vmatprep.subr.bf16.mxu1 %v1382_v35 }
  0x5f   :  { %726 = vmatpush1.bf16.msra.mxu0 %v1377_v36  ;;  %828 = vmatpush1.bf16.msra.mxu1 %v1380_v37 }
  0x60   :  { %727 = vmatprep.subr.bf16.mxu0 %v1385_v38  ;;  %829 = vmatprep.subr.bf16.mxu1 %v1388_v39 }
  0x63   :  { %728 = vmatpush1.bf16.msra.mxu0 %v1383_v42  ;;  %830 = vmatpush1.bf16.msra.mxu1 %v1386_v43 }
  0x64   :  { %1171 = vmatprep.subr.bf16.mxu0 %v1170_v45  ;;  %1202 = vmatprep.subr.bf16.mxu1 %v1170_v45 }
  0x66   :  { %744 = vmatmul.mubr.bf16.vlgmr.msra.gmra.mrb[0].mxu0 %v1389_v48  ;;  %846 = vmatmul.mubr.bf16.vlgmr.msra.gmra.mrb[0].mxu1 %v1389_v48 }
  0x67   :  { %1126 = vmatprep.mubr.msk.bf16.mxu0 %vm653_vm0, %v1024_v51  ;;  %1128 = vmatprep.mubr.msk.bf16.mxu1 %vm653_vm0, %v1024_v51 }
  0x68   :  { %1173 = vmatpush3.bf16.msra.mxu0 %v1172_v52  ;;  %1210 = vmatpush3.bf16.msra.mxu1 %v1172_v52 }
  0x69   :  { %1175 = vmatprep.subr.bf16.mxu0 %v1174_v53  ;;  %1203 = vmatprep.subr.bf16.mxu1 %v1174_v53 }
  0x6c   :  { %1177 = vmatpush3.bf16.msra.mxu0 %v1176_v58  ;;  %1211 = vmatpush3.bf16.msra.mxu1 %v1176_v58 }
  0x6d   :  { %1179 = vmatprep.subr.bf16.mxu0 %v1178_v59  ;;  %1204 = vmatprep.subr.bf16.mxu1 %v1178_v59 }
  0x6e   :  { %754 = vmatmul.mubr.bf16.gmra.mrb[4].mxu0 %v1023_v62  ;;  %856 = vmatmul.mubr.bf16.gmra.mrb[4].mxu1 %v1023_v62 }
  0x70   :  { %1181 = vmatpush3.bf16.msra.mxu0 %v1180_v1  ;;  %1212 = vmatpush3.bf16.msra.mxu1 %v1180_v1 }
  0x71   :  { %1183 = vmatprep.subr.bf16.mxu0 %v1182_v2  ;;  %1205 = vmatprep.subr.bf16.mxu1 %v1182_v2 }
  0x74   :  { %1185 = vmatpush3.bf16.msra.mxu0 %v1184_v7  ;;  %1213 = vmatpush3.bf16.msra.mxu1 %v1184_v7 }
  0x75   :  { %1187 = vmatprep.subr.bf16.mxu0 %v1186_v8  ;;  %1206 = vmatprep.subr.bf16.mxu1 %v1186_v8 }
  0x78   :  { %1189 = vmatpush3.bf16.msra.mxu0 %v1188_v13  ;;  %1214 = vmatpush3.bf16.msra.mxu1 %v1188_v13 }
  0x79   :  { %1191 = vmatprep.subr.bf16.mxu0 %v1190_v14  ;;  %1207 = vmatprep.subr.bf16.mxu1 %v1190_v14 }
  0x7c   :  { %1193 = vmatpush3.bf16.msra.mxu0 %v1192_v19  ;;  %1215 = vmatpush3.bf16.msra.mxu1 %v1192_v19 }
  0x7d   :  { %1195 = vmatprep.subr.bf16.mxu0 %v1194_v20  ;;  %1208 = vmatprep.subr.bf16.mxu1 %v1194_v20 }
  0x80   :  { %1197 = vmatpush3.bf16.msra.mxu0 %v1196_v23  ;;  %1216 = vmatpush3.bf16.msra.mxu1 %v1196_v23 }
  0x81   :  { %1199 = vmatprep.subr.bf16.mxu0 %v1198_v26  ;;  %1209 = vmatprep.subr.bf16.mxu1 %v1198_v26 }
  0x84   :  { %1201 = vmatpush3.bf16.msra.mxu0 %v1200_v29  ;;  %1217 = vmatpush3.bf16.msra.mxu1 %v1200_v29 }
 0x139   :  { %v745_v30 = vpop.f32.mrb[0].mxu0  ;;  %v847_v31 = vpop.f32.mrb[0].mxu1 }
 0x13a   :  { %v864_v32 = vmul.f32 %v745_v30, %v745_v30  ;;  %v870_v33 = vmul.f32 %v847_v31, %v847_v31  ;;  %v747_v34 = vpop.f32.mrb[1].mxu0  ;;  %v849_v35 = vpop.f32.mrb[1].mxu1 }
 0x13b   :  { %v865_v36 = vmul.f32 %v747_v34, %v747_v34  ;;  %v871_v37 = vmul.f32 %v849_v35, %v849_v35  ;;  %v749_v38 = vpop.f32.mrb[2].mxu0  ;;  %v851_v39 = vpop.f32.mrb[2].mxu1 }
 0x13c   :  { %v876_v40 = vadd.f32 %v870_v33, %v864_v32  ;;  %v866_v41 = vmul.f32 %v749_v38, %v749_v38  ;;  %v872_v42 = vmul.f32 %v851_v39, %v851_v39  ;;  %v751_v43 = vpop.f32.mrb[3].mxu0  ;;  %v853_v44 = vpop.f32.mrb[3].mxu1 }
 0x13d   :  { %v877_v45 = vadd.f32 %v871_v37, %v865_v36  ;;  %v867_v46 = vmul.f32 %v751_v43, %v751_v43  ;;  %v873_v47 = vmul.f32 %v853_v44, %v853_v44 }
 0x13e   :  { %v878_v48 = vadd.f32 %v872_v42, %v866_v41 }
 0x13f   :  { %v879_v49 = vadd.f32 %v873_v47, %v867_v46  ;;  %978 = vmatprep.mubr.f32.mxu0 %v877_v45 }
 0x140   :  { %979 = vmatmul.mubr.f32.vlgmr.msra.gmra.mrb[8].mxu0 %v876_v40 }
 0x141   :  { %v755_v50 = vpop.f32.mrb[4].mxu0  ;;  %v857_v51 = vpop.f32.mrb[4].mxu1  ;;  %983 = vmatprep.mubr.f32.mxu1 %v879_v49 }
 0x142   :  { %v868_v52 = vmul.f32 %v755_v50, %v755_v50  ;;  %v874_v53 = vmul.f32 %v857_v51, %v857_v51  ;;  %v757_v54 = vpop.f32.mrb[5].mxu0  ;;  %v859_v55 = vpop.f32.mrb[5].mxu1  ;;  %984 = vmatmul.mubr.f32.vlgmr.msra.gmra.mrb[8].mxu1 %v878_v48 }
 0x143   :  { %v869_v56 = vmul.f32 %v757_v54, %v757_v54  ;;  %v875_v57 = vmul.f32 %v859_v55, %v859_v55  ;;  %v759_v58 = vpop.f32.mrb[6].mxu0  ;;  %v861_v59 = vpop.f32.mrb[6].mxu1 }
 0x144   :  { %v880_v60 = vadd.f32 %v874_v53, %v868_v52  ;;  %v760_v61 = vpop.f32.mrb[7].mxu0  ;;  %v862_v62 = vpop.f32.mrb[7].mxu1 }
 0x145   :  { %v881_v63 = vadd.f32 %v875_v57, %v869_v56 }
 0x147   :  { %988 = vmatprep.mubr.f32.mxu1 %v881_v63 }
 0x148   :  { %989 = vmatmul.mubr.f32.gmra.mrb[10].mxu1 %v880_v60 }
 0x213   :  { %v1161_v0 = vpop.f32.mrb[8].mxu0 }
 0x214   :  { %v1162_v1 = vpop.f32.mrb[9].mxu0 }
 0x215   :  { %v1163_v2 = vadd.f32 %v1162_v1, %v1161_v0  ;;  %v1164_v3 = vpop.f32.mrb[8].mxu1 }
 0x216   :  { %v1165_v4 = vpop.f32.mrb[9].mxu1 }
 0x217   :  { %v994_v5 = vmax.f32 %v1163_v2, 1e-10  ;;  %v1166_v6 = vadd.f32 %v1165_v4, %v1164_v3 }
 0x219   :  { %1394 = vlog2.f32 %v994_v5  ;;  %v995_v7 = vmax.f32 %v1166_v6, 1e-10 }
 0x21b   :  { %1396 = vlog2.f32 %v995_v7  ;;  %v1167_v8 = vpop.f32.mrb[10].mxu1 }
 0x21c   :  { %v1168_v9 = vpop.f32.mrb[11].mxu1 }
 0x21d   :  { %v1169_v10 = vadd.f32 %v1168_v9, %v1167_v8 }
 0x21f   :  { %v996_v11 = vmax.f32 %v1169_v10, 1e-10 }
 0x221   :  { %1398 = vlog2.f32 %v996_v11 }
 0x223   :  { %v1395_v12 = vpop.eup %1394 }
 0x224   :  { %v998_v13 = vmul.f32 0.6931472, %v1395_v12 }
 0x225   :  { %v1397_v14 = vpop.eup %1396 }
 0x226   :  { %v1003_v15 = vmul.f32 0.4342945, %v998_v13  ;;  %v1000_v16 = vmul.f32 0.6931472, %v1397_v14 }
 0x228   :  { %v1006_v17 = vmul.f32 10.0, %v1003_v15  ;;  %v1004_v18 = vmul.f32 0.4342945, %v1000_v16 }
 0x22a   :  { %1010 = vst.msk [vmem:[%s1850_s3] sm:$0xff] %vm1009_vm1, %v1006_v17  ;;  %v1007_v19 = vmul.f32 10.0, %v1004_v18 }
 0x22b   :  { %v1399_v20 = vpop.eup %1398 }
 0x22c   :  { %1011 = vst.msk [vmem:[%s1850_s3 + $0x8] sm:$0xff] %vm1009_vm1, %v1007_v19  ;;  %v1002_v21 = vmul.f32 0.6931472, %v1399_v20 }
 0x22e   :  { %v1005_v22 = vmul.f32 0.4342945, %v1002_v21 }
 0x230   :  { %v1008_v23 = vmul.f32 10.0, %v1005_v22 }
 0x232   :  { %1012 = vst.msk [vmem:[%s1850_s3 + $0x10] sm:$0xff] %vm1009_vm1, %v1008_v23 }

// kernel: _lambda_.5
= control target key start
LH: loop header
LB: loop body
LE: loop exit
PB: predicated region body
PF: predicated region fallthrough
CT: control target
= control target key end

     0   :  { %10 = vsyncpa [#allocation6], 0  ;;  %s4879_s0 = inlined_call_operand.vmem [shape: f32[2,11,384], index: 0, kind: input, shape index: {}]   ;;  %s4880_s1 = inlined_call_operand.vmem [shape: f32[128,384], index: 1, kind: input, shape index: {}]   ;;  %s4881_s2 = inlined_call_operand.vmem [shape: f32[1,128], index: 2, kind: input, shape index: {}]   ;;  %s4882_s3 = inlined_call_operand.vmem [shape: f32[128,128], index: 3, kind: input, shape index: {}]   ;;  %s4883_s4 = inlined_call_operand.vmem [shape: f32[1,128], index: 4, kind: input, shape index: {}]   ;;  %s4884_s5 = inlined_call_operand.hbm [shape: f32[2,1,128], index: 5, kind: output, shape index: {}]  }
   0x1   :  { %12 = vsyncpa [#allocation6 + $0x1], 0  ;;  %s4029_s18 = smov 0   ;;  %s4031_s19 = smov 0  }
   0x2   :  { %s4033_s20 = smov 0   ;;  %s4035_s21 = smov 0  }
   0x3 LB: > { %s4050_s22 = sadd.s32 4294967295, %s3992_s21   ;;  %s2491_s23 = sadd.s32 4294967294, %s3992_s21   ;;  %s3992_s21 = sphi %s4035_s21, %s4890_s21   ;;  %s3988_s20 = sphi %s4033_s20, %s4889_s20   ;;  %s3984_s19 = sphi %s4031_s19, %s4888_s19   ;;  %s3980_s18 = sphi %s4029_s18, %s4887_s18  }
   0x4   : > { %s4054_s24 = sadd.s32 1, %s3992_s21   ;;  %s135_s25 = sadd.s32 1, %s3988_s20 }
   0x5   : > { %s132_s26 = ssub.s32 %s3992_s21, %s4054_s24  ;;  %p145_p0 = scmp.ne.s32.totalorder %s3988_s20, %s3984_s19 }
   0x6   : > { %p133_p1 = scmp.eq.s32.totalorder %s132_s26, 0  ;;  %p146_p2 = scmp.eq.s32.totalorder %s4050_s22, 1 }
   0x7   : > { %p151_p3 = scmp.ne.s32.totalorder %s3984_s19, %s3980_s18  ;;  %p152_p4 = scmp.eq.s32.totalorder %s2491_s23, 1 }
   0x8   : > { %s4065_s27 = scalar_select %p133_p1, %s3988_s20, %s135_s25  }
   0x9   : > { %p4067_p5 = por %p146_p2, %p145_p0  ;;  %p4071_p6 = por %p152_p4, %p151_p3 }
   0xa   : > { %p2494_p7 = scmp.ge.s32.totalorder %s3992_s21, 1  ;;  %p190_p8 = scmp.lt.s32.totalorder %s3992_s21, 3 }
   0xc   : > { %p191_p9 = pnand %p2494_p7, %p190_p8 }
   0xd   : > { %v223_v0 = vld [vmem:[%s4880_s1 + $0x8] sm:$0xff] (!%p191_p9)  ;;  %v226_v1 = vld [vmem:[%s4880_s1 + $0x20] sm:$0xff] (!%p191_p9)  ;;  %v225_v4 = vld [vmem:[%s4880_s1 + $0x18] sm:$0xff] (!%p191_p9)  ;;  %v3994_v7 = vmov (!%p191_p9), 0.0|0.0   ;;  %v3995_v8 = vmov (!%p191_p9), 0.0   ;;  %vm3996_vm0 = vmmov (!%p191_p9), 0  }
   0xe   : > { %194 = sbr.rel (%p191_p9) target bundleno = 3213 (0xc8d), region = 40  ;;  %v222_v2 = vld [vmem:[%s4880_s1] sm:$0xff] (!%p191_p9)  ;;  %v4086_v3 = vpack.c.bf16 (!%p191_p9), %v226_v1, %v223_v0  ;;  %v229_v5 = vld [vmem:[%s4880_s1 + $0x38] sm:$0xff] (!%p191_p9)  ;;  %v232_v6 = vld [vmem:[%s4880_s1 + $0x50] sm:$0xff] (!%p191_p9)  ;;  %3165 = vmatprep.subr.bf16.mxu1 (!%p191_p9), %v3994_v7  ;;  %339 = vmatprep.mubr.f32.mxu0 (!%p191_p9), %v3995_v8  ;;  %272 = vst [vmem:[#allocation3] sm:$0x1] (!%p191_p9), %v3995_v8 }
   0xf   : > { %273 = vst [vmem:[#allocation4] sm:$0x1] (!%p191_p9), %v3995_v8  ;;  %v4101_v9 = vpack.c.bf16 (!%p191_p9), %v225_v4, %v222_v2  ;;  %v4103_v10 = vpack.c.bf16 (!%p191_p9), %v232_v6, %v229_v5  ;;  %v228_v11 = vld [vmem:[%s4880_s1 + $0x30] sm:$0xff] (!%p191_p9)  ;;  %v231_v12 = vld [vmem:[%s4880_s1 + $0x48] sm:$0xff] (!%p191_p9)  ;;  %2745 = vmatprep.mubr.msk.f32.mxu1 (!%p191_p9), %vm3996_vm0, %v3995_v8  ;;  %v238_v14 = vld [vmem:[%s4880_s1 + $0x80] sm:$0xff] (!%p191_p9)  ;;  %p217_p10 = scmp.lt.s32.totalorder (!%p191_p9), %s4050_s22, 1 }
  0x10   : > { %v235_v13 = vld [vmem:[%s4880_s1 + $0x68] sm:$0xff] (!%p191_p9)  ;;  %3134 = vmatprep.subr.bf16.mxu0 (!%p191_p9), %v4086_v3  ;;  %v4121_v15 = vpack.c.bf16 (!%p191_p9), %v231_v12, %v228_v11  ;;  %v234_v17 = vld [vmem:[%s4880_s1 + $0x60] sm:$0xff] (!%p191_p9)  ;;  %v237_v18 = vld [vmem:[%s4880_s1 + $0x78] sm:$0xff] (!%p191_p9)  ;;  %vm439_vm1 = vcmask (!%p191_p9), 1040384   ;;  %s215_s14 = sand.u32 (!%p191_p9), 1, %s3984_s19   ;;  %s2506_s17 = sshll.u32 (!%p191_p9), %s4050_s22, 4 }
  0x11   : > { %3136 = vmatpush1.bf16.msra.mxu0 (!%p191_p9), %v4101_v9  ;;  %v4124_v16 = vpack.c.bf16 (!%p191_p9), %v238_v14, %v235_v13  ;;  %v241_v19 = vld [vmem:[%s4880_s1 + $0x98] sm:$0xff] (!%p191_p9)  ;;  %v244_v20 = vld [vmem:[%s4880_s1 + $0xb0] sm:$0xff] (!%p191_p9)  ;;  %v227_v22 = vld [vmem:[%s4880_s1 + $0x28] sm:$0xff] (!%p191_p9)  ;;  %v4145_v23 = vpack.c.bf16 (!%p191_p9), %v237_v18, %v234_v17  ;;  %v3997_v17 = vmov (!%p191_p9), -1e+30   ;;  %s216_s23 = scalar_lea.vmem (!%p191_p9), [#allocation5], %s215_s14 }
  0x12   : > { %3138 = vmatprep.subr.bf16.mxu0 (!%p191_p9), %v4103_v10  ;;  %v224_v21 = vld [vmem:[%s4880_s1 + $0x10] sm:$0xff] (!%p191_p9)  ;;  %v230_v25 = vld [vmem:[%s4880_s1 + $0x40] sm:$0xff] (!%p191_p9)  ;;  %v4153_v26 = vpack.c.bf16 (!%p191_p9), %v244_v20, %v241_v19  ;;  %v243_v28 = vld [vmem:[%s4880_s1 + $0xa8] sm:$0xff] (!%p191_p9)  ;;  %271 = vst [vmem:[#allocation2] sm:$0x1] (!%p191_p9), %v3997_v17  ;;  %s2436_s25 = sshll.u32 (!%p191_p9), %s216_s23, 4  ;;  %s4839_s25 = int_to_ptr.vmem [resolvable:$true] %s2436_s25 }
  0x13   : > { %v4147_v24 = vpack.c.bf16 (!%p191_p9), %v227_v22, %v224_v21  ;;  %v240_v27 = vld [vmem:[%s4880_s1 + $0x90] sm:$0xff] (!%p191_p9)  ;;  %v233_v29 = vld [vmem:[%s4880_s1 + $0x58] sm:$0xff] (!%p191_p9)  ;;  %v247_v30 = vld [vmem:[%s4880_s1 + $0xc8] sm:$0xff] (!%p191_p9)  ;;  %s2424_s7 = scalar_lea.sflag (!%p191_p9), [#allocation6], %s215_s14  ;;  %s3930_s8 = scalar_lea.vmem (!%p191_p9), %s4839_s25, 16 }
  0x14   : > { %v250_v31 = vld [vmem:[%s4880_s1 + $0xe0] sm:$0xff] (!%p191_p9)  ;;  %v4171_v32 = vpack.c.bf16 (!%p191_p9), %v233_v29, %v230_v25  ;;  %v236_v33 = vld [vmem:[%s4880_s1 + $0x70] sm:$0xff] (!%p191_p9)  ;;  %v239_v34 = vld [vmem:[%s4880_s1 + $0x88] sm:$0xff] (!%p191_p9)  ;;  %v4181_v35 = vpack.c.bf16 (!%p191_p9), %v243_v28, %v240_v27  ;;  %p3931_p11 = scmp.ne.s32.totalorder (!%p191_p9), %s4839_s25, %s3930_s8 }
  0x15   : > { %3140 = vmatpush1.bf16.msra.mxu0 %v4121_v15  ;;  %3167 = vmatpush3.bf16.msra.mxu1 %v4147_v24  ;;  %v4184_v36 = vpack.c.bf16 %v250_v31, %v247_v30  ;;  %v246_v37 = vld [vmem:[%s4880_s1 + $0xc0] sm:$0xff]  ;;  %v249_v38 = vld [vmem:[%s4880_s1 + $0xd8] sm:$0xff]  ;;  %v256_v40 = vld [vmem:[%s4880_s1 + $0x110] sm:$0xff]  ;;  %v4199_v41 = vpack.c.bf16 %v239_v34, %v236_v33  ;;  %s218_s30 = scalar_select %p217_p10, %s4050_s22, 1 }
  0x16   : > { %3142 = vmatprep.subr.bf16.mxu0 %v4124_v16  ;;  %3168 = vmatprep.subr.bf16.mxu1 %v3994_v7  ;;  %v253_v39 = vld [vmem:[%s4880_s1 + $0xf8] sm:$0xff]  ;;  %v242_v42 = vld [vmem:[%s4880_s1 + $0xa0] sm:$0xff]  ;;  %v4209_v44 = vpack.c.bf16 %v249_v38, %v246_v37  ;;  %v252_v46 = vld [vmem:[%s4880_s1 + $0xf0] sm:$0xff]  ;;  %p3932_p12 = pnand %p3931_p11, %p4067_p5  ;;  %s3998_s22 = smov [#allocation5]  }
  0x17   : > { %v245_v43 = vld [vmem:[%s4880_s1 + $0xb8] sm:$0xff]  ;;  %v4212_v45 = vpack.c.bf16 %v256_v40, %v253_v39  ;;  %v255_v47 = vld [vmem:[%s4880_s1 + $0x108] sm:$0xff]  ;;  %v262_v49 = vld [vmem:[%s4880_s1 + $0x140] sm:$0xff]  ;;  %s3773_s6 = smul.u32 48, %s218_s30 }
  0x18   : > { %v259_v48 = vld [vmem:[%s4880_s1 + $0x128] sm:$0xff]  ;;  %v4227_v50 = vpack.c.bf16 %v245_v43, %v242_v42  ;;  %v248_v51 = vld [vmem:[%s4880_s1 + $0xd0] sm:$0xff]  ;;  %v4237_v53 = vpack.c.bf16 %v255_v47, %v252_v46  ;;  %v258_v55 = vld [vmem:[%s4880_s1 + $0x120] sm:$0xff]  ;;  %p3933_p13 = pneg %p3932_p12 }
  0x19   : > { %3144 = vmatpush1.bf16.msra.mxu0 %v4145_v23  ;;  %3170 = vmatpush3.bf16.msra.mxu1 %v4171_v32  ;;  %v251_v52 = vld [vmem:[%s4880_s1 + $0xe8] sm:$0xff]  ;;  %v4240_v54 = vpack.c.bf16 %v262_v49, %v259_v48  ;;  %v261_v56 = vld [vmem:[%s4880_s1 + $0x138] sm:$0xff]  ;;  %v268_v58 = vld [vmem:[%s4880_s1 + $0x170] sm:$0xff]  ;;  %s4350_s9 = scalar_lea.vmem %s4879_s0, %s3773_s6  ;;  %s4837_s6 = scalar_lea.hbm %s4884_s5, %s2506_s17 }
  0x1a   : > { %3146 = vmatprep.subr.bf16.mxu0 %v4153_v26  ;;  %3171 = vmatprep.subr.bf16.mxu1 %v3994_v7  ;;  %v265_v57 = vld [vmem:[%s4880_s1 + $0x158] sm:$0xff]  ;;  %v4255_v59 = vpack.c.bf16 %v251_v52, %v248_v51  ;;  %v254_v60 = vld [vmem:[%s4880_s1 + $0x100] sm:$0xff]  ;;  %v4265_v62 = vpack.c.bf16 %v261_v56, %v258_v55  ;;  %v264_v0 = vld [vmem:[%s4880_s1 + $0x150] sm:$0xff] }
  0x1b   : > { %v257_v61 = vld [vmem:[%s4880_s1 + $0x118] sm:$0xff]  ;;  %v4268_v63 = vpack.c.bf16 %v268_v58, %v265_v57  ;;  %v267_v1 = vld [vmem:[%s4880_s1 + $0x168] sm:$0xff]  ;;  %v260_v4 = vld [vmem:[%s4880_s1 + $0x130] sm:$0xff] }
  0x1c   : > { %v4277_v2 = vpack.c.bf16 %v257_v61, %v254_v60  ;;  %v263_v5 = vld [vmem:[%s4880_s1 + $0x148] sm:$0xff]  ;;  %v4287_v6 = vpack.c.bf16 %v267_v1, %v264_v0  ;;  %v266_v12 = vld [vmem:[%s4880_s1 + $0x160] sm:$0xff]  ;;  %v269_v13 = vld [vmem:[%s4880_s1 + $0x178] sm:$0xff] }
  0x1d   : > { %3148 = vmatpush1.bf16.msra.mxu0 %v4181_v35  ;;  %3173 = vmatpush3.bf16.msra.mxu1 %v4199_v41  ;;  %v4291_v11 = vpack.c.bf16 %v263_v5, %v260_v4  ;;  %v4303_v14 = vpack.c.bf16 %v269_v13, %v266_v12  ;;  %v274_v18 = vld [vmem:[%s4350_s9] ss:$8 sm:$0x7]  ;;  %v451_v5 = vld [vmem:[#allocation3] sm:$0x1] }
  0x1e   : > { %3150 = vmatprep.subr.bf16.mxu0 %v4184_v36  ;;  %3174 = vmatprep.subr.bf16.mxu1 %v3994_v7  ;;  %v422_v20 = vrot.slane %v274_v18, 1  ;;  %v430_v37 = vrot.slane %v274_v18, 2  ;;  %v4356_v51 = vld [vmem:[%s4881_s2] sm:$0x1]  ;;  %v455_v12 = vld [vmem:[#allocation4] sm:$0x1] }
  0x1f   : > { %v443_v57 = vld [vmem:[#allocation2] sm:$0x1] }
  0x21   : > { %3152 = vmatpush1.bf16.msra.mxu0 %v4209_v44  ;;  %3176 = vmatpush3.bf16.msra.mxu1 %v4227_v50 }
  0x22   : > { %3154 = vmatprep.subr.bf16.mxu0 %v4212_v45  ;;  %3177 = vmatprep.subr.bf16.mxu1 %v3994_v7 }
  0x25   : > { %3156 = vmatpush1.bf16.msra.mxu0 %v4237_v53  ;;  %3179 = vmatpush3.bf16.msra.mxu1 %v4255_v59 }
  0x26   : > { %3158 = vmatprep.subr.bf16.mxu0 %v4240_v54  ;;  %3180 = vmatprep.subr.bf16.mxu1 %v3994_v7 }
  0x29   : > { %3160 = vmatpush1.bf16.msra.mxu0 %v4265_v62  ;;  %3182 = vmatpush3.bf16.msra.mxu1 %v4277_v2 }
  0x2a   : > { %3162 = vmatprep.subr.bf16.mxu0 %v4268_v63  ;;  %3183 = vmatprep.subr.bf16.mxu1 %v3994_v7 }
  0x2d   : > { %3164 = vmatpush1.bf16.msra.mxu0 %v4287_v6  ;;  %3185 = vmatpush3.bf16.msra.mxu1 %v4291_v11 }
  0x2e   : > { %3190 = vmatprep.subr.bf16.mxu0 %v4086_v3  ;;  %3186 = vmatprep.subr.bf16.mxu1 %v3994_v7 }
  0x30   : > { %340 = vmatmul.mubr.f32.vlgmr.msra.gmra.mrb[0].mxu0 %v3995_v8 }
  0x31   : > { %3192 = vmatpush1.bf16.msra.mxu0 %v4101_v9  ;;  %527 = vmatprep.mubr.f32.mxu0 %v3995_v8 }
  0x32   : > { %3194 = vmatprep.subr.bf16.mxu0 %v4103_v10  ;;  %3188 = vmatpush3.bf16.msra.mxu1 %v4303_v14 }
  0x33   : > { %3221 = vmatprep.subr.bf16.mxu1 %v3994_v7 }
  0x35   : > { %3196 = vmatpush1.bf16.msra.mxu0 %v4121_v15  ;;  %2746 = vmatmul.mubr.f32.vlgmr.msra.gmra.mrb[0].mxu1 %v3995_v8 }
  0x36   : > { %3198 = vmatprep.subr.bf16.mxu0 %v4124_v16  ;;  %3223 = vmatpush3.bf16.msra.mxu1 %v4147_v24 }
  0x37   : > { %2780 = vmatprep.mubr.msk.f32.mxu1 %vm3996_vm0, %v3995_v8  ;;  %3224 = vmatprep.subr.bf16.mxu1 %v3994_v7 }
  0x39   : > { %3200 = vmatpush1.bf16.msra.mxu0 %v4145_v23 }
  0x3a   : > { %3202 = vmatprep.subr.bf16.mxu0 %v4153_v26  ;;  %3226 = vmatpush3.bf16.msra.mxu1 %v4171_v32 }
  0x3b   : > { %3227 = vmatprep.subr.bf16.mxu1 %v3994_v7 }
  0x3d   : > { %3204 = vmatpush1.bf16.msra.mxu0 %v4181_v35 }
  0x3e   : > { %3206 = vmatprep.subr.bf16.mxu0 %v4184_v36  ;;  %3229 = vmatpush3.bf16.msra.mxu1 %v4199_v41 }
  0x3f   : > { %3230 = vmatprep.subr.bf16.mxu1 %v3994_v7 }
  0x41   : > { %3208 = vmatpush1.bf16.msra.mxu0 %v4209_v44 }
  0x42   : > { %3210 = vmatprep.subr.bf16.mxu0 %v4212_v45  ;;  %3232 = vmatpush3.bf16.msra.mxu1 %v4227_v50 }
  0x43   : > { %3233 = vmatprep.subr.bf16.mxu1 %v3994_v7 }
  0x45   : > { %3212 = vmatpush1.bf16.msra.mxu0 %v4237_v53 }
  0x46   : > { %3214 = vmatprep.subr.bf16.mxu0 %v4240_v54  ;;  %3235 = vmatpush3.bf16.msra.mxu1 %v4255_v59 }
  0x47   : > { %3236 = vmatprep.subr.bf16.mxu1 %v3994_v7 }
  0x49   : > { %3216 = vmatpush1.bf16.msra.mxu0 %v4265_v62 }
  0x4a   : > { %3218 = vmatprep.subr.bf16.mxu0 %v4268_v63  ;;  %3238 = vmatpush3.bf16.msra.mxu1 %v4277_v2 }
  0x4b   : > { %3239 = vmatprep.subr.bf16.mxu1 %v3994_v7 }
  0x4d   : > { %3220 = vmatpush1.bf16.msra.mxu0 %v4287_v6 }
  0x4e   : > { %3246 = vmatprep.subr.bf16.mxu0 %v4086_v3  ;;  %3241 = vmatpush3.bf16.msra.mxu1 %v4291_v11 }
  0x4f   : > { %3242 = vmatprep.subr.bf16.mxu1 %v3994_v7 }
  0x52   : > { %3244 = vmatpush3.bf16.msra.mxu1 %v4303_v14 }
  0x53   : > { %3277 = vmatprep.subr.bf16.mxu1 %v3994_v7 }
 0x103   : > { %v341_v19 = vpop.f32.mrb[0].mxu0 }
 0x104   : > { %v416_v21 = vadd.f32 %v341_v19, %v274_v18  ;;  %v343_v22 = vpop.f32.mrb[1].mxu0 }
 0x105   : > { %v424_v27 = vadd.f32 %v422_v20, %v343_v22 }
 0x106   : > { %v417_v25 = vmul.f32 0.5, %v416_v21 }
 0x107   : > { %v425_v30 = vmul.f32 0.5, %v424_v27 }
 0x108   : > { %3817 = vtanh.f32 %v417_v25  ;;  %v412_v28 = vpop.f32.mrb[0].mxu1  ;;  %v2496_v25 = vld [vmem:[%s4350_s9 + $0x1] ss:$8 sm:$0x7] }
 0x109   : > { %v2747_v29 = vpop.f32.mrb[1].mxu1  ;;  %3819 = vtanh.f32 %v425_v30 }
 0x10a   : > { %v610_v29 = vrot.slane %v2496_v25, 1 }
 0x112   : > { %v3818_v31 = vpop.eup %3817 }
 0x113   : > { %v419_v33 = vadd.f32 1.0, %v3818_v31  ;;  %v3820_v39 = vpop.eup %3819 }
 0x114   : > { %v427_v42 = vadd.f32 1.0, %v3820_v39 }
 0x115   : > { %v420_v34 = vmul.f32 0.5, %v419_v33 }
 0x116   : > { %v428_v43 = vmul.f32 0.5, %v427_v42 }
 0x117   : > { %v429_v38 = vmul.f32 %v420_v34, %v412_v28 }
 0x118   : > { %v434_v46 = vsub.f32 1.0, %v428_v43  ;;  %v436_v48 = vmul.f32 0.0, %v428_v43  ;;  %v618_v43 = vrot.slane %v2496_v25, 2 }
 0x119   : > { %v432_v40 = vadd.f32 %v430_v37, %v429_v38 }
 0x11b   : > { %3821 = vtanh.f32 %v432_v40 }
 0x125   : > { %v3822_v47 = vpop.eup %3821 }
 0x126   : > { %v435_v49 = vmul.f32 %v3822_v47, %v434_v46 }
 0x128   : > { %v4358_v52 = vadd.f32 %v436_v48, %v435_v49 }
 0x12a   : > { %528 = vmatmul.mubr.f32.vlgmr.msra.gmra.mrb[2].mxu0 %v4358_v52  ;;  %2781 = vmatmul.mubr.f32.vlgmr.msra.gmra.mrb[2].mxu1 %v4358_v52  ;;  %v438_v55 = vmul.f32 %v4358_v52, %v4356_v51 }
 0x12b   : > { %3248 = vmatpush1.bf16.msra.mxu0 %v4101_v9  ;;  %3279 = vmatpush3.bf16.msra.mxu1 %v4147_v24 }
 0x12c   : > { %v440_v56 = vsel %vm439_vm1, %v438_v55, 0.0  ;;  %3250 = vmatprep.subr.bf16.mxu0 %v4103_v10  ;;  %3280 = vmatprep.subr.bf16.mxu1 %v3994_v7 }
 0x12d   : > { %441 = vadd.xlane.f32.xlu0 %v440_v56  ;;  %714 = vmatprep.mubr.f32.mxu0 %v3995_v8 }
 0x12e   : > { %2815 = vmatprep.mubr.msk.f32.mxu1 %vm3996_vm0, %v3995_v8 }
 0x12f   : > { %3252 = vmatpush1.bf16.msra.mxu0 %v4121_v15  ;;  %3282 = vmatpush3.bf16.msra.mxu1 %v4171_v32 }
 0x130   : > { %3254 = vmatprep.subr.bf16.mxu0 %v4124_v16  ;;  %3283 = vmatprep.subr.bf16.mxu1 %v3994_v7 }
 0x133   : > { %3256 = vmatpush1.bf16.msra.mxu0 %v4145_v23  ;;  %3285 = vmatpush3.bf16.msra.mxu1 %v4199_v41 }
 0x134   : > { %3258 = vmatprep.subr.bf16.mxu0 %v4153_v26  ;;  %3286 = vmatprep.subr.bf16.mxu1 %v3994_v7 }
 0x137   : > { %3260 = vmatpush1.bf16.msra.mxu0 %v4181_v35  ;;  %3288 = vmatpush3.bf16.msra.mxu1 %v4227_v50 }
 0x138   : > { %3262 = vmatprep.subr.bf16.mxu0 %v4184_v36  ;;  %3289 = vmatprep.subr.bf16.mxu1 %v3994_v7 }
 0x13b   : > { %3264 = vmatpush1.bf16.msra.mxu0 %v4209_v44  ;;  %3291 = vmatpush3.bf16.msra.mxu1 %v4255_v59 }
 0x13c   : > { %3266 = vmatprep.subr.bf16.mxu0 %v4212_v45  ;;  %3292 = vmatprep.subr.bf16.mxu1 %v3994_v7 }
 0x13f   : > { %3268 = vmatpush1.bf16.msra.mxu0 %v4237_v53  ;;  %3294 = vmatpush3.bf16.msra.mxu1 %v4277_v2 }
 0x140   : > { %3270 = vmatprep.subr.bf16.mxu0 %v4240_v54  ;;  %3295 = vmatprep.subr.bf16.mxu1 %v3994_v7 }
 0x143   : > { %3272 = vmatpush1.bf16.msra.mxu0 %v4265_v62  ;;  %3297 = vmatpush3.bf16.msra.mxu1 %v4291_v11 }
 0x144   : > { %3274 = vmatprep.subr.bf16.mxu0 %v4268_v63  ;;  %3298 = vmatprep.subr.bf16.mxu1 %v3994_v7 }
 0x147   : > { %3276 = vmatpush1.bf16.msra.mxu0 %v4287_v6  ;;  %3300 = vmatpush3.bf16.msra.mxu1 %v4303_v14 }
 0x148   : > { %3302 = vmatprep.subr.bf16.mxu0 %v4086_v3  ;;  %3333 = vmatprep.subr.bf16.mxu1 %v3994_v7 }
 0x1ba   : > { %v442_v58 = vpop.xlane.xlu0 %441 }
 0x1bb   : > { %v444_v60 = vmax.f32 %v443_v57, %v442_v58 }
 0x1bd   : > { %v445_v61 = vsub.f32 %v443_v57, %v444_v60  ;;  %v448_v0 = vsub.f32 %v442_v58, %v444_v60  ;;  %460 = vst [vmem:[#allocation2] sm:$0x1] %v444_v60 }
 0x1bf   : > { %v446_v1 = vmul.f32 1.442695, %v445_v61  ;;  %v449_v4 = vmul.f32 1.442695, %v448_v0 }
 0x1c1   : > { %3823 = vpow2.f32 %v446_v1 }
 0x1c2   : > { %3825 = vpow2.f32 %v449_v4 }
 0x1cb   : > { %v3824_v13 = vpop.eup %3823 }
 0x1cc   : > { %v3826_v17 = vpop.eup %3825  ;;  %v452_v18 = vmul.f32 %v3824_v13, %v451_v5  ;;  %v456_v19 = vmul.f32 %v3824_v13, %v455_v12 }
 0x1cd   : > { %v457_v20 = vmul.f32 %v3826_v17, %v4358_v52 }
 0x1ce   : > { %v453_v21 = vadd.f32 %v3826_v17, %v452_v18 }
 0x1cf   : > { %v458_v22 = vadd.f32 %v457_v20, %v456_v19 }
 0x1d0   : > { %454 = vst [vmem:[#allocation3] sm:$0x1] %v453_v21 }
 0x1d1   : > { %459 = vst [vmem:[#allocation4] sm:$0x1] %v458_v22 }
 0x1d7   : > { %v638_v20 = vld [vmem:[#allocation3] sm:$0x1] }
 0x1d8   : > { %v642_v21 = vld [vmem:[#allocation4] sm:$0x1] }
 0x1fd   : > { %v529_v27 = vpop.f32.mrb[2].mxu0  ;;  %v600_v28 = vpop.f32.mrb[2].mxu1 }
 0x1fe   : > { %v604_v30 = vadd.f32 %v2496_v25, %v529_v27  ;;  %v531_v31 = vpop.f32.mrb[3].mxu0  ;;  %v2782_v33 = vpop.f32.mrb[3].mxu1 }
 0x1ff   : > { %v612_v37 = vadd.f32 %v610_v29, %v531_v31  ;;  %v2497_v31 = vld [vmem:[%s4350_s9 + $0x2] ss:$8 sm:$0x7] }
 0x200   : > { %v605_v34 = vmul.f32 0.5, %v604_v30 }
 0x201   : > { %v613_v38 = vmul.f32 0.5, %v612_v37  ;;  %v797_v37 = vrot.slane %v2497_v31, 1 }
 0x202   : > { %3827 = vtanh.f32 %v605_v34 }
 0x203   : > { %3829 = vtanh.f32 %v613_v38 }
 0x20c   : > { %v3828_v39 = vpop.eup %3827 }
 0x20d   : > { %v607_v40 = vadd.f32 1.0, %v3828_v39  ;;  %v3830_v47 = vpop.eup %3829 }
 0x20e   : > { %v615_v49 = vadd.f32 1.0, %v3830_v47 }
 0x20f   : > { %v608_v42 = vmul.f32 0.5, %v607_v40 }
 0x210   : > { %v616_v55 = vmul.f32 0.5, %v615_v49 }
 0x211   : > { %v617_v46 = vmul.f32 %v608_v42, %v600_v28 }
 0x212   : > { %v622_v56 = vsub.f32 1.0, %v616_v55  ;;  %v624_v60 = vmul.f32 %v616_v55, %v4358_v52  ;;  %v630_v52 = vld [vmem:[#allocation2] sm:$0x1]  ;;  %v805_v55 = vrot.slane %v2497_v31, 2 }
 0x213   : > { %v620_v48 = vadd.f32 %v618_v43, %v617_v46 }
 0x215   : > { %3831 = vtanh.f32 %v620_v48 }
 0x21f   : > { %v3832_v57 = vpop.eup %3831 }
 0x220   : > { %v623_v58 = vmul.f32 %v3832_v57, %v622_v56 }
 0x222   : > { %v4403_v61 = vadd.f32 %v624_v60, %v623_v58 }
 0x224   : > { %715 = vmatmul.mubr.f32.vlgmr.msra.gmra.mrb[4].mxu0 %v4403_v61  ;;  %2816 = vmatmul.mubr.f32.vlgmr.msra.gmra.mrb[4].mxu1 %v4403_v61  ;;  %v626_v0 = vmul.f32 %v4403_v61, %v4356_v51 }
 0x225   : > { %3304 = vmatpush1.bf16.msra.mxu0 %v4101_v9  ;;  %3335 = vmatpush3.bf16.msra.mxu1 %v4147_v24 }
 0x226   : > { %v627_v1 = vsel %vm439_vm1, %v626_v0, 0.0  ;;  %3306 = vmatprep.subr.bf16.mxu0 %v4103_v10  ;;  %3336 = vmatprep.subr.bf16.mxu1 %v3994_v7 }
 0x227   : > { %628 = vadd.xlane.f32.xlu0 %v627_v1  ;;  %901 = vmatprep.mubr.f32.mxu0 %v3995_v8 }
 0x228   : > { %2850 = vmatprep.mubr.msk.f32.mxu1 %vm3996_vm0, %v3995_v8 }
 0x229   : > { %3308 = vmatpush1.bf16.msra.mxu0 %v4121_v15  ;;  %3338 = vmatpush3.bf16.msra.mxu1 %v4171_v32 }
 0x22a   : > { %3310 = vmatprep.subr.bf16.mxu0 %v4124_v16  ;;  %3339 = vmatprep.subr.bf16.mxu1 %v3994_v7 }
 0x22d   : > { %3312 = vmatpush1.bf16.msra.mxu0 %v4145_v23  ;;  %3341 = vmatpush3.bf16.msra.mxu1 %v4199_v41 }
 0x22e   : > { %3314 = vmatprep.subr.bf16.mxu0 %v4153_v26  ;;  %3342 = vmatprep.subr.bf16.mxu1 %v3994_v7 }
 0x231   : > { %3316 = vmatpush1.bf16.msra.mxu0 %v4181_v35  ;;  %3344 = vmatpush3.bf16.msra.mxu1 %v4227_v50 }
 0x232   : > { %3318 = vmatprep.subr.bf16.mxu0 %v4184_v36  ;;  %3345 = vmatprep.subr.bf16.mxu1 %v3994_v7 }
 0x235   : > { %3320 = vmatpush1.bf16.msra.mxu0 %v4209_v44  ;;  %3347 = vmatpush3.bf16.msra.mxu1 %v4255_v59 }
 0x236   : > { %3322 = vmatprep.subr.bf16.mxu0 %v4212_v45  ;;  %3348 = vmatprep.subr.bf16.mxu1 %v3994_v7 }
 0x239   : > { %3324 = vmatpush1.bf16.msra.mxu0 %v4237_v53  ;;  %3350 = vmatpush3.bf16.msra.mxu1 %v4277_v2 }
 0x23a   : > { %3326 = vmatprep.subr.bf16.mxu0 %v4240_v54  ;;  %3351 = vmatprep.subr.bf16.mxu1 %v3994_v7 }
 0x23d   : > { %3328 = vmatpush1.bf16.msra.mxu0 %v4265_v62  ;;  %3353 = vmatpush3.bf16.msra.mxu1 %v4291_v11 }
 0x23e   : > { %3330 = vmatprep.subr.bf16.mxu0 %v4268_v63  ;;  %3354 = vmatprep.subr.bf16.mxu1 %v3994_v7 }
 0x241   : > { %3332 = vmatpush1.bf16.msra.mxu0 %v4287_v6  ;;  %3356 = vmatpush3.bf16.msra.mxu1 %v4303_v14 }
 0x242   : > { %3358 = vmatprep.subr.bf16.mxu0 %v4086_v3  ;;  %3389 = vmatprep.subr.bf16.mxu1 %v3994_v7 }
 0x2b4   : > { %v629_v4 = vpop.xlane.xlu0 %628 }
 0x2b5   : > { %v631_v5 = vmax.f32 %v630_v52, %v629_v4 }
 0x2b7   : > { %v632_v12 = vsub.f32 %v630_v52, %v631_v5  ;;  %v635_v13 = vsub.f32 %v629_v4, %v631_v5  ;;  %647 = vst [vmem:[#allocation2] sm:$0x1] %v631_v5 }
 0x2b9   : > { %v633_v17 = vmul.f32 1.442695, %v632_v12  ;;  %v636_v18 = vmul.f32 1.442695, %v635_v13 }
 0x2bb   : > { %3833 = vpow2.f32 %v633_v17 }
 0x2bc   : > { %3835 = vpow2.f32 %v636_v18 }
 0x2be   : > { %v817_v18 = vld [vmem:[#allocation2] sm:$0x1] }
 0x2c5   : > { %v3834_v19 = vpop.eup %3833 }
 0x2c6   : > { %v3836_v22 = vpop.eup %3835  ;;  %v639_v25 = vmul.f32 %v3834_v19, %v638_v20  ;;  %v643_v27 = vmul.f32 %v3834_v19, %v642_v21 }
 0x2c7   : > { %v644_v28 = vmul.f32 %v3836_v22, %v4403_v61 }
 0x2c8   : > { %v640_v29 = vadd.f32 %v3836_v22, %v639_v25 }
 0x2c9   : > { %v645_v30 = vadd.f32 %v644_v28, %v643_v27 }
 0x2ca   : > { %641 = vst [vmem:[#allocation3] sm:$0x1] %v640_v29 }
 0x2cb   : > { %646 = vst [vmem:[#allocation4] sm:$0x1] %v645_v30 }
 0x2d1   : > { %v825_v28 = vld [vmem:[#allocation3] sm:$0x1] }
 0x2d2   : > { %v829_v29 = vld [vmem:[#allocation4] sm:$0x1] }
 0x2f7   : > { %v716_v33 = vpop.f32.mrb[4].mxu0  ;;  %v787_v34 = vpop.f32.mrb[4].mxu1 }
 0x2f8   : > { %v791_v38 = vadd.f32 %v2497_v31, %v716_v33  ;;  %v718_v39 = vpop.f32.mrb[5].mxu0  ;;  %v2817_v40 = vpop.f32.mrb[5].mxu1 }
 0x2f9   : > { %v799_v43 = vadd.f32 %v797_v37, %v718_v39  ;;  %v2498_v39 = vld [vmem:[%s4350_s9 + $0x3] ss:$8 sm:$0x7] }
 0x2fa   : > { %v792_v42 = vmul.f32 0.5, %v791_v38 }
 0x2fb   : > { %v800_v46 = vmul.f32 0.5, %v799_v43  ;;  %v984_v43 = vrot.slane %v2498_v39, 1 }
 0x2fc   : > { %3837 = vtanh.f32 %v792_v42 }
 0x2fd   : > { %3839 = vtanh.f32 %v800_v46 }
 0x306   : > { %v3838_v47 = vpop.eup %3837 }
 0x307   : > { %v794_v48 = vadd.f32 1.0, %v3838_v47  ;;  %v3840_v57 = vpop.eup %3839 }
 0x308   : > { %v802_v60 = vadd.f32 1.0, %v3840_v57 }
 0x309   : > { %v795_v49 = vmul.f32 0.5, %v794_v48 }
 0x30a   : > { %v803_v0 = vmul.f32 0.5, %v802_v60 }
 0x30b   : > { %v804_v56 = vmul.f32 %v795_v49, %v787_v34 }
 0x30c   : > { %v809_v1 = vsub.f32 1.0, %v803_v0  ;;  %v811_v5 = vmul.f32 %v803_v0, %v4403_v61  ;;  %v992_v0 = vrot.slane %v2498_v39, 2 }
 0x30d   : > { %v807_v58 = vadd.f32 %v805_v55, %v804_v56 }
 0x30f   : > { %3841 = vtanh.f32 %v807_v58 }
 0x319   : > { %v3842_v52 = vpop.eup %3841 }
 0x31a   : > { %v810_v4 = vmul.f32 %v3842_v52, %v809_v1 }
 0x31c   : > { %v4448_v12 = vadd.f32 %v811_v5, %v810_v4 }
 0x31e   : > { %902 = vmatmul.mubr.f32.vlgmr.msra.gmra.mrb[6].mxu0 %v4448_v12  ;;  %2851 = vmatmul.mubr.f32.vlgmr.msra.gmra.mrb[6].mxu1 %v4448_v12  ;;  %v813_v13 = vmul.f32 %v4448_v12, %v4356_v51 }
 0x31f   : > { %3360 = vmatpush1.bf16.msra.mxu0 %v4101_v9  ;;  %3391 = vmatpush3.bf16.msra.mxu1 %v4147_v24 }
 0x320   : > { %v814_v17 = vsel %vm439_vm1, %v813_v13, 0.0  ;;  %3362 = vmatprep.subr.bf16.mxu0 %v4103_v10  ;;  %3392 = vmatprep.subr.bf16.mxu1 %v3994_v7 }
 0x321   : > { %815 = vadd.xlane.f32.xlu1 %v814_v17  ;;  %1088 = vmatprep.mubr.f32.mxu0 %v3995_v8 }
 0x322   : > { %2885 = vmatprep.mubr.msk.f32.mxu1 %vm3996_vm0, %v3995_v8 }
 0x323   : > { %3364 = vmatpush1.bf16.msra.mxu0 %v4121_v15  ;;  %3394 = vmatpush3.bf16.msra.mxu1 %v4171_v32 }
 0x324   : > { %3366 = vmatprep.subr.bf16.mxu0 %v4124_v16  ;;  %3395 = vmatprep.subr.bf16.mxu1 %v3994_v7 }
 0x327   : > { %3368 = vmatpush1.bf16.msra.mxu0 %v4145_v23  ;;  %3397 = vmatpush3.bf16.msra.mxu1 %v4199_v41 }
 0x328   : > { %3370 = vmatprep.subr.bf16.mxu0 %v4153_v26  ;;  %3398 = vmatprep.subr.bf16.mxu1 %v3994_v7 }
 0x32b   : > { %3372 = vmatpush1.bf16.msra.mxu0 %v4181_v35  ;;  %3400 = vmatpush3.bf16.msra.mxu1 %v4227_v50 }
 0x32c   : > { %3374 = vmatprep.subr.bf16.mxu0 %v4184_v36  ;;  %3401 = vmatprep.subr.bf16.mxu1 %v3994_v7 }
 0x32f   : > { %3376 = vmatpush1.bf16.msra.mxu0 %v4209_v44  ;;  %3403 = vmatpush3.bf16.msra.mxu1 %v4255_v59 }
 0x330   : > { %3378 = vmatprep.subr.bf16.mxu0 %v4212_v45  ;;  %3404 = vmatprep.subr.bf16.mxu1 %v3994_v7 }
 0x333   : > { %3380 = vmatpush1.bf16.msra.mxu0 %v4237_v53  ;;  %3406 = vmatpush3.bf16.msra.mxu1 %v4277_v2 }
 0x334   : > { %3382 = vmatprep.subr.bf16.mxu0 %v4240_v54  ;;  %3407 = vmatprep.subr.bf16.mxu1 %v3994_v7 }
 0x337   : > { %3384 = vmatpush1.bf16.msra.mxu0 %v4265_v62  ;;  %3409 = vmatpush3.bf16.msra.mxu1 %v4291_v11 }
 0x338   : > { %3386 = vmatprep.subr.bf16.mxu0 %v4268_v63  ;;  %3410 = vmatprep.subr.bf16.mxu1 %v3994_v7 }
 0x33b   : > { %3388 = vmatpush1.bf16.msra.mxu0 %v4287_v6  ;;  %3412 = vmatpush3.bf16.msra.mxu1 %v4303_v14 }
 0x33c   : > { %3414 = vmatprep.subr.bf16.mxu0 %v4086_v3  ;;  %3445 = vmatprep.subr.bf16.mxu1 %v3994_v7 }
 0x3ae   : > { %v816_v61 = vpop.xlane.xlu1 %815 }
 0x3af   : > { %v818_v19 = vmax.f32 %v817_v18, %v816_v61 }
 0x3b1   : > { %v819_v20 = vsub.f32 %v817_v18, %v818_v19  ;;  %v822_v21 = vsub.f32 %v816_v61, %v818_v19  ;;  %834 = vst [vmem:[#allocation2] sm:$0x1] %v818_v19 }
 0x3b3   : > { %v820_v22 = vmul.f32 1.442695, %v819_v20  ;;  %v823_v25 = vmul.f32 1.442695, %v822_v21 }
 0x3b5   : > { %3843 = vpow2.f32 %v820_v22 }
 0x3b6   : > { %3845 = vpow2.f32 %v823_v25 }
 0x3b8   : > { %v1004_v25 = vld [vmem:[#allocation2] sm:$0x1] }
 0x3bf   : > { %v3844_v27 = vpop.eup %3843 }
 0x3c0   : > { %v3846_v30 = vpop.eup %3845  ;;  %v826_v31 = vmul.f32 %v3844_v27, %v825_v28  ;;  %v830_v33 = vmul.f32 %v3844_v27, %v829_v29 }
 0x3c1   : > { %v831_v34 = vmul.f32 %v3846_v30, %v4448_v12 }
 0x3c2   : > { %v827_v37 = vadd.f32 %v3846_v30, %v826_v31 }
 0x3c3   : > { %v832_v38 = vadd.f32 %v831_v34, %v830_v33 }
 0x3c4   : > { %828 = vst [vmem:[#allocation3] sm:$0x1] %v827_v37 }
 0x3c5   : > { %833 = vst [vmem:[#allocation4] sm:$0x1] %v832_v38 }
 0x3cb   : > { %v1012_v34 = vld [vmem:[#allocation3] sm:$0x1] }
 0x3cc   : > { %v1016_v37 = vld [vmem:[#allocation4] sm:$0x1] }
 0x3f1   : > { %v903_v40 = vpop.f32.mrb[6].mxu0  ;;  %v974_v42 = vpop.f32.mrb[6].mxu1 }
 0x3f2   : > { %v978_v46 = vadd.f32 %v2498_v39, %v903_v40  ;;  %v905_v47 = vpop.f32.mrb[7].mxu0  ;;  %v2852_v48 = vpop.f32.mrb[7].mxu1 }
 0x3f3   : > { %v986_v55 = vadd.f32 %v984_v43, %v905_v47  ;;  %v2499_v47 = vld [vmem:[%s4350_s9 + $0x4] ss:$8 sm:$0x7] }
 0x3f4   : > { %v979_v49 = vmul.f32 0.5, %v978_v46 }
 0x3f5   : > { %v987_v56 = vmul.f32 0.5, %v986_v55  ;;  %v1171_v55 = vrot.slane %v2499_v47, 1 }
 0x3f6   : > { %3847 = vtanh.f32 %v979_v49 }
 0x3f7   : > { %3849 = vtanh.f32 %v987_v56 }
 0x400   : > { %v3848_v57 = vpop.eup %3847 }
 0x401   : > { %v981_v58 = vadd.f32 1.0, %v3848_v57  ;;  %v3850_v52 = vpop.eup %3849 }
 0x402   : > { %v989_v5 = vadd.f32 1.0, %v3850_v52 }
 0x403   : > { %v982_v60 = vmul.f32 0.5, %v981_v58 }
 0x404   : > { %v990_v13 = vmul.f32 0.5, %v989_v5 }
 0x405   : > { %v991_v1 = vmul.f32 %v982_v60, %v974_v42 }
 0x406   : > { %v996_v17 = vsub.f32 1.0, %v990_v13  ;;  %v998_v19 = vmul.f32 %v990_v13, %v4448_v12  ;;  %v1179_v13 = vrot.slane %v2499_v47, 2 }
 0x407   : > { %v994_v4 = vadd.f32 %v992_v0, %v991_v1 }
 0x409   : > { %3851 = vtanh.f32 %v994_v4 }
 0x413   : > { %v3852_v61 = vpop.eup %3851 }
 0x414   : > { %v997_v18 = vmul.f32 %v3852_v61, %v996_v17 }
 0x416   : > { %v4493_v20 = vadd.f32 %v998_v19, %v997_v18 }
 0x418   : > { %1089 = vmatmul.mubr.f32.vlgmr.msra.gmra.mrb[8].mxu0 %v4493_v20  ;;  %2886 = vmatmul.mubr.f32.vlgmr.msra.gmra.mrb[8].mxu1 %v4493_v20  ;;  %v1000_v21 = vmul.f32 %v4493_v20, %v4356_v51 }
 0x419   : > { %3416 = vmatpush1.bf16.msra.mxu0 %v4101_v9  ;;  %3447 = vmatpush3.bf16.msra.mxu1 %v4147_v24 }
 0x41a   : > { %v1001_v22 = vsel %vm439_vm1, %v1000_v21, 0.0  ;;  %3418 = vmatprep.subr.bf16.mxu0 %v4103_v10  ;;  %3448 = vmatprep.subr.bf16.mxu1 %v3994_v7 }
 0x41b   : > { %1002 = vadd.xlane.f32.xlu1 %v1001_v22  ;;  %1275 = vmatprep.mubr.f32.mxu0 %v3995_v8 }
 0x41c   : > { %2920 = vmatprep.mubr.msk.f32.mxu1 %vm3996_vm0, %v3995_v8 }
 0x41d   : > { %3420 = vmatpush1.bf16.msra.mxu0 %v4121_v15  ;;  %3450 = vmatpush3.bf16.msra.mxu1 %v4171_v32 }
 0x41e   : > { %3422 = vmatprep.subr.bf16.mxu0 %v4124_v16  ;;  %3451 = vmatprep.subr.bf16.mxu1 %v3994_v7 }
 0x421   : > { %3424 = vmatpush1.bf16.msra.mxu0 %v4145_v23  ;;  %3453 = vmatpush3.bf16.msra.mxu1 %v4199_v41 }
 0x422   : > { %3426 = vmatprep.subr.bf16.mxu0 %v4153_v26  ;;  %3454 = vmatprep.subr.bf16.mxu1 %v3994_v7 }
 0x425   : > { %3428 = vmatpush1.bf16.msra.mxu0 %v4181_v35  ;;  %3456 = vmatpush3.bf16.msra.mxu1 %v4227_v50 }
 0x426   : > { %3430 = vmatprep.subr.bf16.mxu0 %v4184_v36  ;;  %3457 = vmatprep.subr.bf16.mxu1 %v3994_v7 }
 0x429   : > { %3432 = vmatpush1.bf16.msra.mxu0 %v4209_v44  ;;  %3459 = vmatpush3.bf16.msra.mxu1 %v4255_v59 }
 0x42a   : > { %3434 = vmatprep.subr.bf16.mxu0 %v4212_v45  ;;  %3460 = vmatprep.subr.bf16.mxu1 %v3994_v7 }
 0x42d   : > { %3436 = vmatpush1.bf16.msra.mxu0 %v4237_v53  ;;  %3462 = vmatpush3.bf16.msra.mxu1 %v4277_v2 }
 0x42e   : > { %3438 = vmatprep.subr.bf16.mxu0 %v4240_v54  ;;  %3463 = vmatprep.subr.bf16.mxu1 %v3994_v7 }
 0x431   : > { %3440 = vmatpush1.bf16.msra.mxu0 %v4265_v62  ;;  %3465 = vmatpush3.bf16.msra.mxu1 %v4291_v11 }
 0x432   : > { %3442 = vmatprep.subr.bf16.mxu0 %v4268_v63  ;;  %3466 = vmatprep.subr.bf16.mxu1 %v3994_v7 }
 0x435   : > { %3444 = vmatpush1.bf16.msra.mxu0 %v4287_v6  ;;  %3468 = vmatpush3.bf16.msra.mxu1 %v4303_v14 }
 0x436   : > { %3470 = vmatprep.subr.bf16.mxu0 %v4086_v3  ;;  %3501 = vmatprep.subr.bf16.mxu1 %v3994_v7 }
 0x4a8   : > { %v1003_v12 = vpop.xlane.xlu1 %1002 }
 0x4a9   : > { %v1005_v27 = vmax.f32 %v1004_v25, %v1003_v12 }
 0x4ab   : > { %v1006_v28 = vsub.f32 %v1004_v25, %v1005_v27  ;;  %v1009_v29 = vsub.f32 %v1003_v12, %v1005_v27  ;;  %1021 = vst [vmem:[#allocation2] sm:$0x1] %v1005_v27 }
 0x4ad   : > { %v1007_v30 = vmul.f32 1.442695, %v1006_v28  ;;  %v1010_v31 = vmul.f32 1.442695, %v1009_v29 }
 0x4af   : > { %3853 = vpow2.f32 %v1007_v30 }
 0x4b0   : > { %3855 = vpow2.f32 %v1010_v31 }
 0x4b9   : > { %v3854_v33 = vpop.eup %3853 }
 0x4ba   : > { %v3856_v38 = vpop.eup %3855  ;;  %v1013_v39 = vmul.f32 %v3854_v33, %v1012_v34  ;;  %v1017_v40 = vmul.f32 %v3854_v33, %v1016_v37 }
 0x4bb   : > { %v1018_v42 = vmul.f32 %v3856_v38, %v4493_v20 }
 0x4bc   : > { %v1014_v43 = vadd.f32 %v3856_v38, %v1013_v39 }
 0x4bd   : > { %v1019_v46 = vadd.f32 %v1018_v42, %v1017_v40 }
 0x4be   : > { %1015 = vst [vmem:[#allocation3] sm:$0x1] %v1014_v43 }
 0x4bf   : > { %1020 = vst [vmem:[#allocation4] sm:$0x1] %v1019_v46 }
 0x4c5   : > { %v1199_v42 = vld [vmem:[#allocation3] sm:$0x1] }
 0x4c6   : > { %v1203_v43 = vld [vmem:[#allocation4] sm:$0x1] }
 0x4eb   : > { %v1090_v48 = vpop.f32.mrb[8].mxu0  ;;  %v1161_v49 = vpop.f32.mrb[8].mxu1 }
 0x4ec   : > { %v1165_v56 = vadd.f32 %v2499_v47, %v1090_v48  ;;  %v1092_v57 = vpop.f32.mrb[9].mxu0  ;;  %v2887_v58 = vpop.f32.mrb[9].mxu1 }
 0x4ed   : > { %v1173_v0 = vadd.f32 %v1171_v55, %v1092_v57  ;;  %v2500_v57 = vld [vmem:[%s4350_s9 + $0x5] ss:$8 sm:$0x7] }
 0x4ee   : > { %v1166_v60 = vmul.f32 0.5, %v1165_v56 }
 0x4ef   : > { %v1174_v1 = vmul.f32 0.5, %v1173_v0  ;;  %v1358_v0 = vrot.slane %v2500_v57, 1 }
 0x4f0   : > { %3857 = vtanh.f32 %v1166_v60 }
 0x4f1   : > { %3859 = vtanh.f32 %v1174_v1 }
 0x4fa   : > { %v3858_v52 = vpop.eup %3857 }
 0x4fb   : > { %v1168_v4 = vadd.f32 1.0, %v3858_v52  ;;  %v3860_v61 = vpop.eup %3859 }
 0x4fc   : > { %v1176_v19 = vadd.f32 1.0, %v3860_v61 }
 0x4fd   : > { %v1169_v5 = vmul.f32 0.5, %v1168_v4 }
 0x4fe   : > { %v1177_v21 = vmul.f32 0.5, %v1176_v19 }
 0x4ff   : > { %v1178_v17 = vmul.f32 %v1169_v5, %v1161_v49 }
 0x500   : > { %v1183_v22 = vsub.f32 1.0, %v1177_v21  ;;  %v1185_v27 = vmul.f32 %v1177_v21, %v4493_v20  ;;  %v1191_v20 = vld [vmem:[#allocation2] sm:$0x1]  ;;  %v1366_v21 = vrot.slane %v2500_v57, 2 }
 0x501   : > { %v1181_v18 = vadd.f32 %v1179_v13, %v1178_v17 }
 0x503   : > { %3861 = vtanh.f32 %v1181_v18 }
 0x50d   : > { %v3862_v12 = vpop.eup %3861 }
 0x50e   : > { %v1184_v25 = vmul.f32 %v3862_v12, %v1183_v22 }
 0x510   : > { %v4538_v28 = vadd.f32 %v1185_v27, %v1184_v25 }
 0x512   : > { %1276 = vmatmul.mubr.f32.vlgmr.msra.gmra.mrb[10].mxu0 %v4538_v28  ;;  %2921 = vmatmul.mubr.f32.vlgmr.msra.gmra.mrb[10].mxu1 %v4538_v28  ;;  %v1187_v29 = vmul.f32 %v4538_v28, %v4356_v51 }
 0x513   : > { %3472 = vmatpush1.bf16.msra.mxu0 %v4101_v9  ;;  %3503 = vmatpush3.bf16.msra.mxu1 %v4147_v24 }
 0x514   : > { %v1188_v30 = vsel %vm439_vm1, %v1187_v29, 0.0  ;;  %3474 = vmatprep.subr.bf16.mxu0 %v4103_v10  ;;  %3504 = vmatprep.subr.bf16.mxu1 %v3994_v7 }
 0x515   : > { %1189 = vadd.xlane.f32.xlu0 %v1188_v30  ;;  %1462 = vmatprep.mubr.f32.mxu0 %v3995_v8 }
 0x516   : > { %2955 = vmatprep.mubr.msk.f32.mxu1 %vm3996_vm0, %v3995_v8 }
 0x517   : > { %3476 = vmatpush1.bf16.msra.mxu0 %v4121_v15  ;;  %3506 = vmatpush3.bf16.msra.mxu1 %v4171_v32 }
 0x518   : > { %3478 = vmatprep.subr.bf16.mxu0 %v4124_v16  ;;  %3507 = vmatprep.subr.bf16.mxu1 %v3994_v7 }
 0x51b   : > { %3480 = vmatpush1.bf16.msra.mxu0 %v4145_v23  ;;  %3509 = vmatpush3.bf16.msra.mxu1 %v4199_v41 }
 0x51c   : > { %3482 = vmatprep.subr.bf16.mxu0 %v4153_v26  ;;  %3510 = vmatprep.subr.bf16.mxu1 %v3994_v7 }
 0x51f   : > { %3484 = vmatpush1.bf16.msra.mxu0 %v4181_v35  ;;  %3512 = vmatpush3.bf16.msra.mxu1 %v4227_v50 }
 0x520   : > { %3486 = vmatprep.subr.bf16.mxu0 %v4184_v36  ;;  %3513 = vmatprep.subr.bf16.mxu1 %v3994_v7 }
 0x523   : > { %3488 = vmatpush1.bf16.msra.mxu0 %v4209_v44  ;;  %3515 = vmatpush3.bf16.msra.mxu1 %v4255_v59 }
 0x524   : > { %3490 = vmatprep.subr.bf16.mxu0 %v4212_v45  ;;  %3516 = vmatprep.subr.bf16.mxu1 %v3994_v7 }
 0x527   : > { %3492 = vmatpush1.bf16.msra.mxu0 %v4237_v53  ;;  %3518 = vmatpush3.bf16.msra.mxu1 %v4277_v2 }
 0x528   : > { %3494 = vmatprep.subr.bf16.mxu0 %v4240_v54  ;;  %3519 = vmatprep.subr.bf16.mxu1 %v3994_v7 }
 0x52b   : > { %3496 = vmatpush1.bf16.msra.mxu0 %v4265_v62  ;;  %3521 = vmatpush3.bf16.msra.mxu1 %v4291_v11 }
 0x52c   : > { %3498 = vmatprep.subr.bf16.mxu0 %v4268_v63  ;;  %3522 = vmatprep.subr.bf16.mxu1 %v3994_v7 }
 0x52f   : > { %3500 = vmatpush1.bf16.msra.mxu0 %v4287_v6  ;;  %3524 = vmatpush3.bf16.msra.mxu1 %v4303_v14 }
 0x530   : > { %3526 = vmatprep.subr.bf16.mxu0 %v4086_v3  ;;  %3557 = vmatprep.subr.bf16.mxu1 %v3994_v7 }
 0x5a2   : > { %v1190_v31 = vpop.xlane.xlu0 %1189 }
 0x5a3   : > { %v1192_v33 = vmax.f32 %v1191_v20, %v1190_v31 }
 0x5a5   : > { %v1193_v34 = vsub.f32 %v1191_v20, %v1192_v33  ;;  %v1196_v37 = vsub.f32 %v1190_v31, %v1192_v33  ;;  %1208 = vst [vmem:[#allocation2] sm:$0x1] %v1192_v33 }
 0x5a7   : > { %v1194_v38 = vmul.f32 1.442695, %v1193_v34  ;;  %v1197_v39 = vmul.f32 1.442695, %v1196_v37 }
 0x5a9   : > { %3863 = vpow2.f32 %v1194_v38 }
 0x5aa   : > { %3865 = vpow2.f32 %v1197_v39 }
 0x5b3   : > { %v3864_v40 = vpop.eup %3863 }
 0x5b4   : > { %v3866_v46 = vpop.eup %3865  ;;  %v1200_v47 = vmul.f32 %v3864_v40, %v1199_v42  ;;  %v1204_v48 = vmul.f32 %v3864_v40, %v1203_v43 }
 0x5b5   : > { %v1205_v49 = vmul.f32 %v3866_v46, %v4538_v28 }
 0x5b6   : > { %v1201_v55 = vadd.f32 %v3866_v46, %v1200_v47 }
 0x5b7   : > { %v1206_v56 = vadd.f32 %v1205_v49, %v1204_v48 }
 0x5b8   : > { %1202 = vst [vmem:[#allocation3] sm:$0x1] %v1201_v55 }
 0x5b9   : > { %1207 = vst [vmem:[#allocation4] sm:$0x1] %v1206_v56 }
 0x5bf   : > { %v1386_v48 = vld [vmem:[#allocation3] sm:$0x1] }
 0x5c0   : > { %v1390_v49 = vld [vmem:[#allocation4] sm:$0x1] }
 0x5e5   : > { %v1277_v58 = vpop.f32.mrb[10].mxu0  ;;  %v1348_v60 = vpop.f32.mrb[10].mxu1 }
 0x5e6   : > { %v1352_v1 = vadd.f32 %v2500_v57, %v1277_v58  ;;  %v1279_v52 = vpop.f32.mrb[11].mxu0  ;;  %v2922_v4 = vpop.f32.mrb[11].mxu1 }
 0x5e7   : > { %v1360_v13 = vadd.f32 %v1358_v0, %v1279_v52 }
 0x5e8   : > { %v1353_v5 = vmul.f32 0.5, %v1352_v1  ;;  %v2501_v1 = vld [vmem:[%s4350_s9 + $0x6] ss:$8 sm:$0x7] }
 0x5e9   : > { %v1361_v17 = vmul.f32 0.5, %v1360_v13 }
 0x5ea   : > { %3867 = vtanh.f32 %v1353_v5  ;;  %v1545_v5 = vrot.slane %v2501_v1, 1 }
 0x5eb   : > { %3869 = vtanh.f32 %v1361_v17 }
 0x5f4   : > { %v3868_v61 = vpop.eup %3867 }
 0x5f5   : > { %v1355_v18 = vadd.f32 1.0, %v3868_v61  ;;  %v3870_v12 = vpop.eup %3869 }
 0x5f6   : > { %v1363_v27 = vadd.f32 1.0, %v3870_v12 }
 0x5f7   : > { %v1356_v19 = vmul.f32 0.5, %v1355_v18 }
 0x5f8   : > { %v1364_v29 = vmul.f32 0.5, %v1363_v27  ;;  %v1553_v27 = vrot.slane %v2501_v1, 2 }
 0x5f9   : > { %v1365_v22 = vmul.f32 %v1356_v19, %v1348_v60 }
 0x5fa   : > { %v1370_v30 = vsub.f32 1.0, %v1364_v29  ;;  %v1372_v33 = vmul.f32 %v1364_v29, %v4538_v28  ;;  %v1378_v28 = vld [vmem:[#allocation2] sm:$0x1] }
 0x5fb   : > { %v1368_v25 = vadd.f32 %v1366_v21, %v1365_v22 }
 0x5fd   : > { %3871 = vtanh.f32 %v1368_v25 }
 0x607   : > { %v3872_v20 = vpop.eup %3871 }
 0x608   : > { %v1371_v31 = vmul.f32 %v3872_v20, %v1370_v30 }
 0x60a   : > { %v4583_v34 = vadd.f32 %v1372_v33, %v1371_v31 }
 0x60c   : > { %1463 = vmatmul.mubr.f32.vlgmr.msra.gmra.mrb[12].mxu0 %v4583_v34  ;;  %2956 = vmatmul.mubr.f32.vlgmr.msra.gmra.mrb[12].mxu1 %v4583_v34  ;;  %v1374_v37 = vmul.f32 %v4583_v34, %v4356_v51 }
 0x60d   : > { %3528 = vmatpush1.bf16.msra.mxu0 %v4101_v9  ;;  %3559 = vmatpush3.bf16.msra.mxu1 %v4147_v24 }
 0x60e   : > { %v1375_v38 = vsel %vm439_vm1, %v1374_v37, 0.0  ;;  %3530 = vmatprep.subr.bf16.mxu0 %v4103_v10  ;;  %3560 = vmatprep.subr.bf16.mxu1 %v3994_v7 }
 0x60f   : > { %1376 = vadd.xlane.f32.xlu1 %v1375_v38  ;;  %1649 = vmatprep.mubr.f32.mxu0 %v3995_v8 }
 0x610   : > { %2990 = vmatprep.mubr.msk.f32.mxu1 %vm3996_vm0, %v3995_v8 }
 0x611   : > { %3532 = vmatpush1.bf16.msra.mxu0 %v4121_v15  ;;  %3562 = vmatpush3.bf16.msra.mxu1 %v4171_v32 }
 0x612   : > { %3534 = vmatprep.subr.bf16.mxu0 %v4124_v16  ;;  %3563 = vmatprep.subr.bf16.mxu1 %v3994_v7 }
 0x615   : > { %3536 = vmatpush1.bf16.msra.mxu0 %v4145_v23  ;;  %3565 = vmatpush3.bf16.msra.mxu1 %v4199_v41 }
 0x616   : > { %3538 = vmatprep.subr.bf16.mxu0 %v4153_v26  ;;  %3566 = vmatprep.subr.bf16.mxu1 %v3994_v7 }
 0x619   : > { %3540 = vmatpush1.bf16.msra.mxu0 %v4181_v35  ;;  %3568 = vmatpush3.bf16.msra.mxu1 %v4227_v50 }
 0x61a   : > { %3542 = vmatprep.subr.bf16.mxu0 %v4184_v36  ;;  %3569 = vmatprep.subr.bf16.mxu1 %v3994_v7 }
 0x61d   : > { %3544 = vmatpush1.bf16.msra.mxu0 %v4209_v44  ;;  %3571 = vmatpush3.bf16.msra.mxu1 %v4255_v59 }
 0x61e   : > { %3546 = vmatprep.subr.bf16.mxu0 %v4212_v45  ;;  %3572 = vmatprep.subr.bf16.mxu1 %v3994_v7 }
 0x621   : > { %3548 = vmatpush1.bf16.msra.mxu0 %v4237_v53  ;;  %3574 = vmatpush3.bf16.msra.mxu1 %v4277_v2 }
 0x622   : > { %3550 = vmatprep.subr.bf16.mxu0 %v4240_v54  ;;  %3575 = vmatprep.subr.bf16.mxu1 %v3994_v7 }
 0x625   : > { %3552 = vmatpush1.bf16.msra.mxu0 %v4265_v62  ;;  %3577 = vmatpush3.bf16.msra.mxu1 %v4291_v11 }
 0x626   : > { %3554 = vmatprep.subr.bf16.mxu0 %v4268_v63  ;;  %3578 = vmatprep.subr.bf16.mxu1 %v3994_v7 }
 0x629   : > { %3556 = vmatpush1.bf16.msra.mxu0 %v4287_v6  ;;  %3580 = vmatpush3.bf16.msra.mxu1 %v4303_v14 }
 0x62a   : > { %3582 = vmatprep.subr.bf16.mxu0 %v4086_v3  ;;  %3613 = vmatprep.subr.bf16.mxu1 %v3994_v7 }
 0x69c   : > { %v1377_v51 = vpop.xlane.xlu1 %1376 }
 0x69d   : > { %v1379_v39 = vmax.f32 %v1378_v28, %v1377_v51 }
 0x69f   : > { %v1380_v40 = vsub.f32 %v1378_v28, %v1379_v39  ;;  %v1383_v42 = vsub.f32 %v1377_v51, %v1379_v39  ;;  %1395 = vst [vmem:[#allocation2] sm:$0x1] %v1379_v39 }
 0x6a1   : > { %v1381_v43 = vmul.f32 1.442695, %v1380_v40  ;;  %v1384_v46 = vmul.f32 1.442695, %v1383_v42  ;;  %v4635_v40 = vld [vmem:[%s4881_s2] sm:$0x1] }
 0x6a3   : > { %3873 = vpow2.f32 %v1381_v43 }
 0x6a4   : > { %3875 = vpow2.f32 %v1384_v46 }
 0x6a6   : > { %v1565_v43 = vld [vmem:[#allocation2] sm:$0x1] }
 0x6ad   : > { %v3874_v47 = vpop.eup %3873 }
 0x6ae   : > { %v3876_v55 = vpop.eup %3875  ;;  %v1387_v56 = vmul.f32 %v3874_v47, %v1386_v48  ;;  %v1391_v57 = vmul.f32 %v3874_v47, %v1390_v49 }
 0x6af   : > { %v1392_v58 = vmul.f32 %v3876_v55, %v4583_v34 }
 0x6b0   : > { %v1388_v60 = vadd.f32 %v3876_v55, %v1387_v56 }
 0x6b1   : > { %v1393_v0 = vadd.f32 %v1392_v58, %v1391_v57 }
 0x6b2   : > { %1389 = vst [vmem:[#allocation3] sm:$0x1] %v1388_v60 }
 0x6b3   : > { %1394 = vst [vmem:[#allocation4] sm:$0x1] %v1393_v0 }
 0x6b9   : > { %v1573_v58 = vld [vmem:[#allocation3] sm:$0x1] }
 0x6ba   : > { %v1577_v60 = vld [vmem:[#allocation4] sm:$0x1] }
 0x6df   : > { %v1464_v52 = vpop.f32.mrb[12].mxu0  ;;  %v1535_v4 = vpop.f32.mrb[12].mxu1 }
 0x6e0   : > { %v1539_v13 = vadd.f32 %v2501_v1, %v1464_v52  ;;  %v1466_v17 = vpop.f32.mrb[13].mxu0  ;;  %v2957_v61 = vpop.f32.mrb[13].mxu1 }
 0x6e1   : > { %v1547_v19 = vadd.f32 %v1545_v5, %v1466_v17  ;;  %v2502_v17 = vld [vmem:[%s4350_s9 + $0x7] ss:$8 sm:$0x7] }
 0x6e2   : > { %v1540_v18 = vmul.f32 0.5, %v1539_v13 }
 0x6e3   : > { %v1548_v21 = vmul.f32 0.5, %v1547_v19  ;;  %v1732_v19 = vrot.slane %v2502_v17, 1 }
 0x6e4   : > { %3877 = vtanh.f32 %v1540_v18 }
 0x6e5   : > { %3879 = vtanh.f32 %v1548_v21 }
 0x6ee   : > { %v3878_v22 = vpop.eup %3877 }
 0x6ef   : > { %v1542_v12 = vadd.f32 1.0, %v3878_v22  ;;  %v3880_v30 = vpop.eup %3879 }
 0x6f0   : > { %v1550_v31 = vadd.f32 1.0, %v3880_v30 }
 0x6f1   : > { %v1543_v25 = vmul.f32 0.5, %v1542_v12 }
 0x6f2   : > { %v1551_v33 = vmul.f32 0.5, %v1550_v31 }
 0x6f3   : > { %v1552_v29 = vmul.f32 %v1543_v25, %v1535_v4 }
 0x6f4   : > { %v1557_v37 = vsub.f32 1.0, %v1551_v33  ;;  %v1559_v28 = vmul.f32 %v1551_v33, %v4583_v34  ;;  %v1740_v33 = vrot.slane %v2502_v17, 2 }
 0x6f5   : > { %v1555_v20 = vadd.f32 %v1553_v27, %v1552_v29 }
 0x6f7   : > { %3881 = vtanh.f32 %v1555_v20 }
 0x701   : > { %v3882_v38 = vpop.eup %3881 }
 0x702   : > { %v1558_v51 = vmul.f32 %v3882_v38, %v1557_v37 }
 0x704   : > { %v4628_v39 = vadd.f32 %v1559_v28, %v1558_v51 }
 0x706   : > { %1650 = vmatmul.mubr.f32.vlgmr.msra.gmra.mrb[14].mxu0 %v4628_v39  ;;  %2991 = vmatmul.mubr.f32.vlgmr.msra.gmra.mrb[14].mxu1 %v4628_v39  ;;  %v1561_v42 = vmul.f32 %v4635_v40, %v4628_v39 }
 0x707   : > { %3584 = vmatpush1.bf16.msra.mxu0 %v4101_v9  ;;  %3615 = vmatpush3.bf16.msra.mxu1 %v4147_v24 }
 0x708   : > { %v1562_v34 = vsel %vm439_vm1, %v1561_v42, 0.0  ;;  %3586 = vmatprep.subr.bf16.mxu0 %v4103_v10  ;;  %3616 = vmatprep.subr.bf16.mxu1 %v3994_v7 }
 0x709   : > { %1563 = vadd.xlane.f32.xlu0 %v1562_v34  ;;  %1836 = vmatprep.mubr.f32.mxu0 %v3995_v8 }
 0x70a   : > { %3025 = vmatprep.mubr.msk.f32.mxu1 %vm3996_vm0, %v3995_v8 }
 0x70b   : > { %3588 = vmatpush1.bf16.msra.mxu0 %v4121_v15  ;;  %3618 = vmatpush3.bf16.msra.mxu1 %v4171_v32 }
 0x70c   : > { %3590 = vmatprep.subr.bf16.mxu0 %v4124_v16  ;;  %3619 = vmatprep.subr.bf16.mxu1 %v3994_v7 }
 0x70f   : > { %3592 = vmatpush1.bf16.msra.mxu0 %v4145_v23  ;;  %3621 = vmatpush3.bf16.msra.mxu1 %v4199_v41 }
 0x710   : > { %3594 = vmatprep.subr.bf16.mxu0 %v4153_v26  ;;  %3622 = vmatprep.subr.bf16.mxu1 %v3994_v7 }
 0x713   : > { %3596 = vmatpush1.bf16.msra.mxu0 %v4181_v35  ;;  %3624 = vmatpush3.bf16.msra.mxu1 %v4227_v50 }
 0x714   : > { %3598 = vmatprep.subr.bf16.mxu0 %v4184_v36  ;;  %3625 = vmatprep.subr.bf16.mxu1 %v3994_v7 }
 0x717   : > { %3600 = vmatpush1.bf16.msra.mxu0 %v4209_v44  ;;  %3627 = vmatpush3.bf16.msra.mxu1 %v4255_v59 }
 0x718   : > { %3602 = vmatprep.subr.bf16.mxu0 %v4212_v45  ;;  %3628 = vmatprep.subr.bf16.mxu1 %v3994_v7 }
 0x71b   : > { %3604 = vmatpush1.bf16.msra.mxu0 %v4237_v53  ;;  %3630 = vmatpush3.bf16.msra.mxu1 %v4277_v2 }
 0x71c   : > { %3606 = vmatprep.subr.bf16.mxu0 %v4240_v54  ;;  %3631 = vmatprep.subr.bf16.mxu1 %v3994_v7 }
 0x71f   : > { %3608 = vmatpush1.bf16.msra.mxu0 %v4265_v62  ;;  %3633 = vmatpush3.bf16.msra.mxu1 %v4291_v11 }
 0x720   : > { %3610 = vmatprep.subr.bf16.mxu0 %v4268_v63  ;;  %3634 = vmatprep.subr.bf16.mxu1 %v3994_v7 }
 0x723   : > { %3612 = vmatpush1.bf16.msra.mxu0 %v4287_v6  ;;  %3636 = vmatpush3.bf16.msra.mxu1 %v4303_v14 }
 0x724   : > { %3638 = vmatprep.subr.bf16.mxu0 %v4086_v3  ;;  %3669 = vmatprep.subr.bf16.mxu1 %v3994_v7 }
 0x796   : > { %v1564_v46 = vpop.xlane.xlu0 %1563 }
 0x797   : > { %v1566_v47 = vmax.f32 %v1565_v43, %v1564_v46 }
 0x799   : > { %v1567_v48 = vsub.f32 %v1565_v43, %v1566_v47  ;;  %v1570_v49 = vsub.f32 %v1564_v46, %v1566_v47  ;;  %1582 = vst [vmem:[#allocation2] sm:$0x1] %v1566_v47 }
 0x79b   : > { %v1568_v55 = vmul.f32 1.442695, %v1567_v48  ;;  %v1571_v56 = vmul.f32 1.442695, %v1570_v49 }
 0x79d   : > { %3883 = vpow2.f32 %v1568_v55 }
 0x79e   : > { %3885 = vpow2.f32 %v1571_v56 }
 0x7a0   : > { %v1752_v56 = vld [vmem:[#allocation2] sm:$0x1] }
 0x7a7   : > { %v3884_v57 = vpop.eup %3883 }
 0x7a8   : > { %v3886_v0 = vpop.eup %3885  ;;  %v1574_v1 = vmul.f32 %v3884_v57, %v1573_v58  ;;  %v1578_v52 = vmul.f32 %v3884_v57, %v1577_v60 }
 0x7a9   : > { %v1579_v4 = vmul.f32 %v3886_v0, %v4628_v39 }
 0x7aa   : > { %v1575_v5 = vadd.f32 %v3886_v0, %v1574_v1 }
 0x7ab   : > { %v1580_v13 = vadd.f32 %v1579_v4, %v1578_v52 }
 0x7ac   : > { %1576 = vst [vmem:[#allocation3] sm:$0x1] %v1575_v5 }
 0x7ad   : > { %1581 = vst [vmem:[#allocation4] sm:$0x1] %v1580_v13 }
 0x7b3   : > { %v1760_v4 = vld [vmem:[#allocation3] sm:$0x1] }
 0x7b4   : > { %v1764_v5 = vld [vmem:[#allocation4] sm:$0x1] }
 0x7d9   : > { %v1651_v61 = vpop.f32.mrb[14].mxu0  ;;  %v1722_v18 = vpop.f32.mrb[14].mxu1 }
 0x7da   : > { %v1726_v21 = vadd.f32 %v2502_v17, %v1651_v61  ;;  %v1653_v22 = vpop.f32.mrb[15].mxu0  ;;  %v2992_v12 = vpop.f32.mrb[15].mxu1 }
 0x7db   : > { %v1734_v27 = vadd.f32 %v1732_v19, %v1653_v22 }
 0x7dc   : > { %v1727_v25 = vmul.f32 0.5, %v1726_v21  ;;  %v2503_v21 = vld [vmem:[%s4350_s9 + $0x18] ss:$8 sm:$0x7] }
 0x7dd   : > { %v1735_v29 = vmul.f32 0.5, %v1734_v27 }
 0x7de   : > { %3887 = vtanh.f32 %v1727_v25  ;;  %v1919_v25 = vrot.slane %v2503_v21, 1 }
 0x7df   : > { %3889 = vtanh.f32 %v1735_v29 }
 0x7e8   : > { %v3888_v30 = vpop.eup %3887 }
 0x7e9   : > { %v1729_v20 = vadd.f32 1.0, %v3888_v30  ;;  %v3890_v38 = vpop.eup %3889 }
 0x7ea   : > { %v1737_v28 = vadd.f32 1.0, %v3890_v38 }
 0x7eb   : > { %v1730_v31 = vmul.f32 0.5, %v1729_v20 }
 0x7ec   : > { %v1738_v42 = vmul.f32 0.5, %v1737_v28  ;;  %v1927_v28 = vrot.slane %v2503_v21, 2 }
 0x7ed   : > { %v1739_v37 = vmul.f32 %v1730_v31, %v1722_v18 }
 0x7ee   : > { %v1744_v34 = vsub.f32 1.0, %v1738_v42  ;;  %v1746_v47 = vmul.f32 %v1738_v42, %v4628_v39 }
 0x7ef   : > { %v1742_v51 = vadd.f32 %v1740_v33, %v1739_v37 }
 0x7f1   : > { %3891 = vtanh.f32 %v1742_v51 }
 0x7fb   : > { %v3892_v43 = vpop.eup %3891 }
 0x7fc   : > { %v1745_v46 = vmul.f32 %v3892_v43, %v1744_v34 }
 0x7fe   : > { %v4678_v48 = vadd.f32 %v1746_v47, %v1745_v46 }
 0x800   : > { %1837 = vmatmul.mubr.f32.vlgmr.msra.gmra.mrb[16].mxu0 %v4678_v48  ;;  %3026 = vmatmul.mubr.f32.vlgmr.msra.gmra.mrb[16].mxu1 %v4678_v48  ;;  %v1748_v49 = vmul.f32 %v4635_v40, %v4678_v48 }
 0x801   : > { %3640 = vmatpush1.bf16.msra.mxu0 %v4101_v9  ;;  %3671 = vmatpush3.bf16.msra.mxu1 %v4147_v24 }
 0x802   : > { %v1749_v55 = vsel %vm439_vm1, %v1748_v49, 0.0  ;;  %3642 = vmatprep.subr.bf16.mxu0 %v4103_v10  ;;  %3672 = vmatprep.subr.bf16.mxu1 %v3994_v7 }
 0x803   : > { %1750 = vadd.xlane.f32.xlu1 %v1749_v55  ;;  %2023 = vmatprep.mubr.f32.mxu0 %v3995_v8 }
 0x804   : > { %3060 = vmatprep.mubr.msk.f32.mxu1 %vm3996_vm0, %v3995_v8 }
 0x805   : > { %3644 = vmatpush1.bf16.msra.mxu0 %v4121_v15  ;;  %3674 = vmatpush3.bf16.msra.mxu1 %v4171_v32 }
 0x806   : > { %3646 = vmatprep.subr.bf16.mxu0 %v4124_v16  ;;  %3675 = vmatprep.subr.bf16.mxu1 %v3994_v7 }
 0x809   : > { %3648 = vmatpush1.bf16.msra.mxu0 %v4145_v23  ;;  %3677 = vmatpush3.bf16.msra.mxu1 %v4199_v41 }
 0x80a   : > { %3650 = vmatprep.subr.bf16.mxu0 %v4153_v26  ;;  %3678 = vmatprep.subr.bf16.mxu1 %v3994_v7 }
 0x80d   : > { %3652 = vmatpush1.bf16.msra.mxu0 %v4181_v35  ;;  %3680 = vmatpush3.bf16.msra.mxu1 %v4227_v50 }
 0x80e   : > { %3654 = vmatprep.subr.bf16.mxu0 %v4184_v36  ;;  %3681 = vmatprep.subr.bf16.mxu1 %v3994_v7 }
 0x811   : > { %3656 = vmatpush1.bf16.msra.mxu0 %v4209_v44  ;;  %3683 = vmatpush3.bf16.msra.mxu1 %v4255_v59 }
 0x812   : > { %3658 = vmatprep.subr.bf16.mxu0 %v4212_v45  ;;  %3684 = vmatprep.subr.bf16.mxu1 %v3994_v7 }
 0x815   : > { %3660 = vmatpush1.bf16.msra.mxu0 %v4237_v53  ;;  %3686 = vmatpush3.bf16.msra.mxu1 %v4277_v2 }
 0x816   : > { %3662 = vmatprep.subr.bf16.mxu0 %v4240_v54  ;;  %3687 = vmatprep.subr.bf16.mxu1 %v3994_v7 }
 0x819   : > { %3664 = vmatpush1.bf16.msra.mxu0 %v4265_v62  ;;  %3689 = vmatpush3.bf16.msra.mxu1 %v4291_v11 }
 0x81a   : > { %3666 = vmatprep.subr.bf16.mxu0 %v4268_v63  ;;  %3690 = vmatprep.subr.bf16.mxu1 %v3994_v7 }
 0x81d   : > { %3668 = vmatpush1.bf16.msra.mxu0 %v4287_v6  ;;  %3692 = vmatpush3.bf16.msra.mxu1 %v4303_v14 }
 0x81e   : > { %3694 = vmatprep.subr.bf16.mxu0 %v4086_v3  ;;  %3725 = vmatprep.subr.bf16.mxu1 %v3994_v7 }
 0x890   : > { %v1751_v39 = vpop.xlane.xlu1 %1750 }
 0x891   : > { %v1753_v57 = vmax.f32 %v1752_v56, %v1751_v39 }
 0x893   : > { %v1754_v58 = vsub.f32 %v1752_v56, %v1753_v57  ;;  %v1757_v60 = vsub.f32 %v1751_v39, %v1753_v57  ;;  %1769 = vst [vmem:[#allocation2] sm:$0x1] %v1753_v57 }
 0x895   : > { %v1755_v0 = vmul.f32 1.442695, %v1754_v58  ;;  %v1758_v1 = vmul.f32 1.442695, %v1757_v60 }
 0x897   : > { %3893 = vpow2.f32 %v1755_v0 }
 0x898   : > { %3895 = vpow2.f32 %v1758_v1 }
 0x8a1   : > { %v3894_v52 = vpop.eup %3893 }
 0x8a2   : > { %v3896_v13 = vpop.eup %3895  ;;  %v1761_v17 = vmul.f32 %v3894_v52, %v1760_v4  ;;  %v1765_v61 = vmul.f32 %v3894_v52, %v1764_v5 }
 0x8a3   : > { %v1766_v3 = vmul.f32 %v3896_v13, %v4678_v48 }
 0x8a4   : > { %v1762_v18 = vadd.f32 %v3896_v13, %v1761_v17 }
 0x8a5   : > { %v1767_v19 = vadd.f32 %v1766_v3, %v1765_v61 }
 0x8a6   : > { %1763 = vst [vmem:[#allocation3] sm:$0x1] %v1762_v18 }
 0x8a7   : > { %1768 = vst [vmem:[#allocation4] sm:$0x1] %v1767_v19 }
 0x8d3   : > { %v1838_v22 = vpop.f32.mrb[16].mxu0  ;;  %v1909_v12 = vpop.f32.mrb[16].mxu1 }
 0x8d4   : > { %v1913_v27 = vadd.f32 %v2503_v21, %v1838_v22  ;;  %v1840_v29 = vpop.f32.mrb[17].mxu0  ;;  %v3027_v30 = vpop.f32.mrb[17].mxu1 }
 0x8d5   : > { %v1921_v31 = vadd.f32 %v1919_v25, %v1840_v29 }
 0x8d6   : > { %v1914_v20 = vmul.f32 0.5, %v1913_v27 }
 0x8d7   : > { %v1922_v33 = vmul.f32 0.5, %v1921_v31 }
 0x8d8   : > { %3897 = vtanh.f32 %v1914_v20 }
 0x8d9   : > { %3899 = vtanh.f32 %v1922_v33 }
 0x8e2   : > { %v3898_v37 = vpop.eup %3897 }
 0x8e3   : > { %v1916_v38 = vadd.f32 1.0, %v3898_v37  ;;  %v3900_v34 = vpop.eup %3899 }
 0x8e4   : > { %v1924_v46 = vadd.f32 1.0, %v3900_v34 }
 0x8e5   : > { %v1917_v51 = vmul.f32 0.5, %v1916_v38 }
 0x8e6   : > { %v1925_v47 = vmul.f32 0.5, %v1924_v46 }
 0x8e7   : > { %v1926_v42 = vmul.f32 %v1917_v51, %v1909_v12 }
 0x8e8   : > { %v1931_v49 = vsub.f32 1.0, %v1925_v47  ;;  %v1933_v56 = vmul.f32 %v1925_v47, %v4678_v48 }
 0x8e9   : > { %v1929_v43 = vadd.f32 %v1927_v28, %v1926_v42 }
 0x8eb   : > { %3901 = vtanh.f32 %v1929_v43 }
 0x8f5   : > { %v3902_v55 = vpop.eup %3901 }
 0x8f6   : > { %v1932_v39 = vmul.f32 %v3902_v55, %v1931_v49 }
 0x8f8   : > { %v4723_v57 = vadd.f32 %v1933_v56, %v1932_v39  ;;  %v2505_v56 = vld [vmem:[%s4350_s9 + $0x1a] ss:$8 sm:$0x7] }
 0x8fa   : > { %2024 = vmatmul.mubr.f32.vlgmr.msra.gmra.mrb[18].mxu0 %v4723_v57  ;;  %3061 = vmatmul.mubr.f32.vlgmr.msra.gmra.mrb[18].mxu1 %v4723_v57  ;;  %v1935_v58 = vmul.f32 %v4635_v40, %v4723_v57 }
 0x8fb   : > { %3696 = vmatpush1.bf16.msra.mxu0 %v4101_v9  ;;  %3727 = vmatpush3.bf16.msra.mxu1 %v4147_v24  ;;  %v1939_v9 = vld [vmem:[#allocation2] sm:$0x1] }
 0x8fc   : > { %v1936_v60 = vsel %vm439_vm1, %v1935_v58, 0.0  ;;  %3698 = vmatprep.subr.bf16.mxu0 %v4103_v10  ;;  %3728 = vmatprep.subr.bf16.mxu1 %v3994_v7 }
 0x8fd   : > { %1937 = vadd.xlane.f32.xlu0 %v1936_v60  ;;  %2210 = vmatprep.mubr.f32.mxu0 %v3995_v8  ;;  %v2293_v60 = vrot.slane %v2505_v56, 1 }
 0x8fe   : > { %3095 = vmatprep.mubr.msk.f32.mxu1 %vm3996_vm0, %v3995_v8 }
 0x8ff   : > { %3700 = vmatpush1.bf16.msra.mxu0 %v4121_v15  ;;  %3730 = vmatpush3.bf16.msra.mxu1 %v4171_v32 }
 0x900   : > { %3702 = vmatprep.subr.bf16.mxu0 %v4124_v16  ;;  %3731 = vmatprep.subr.bf16.mxu1 %v3994_v7 }
 0x903   : > { %3704 = vmatpush1.bf16.msra.mxu0 %v4145_v23  ;;  %3733 = vmatpush3.bf16.msra.mxu1 %v4199_v41 }
 0x904   : > { %3706 = vmatprep.subr.bf16.mxu0 %v4153_v26  ;;  %3734 = vmatprep.subr.bf16.mxu1 %v3994_v7 }
 0x907   : > { %3708 = vmatpush1.bf16.msra.mxu0 %v4181_v35  ;;  %3736 = vmatpush3.bf16.msra.mxu1 %v4227_v50  ;;  %v1947_v35 = vld [vmem:[#allocation3] sm:$0x1] }
 0x908   : > { %3710 = vmatprep.subr.bf16.mxu0 %v4184_v36  ;;  %3737 = vmatprep.subr.bf16.mxu1 %v3994_v7  ;;  %v1951_v36 = vld [vmem:[#allocation4] sm:$0x1] }
 0x90b   : > { %3712 = vmatpush1.bf16.msra.mxu0 %v4209_v44  ;;  %3739 = vmatpush3.bf16.msra.mxu1 %v4255_v59  ;;  %v2504_v59 = vld [vmem:[%s4350_s9 + $0x19] ss:$8 sm:$0x7]  ;;  %s3934_s9 = sshll.u32 %s3998_s22, 4  ;;  %s3935_s9 = int_to_ptr.vmem [resolvable:$false] %s3934_s9 }
 0x90c   : > { %3714 = vmatprep.subr.bf16.mxu0 %v4212_v45  ;;  %3740 = vmatprep.subr.bf16.mxu1 %v3994_v7  ;;  %v2114_v13 = vrot.slane %v2504_v59, 2  ;;  %s3936_s10 = scalar_lea.vmem %s3935_s9, 32  ;;  %p3937_p0 = scmp.lt.s32.totalorder %s4839_s25, %s3935_s9 }
 0x90d   : > { %p3938_p1 = scmp.lt.s32.totalorder %s3936_s10, %s3930_s8 }
 0x90f   : > { %3716 = vmatpush1.bf16.msra.mxu0 %v4237_v53  ;;  %3742 = vmatpush3.bf16.msra.mxu1 %v4277_v2  ;;  %v2106_v2 = vrot.slane %v2504_v59, 1  ;;  %p3939_p2 = por %p3938_p1, %p3937_p0 }
 0x910   : > { %3718 = vmatprep.subr.bf16.mxu0 %v4240_v54  ;;  %3743 = vmatprep.subr.bf16.mxu1 %v3994_v7 }
 0x911   : > { %p3940_p3 = pnand %p3939_p2, %p3933_p13 }
 0x913   : > { %3720 = vmatpush1.bf16.msra.mxu0 %v4265_v62  ;;  %3745 = vmatpush3.bf16.msra.mxu1 %v4291_v11 }
 0x914   : > { %3722 = vmatprep.subr.bf16.mxu0 %v4268_v63  ;;  %3746 = vmatprep.subr.bf16.mxu1 %v3994_v7 }
 0x917   : > { %3724 = vmatpush1.bf16.msra.mxu0 %v4287_v6  ;;  %3748 = vmatpush3.bf16.msra.mxu1 %v4303_v14 }
 0x918   : > { %3749 = vmatprep.subr.bf16.mxu0 %v3994_v7 }
 0x98a   : > { %v1938_v10 = vpop.xlane.xlu0 %1937 }
 0x98b   : > { %v1940_v15 = vmax.f32 %v1939_v9, %v1938_v10 }
 0x98d   : > { %v1941_v16 = vsub.f32 %v1939_v9, %v1940_v15  ;;  %v1944_v23 = vsub.f32 %v1938_v10, %v1940_v15  ;;  %1956 = vst [vmem:[#allocation2] sm:$0x1] %v1940_v15 }
 0x98f   : > { %v1942_v24 = vmul.f32 1.442695, %v1941_v16  ;;  %v1945_v26 = vmul.f32 1.442695, %v1944_v23 }
 0x991   : > { %3903 = vpow2.f32 %v1942_v24 }
 0x992   : > { %3905 = vpow2.f32 %v1945_v26 }
 0x994   : > { %v2126_v31 = vld [vmem:[#allocation2] sm:$0x1] }
 0x99b   : > { %v3904_v32 = vpop.eup %3903 }
 0x99c   : > { %v3906_v41 = vpop.eup %3905  ;;  %v1948_v44 = vmul.f32 %v3904_v32, %v1947_v35  ;;  %v1952_v45 = vmul.f32 %v3904_v32, %v1951_v36  ;;  %v2301_v36 = vrot.slane %v2505_v56, 2 }
 0x99d   : > { %v1953_v50 = vmul.f32 %v3906_v41, %v4723_v57 }
 0x99e   : > { %v1949_v53 = vadd.f32 %v3906_v41, %v1948_v44 }
 0x99f   : > { %v1954_v54 = vadd.f32 %v1953_v50, %v1952_v45 }
 0x9a0   : > { %1950 = vst [vmem:[#allocation3] sm:$0x1] %v1949_v53 }
 0x9a1   : > { %1955 = vst [vmem:[#allocation4] sm:$0x1] %v1954_v54 }
 0x9a7   : > { %v2134_v34 = vld [vmem:[#allocation3] sm:$0x1] }
 0x9a8   : > { %v2138_v43 = vld [vmem:[#allocation4] sm:$0x1] }
 0x9cd   : > { %v2025_v62 = vpop.f32.mrb[18].mxu0  ;;  %v2096_v63 = vpop.f32.mrb[18].mxu1 }
 0x9ce   : > { %v2100_v6 = vadd.f32 %v2504_v59, %v2025_v62  ;;  %v2027_v11 = vpop.f32.mrb[19].mxu0  ;;  %v3062_v14 = vpop.f32.mrb[19].mxu1 }
 0x9cf   : > { %v2108_v0 = vadd.f32 %v2106_v2, %v2027_v11  ;;  %v2335_v14 = vld [vmem:[%s4882_s3] sm:$0xff] }
 0x9d0   : > { %v2101_v48 = vmul.f32 0.5, %v2100_v6 }
 0x9d1   : > { %v2109_v1 = vmul.f32 0.5, %v2108_v0 }
 0x9d2   : > { %3907 = vtanh.f32 %v2101_v48  ;;  %v2336_v48 = vld [vmem:[%s4882_s3 + $0x8] sm:$0xff] }
 0x9d3   : > { %3909 = vtanh.f32 %v2109_v1  ;;  %v3750_v0 = vpack.c.bf16 %v2336_v48, %v2335_v14  ;;  %v2337_v1 = vld [vmem:[%s4882_s3 + $0x10] sm:$0xff] }
 0x9dc   : > { %v3908_v52 = vpop.eup %3907 }
 0x9dd   : > { %v2103_v4 = vadd.f32 1.0, %v3908_v52  ;;  %v3910_v61 = vpop.eup %3909 }
 0x9de   : > { %v2111_v18 = vadd.f32 1.0, %v3910_v61  ;;  %v2342_v61 = vld [vmem:[%s4882_s3 + $0x38] sm:$0xff] }
 0x9df   : > { %v2104_v5 = vmul.f32 0.5, %v2103_v4  ;;  %v2339_v4 = vld [vmem:[%s4882_s3 + $0x20] sm:$0xff] }
 0x9e0   : > { %v2112_v19 = vmul.f32 0.5, %v2111_v18  ;;  %v2343_v18 = vld [vmem:[%s4882_s3 + $0x40] sm:$0xff] }
 0x9e1   : > { %v2113_v17 = vmul.f32 %v2104_v5, %v2096_v63  ;;  %v2340_v5 = vld [vmem:[%s4882_s3 + $0x28] sm:$0xff] }
 0x9e2   : > { %v2118_v21 = vsub.f32 1.0, %v2112_v19  ;;  %v2120_v25 = vmul.f32 %v2112_v19, %v4723_v57  ;;  %v2344_v19 = vld [vmem:[%s4882_s3 + $0x48] sm:$0xff] }
 0x9e3   : > { %v2116_v3 = vadd.f32 %v2114_v13, %v2113_v17  ;;  %v3756_v13 = vpack.c.bf16 %v2340_v5, %v2339_v4  ;;  %v2341_v17 = vld [vmem:[%s4882_s3 + $0x30] sm:$0xff] }
 0x9e5   : > { %3911 = vtanh.f32 %v2116_v3  ;;  %v3759_v3 = vpack.c.bf16 %v2342_v61, %v2341_v17 }
 0x9ef   : > { %v3912_v22 = vpop.eup %3911 }
 0x9f0   : > { %v2119_v12 = vmul.f32 %v3912_v22, %v2118_v21  ;;  %v3762_v21 = vpack.c.bf16 %v2344_v19, %v2343_v18  ;;  %v2345_v22 = vld [vmem:[%s4882_s3 + $0x50] sm:$0xff] }
 0x9f2   : > { %v2121_v27 = vadd.f32 %v2120_v25, %v2119_v12  ;;  %v2346_v12 = vld [vmem:[%s4882_s3 + $0x58] sm:$0xff] }
 0x9f3   : > { %v3765_v25 = vpack.c.bf16 %v2346_v12, %v2345_v22 }
 0x9f4   : > { %2211 = vmatmul.mubr.f32.vlgmr.msra.gmra.mrb[20].mxu0 %v2121_v27  ;;  %3096 = vmatmul.mubr.f32.vlgmr.msra.gmra.mrb[20].mxu1 %v2121_v27  ;;  %v2122_v29 = vmul.f32 %v4635_v40, %v2121_v27 }
 0x9f5   : > { %3130 = vmatprep.mubr.msk.f32.mxu0 %vm3996_vm0, %v3995_v8  ;;  %3751 = vmatpush3.bf16.msra.mxu0 %v3750_v0 }
 0x9f6   : > { %v2123_v30 = vsel %vm439_vm1, %v2122_v29, 0.0  ;;  %3752 = vmatprep.subr.bf16.mxu0 %v3994_v7  ;;  %v2348_v29 = vld [vmem:[%s4882_s3 + $0x68] sm:$0xff] }
 0x9f7   : > { %2124 = vadd.xlane.f32.xlu1 %v2123_v30 }
 0xa84   : > { %v2125_v20 = vpop.xlane.xlu1 %2124 }
 0xa85   : > { %v2127_v33 = vmax.f32 %v2126_v31, %v2125_v20 }
 0xa87   : > { %v2128_v37 = vsub.f32 %v2126_v31, %v2127_v33  ;;  %v2131_v38 = vsub.f32 %v2125_v20, %v2127_v33  ;;  %2143 = vst [vmem:[#allocation2] sm:$0x1] %v2127_v33  ;;  %v2349_v20 = vld [vmem:[%s4882_s3 + $0x70] sm:$0xff]  ;;  %v2350_v31 = vld [vmem:[%s4882_s3 + $0x78] sm:$0xff] }
 0xa88   : > { %v3771_v33 = vpack.c.bf16 %v2350_v31, %v2349_v20 }
 0xa89   : > { %v2129_v51 = vmul.f32 1.442695, %v2128_v37  ;;  %v2132_v28 = vmul.f32 1.442695, %v2131_v38 }
 0xa8b   : > { %3913 = vpow2.f32 %v2129_v51 }
 0xa8c   : > { %3915 = vpow2.f32 %v2132_v28 }
 0xa8e   : > { %v2313_v37 = vld [vmem:[#allocation2] sm:$0x1] }
 0xa95   : > { %v3914_v42 = vpop.eup %3913 }
 0xa96   : > { %v3916_v46 = vpop.eup %3915  ;;  %v2135_v47 = vmul.f32 %v3914_v42, %v2134_v34  ;;  %v2139_v8 = vmul.f32 %v3914_v42, %v2138_v43 }
 0xa97   : > { %v2140_v49 = vmul.f32 %v3916_v46, %v2121_v27 }
 0xa98   : > { %v2136_v55 = vadd.f32 %v3916_v46, %v2135_v47 }
 0xa99   : > { %v2141_v39 = vadd.f32 %v2140_v49, %v2139_v8 }
 0xa9a   : > { %2137 = vst [vmem:[#allocation3] sm:$0x1] %v2136_v55 }
 0xa9b   : > { %2142 = vst [vmem:[#allocation4] sm:$0x1] %v2141_v39 }
 0xaa1   : > { %v2321_v47 = vld [vmem:[#allocation3] sm:$0x1] }
 0xaa2   : > { %v2325_v8 = vld [vmem:[#allocation4] sm:$0x1] }
 0xac7   : > { %v2212_v57 = vpop.f32.mrb[20].mxu0  ;;  %v2283_v58 = vpop.f32.mrb[20].mxu1 }
 0xac8   : > { %v2287_v9 = vadd.f32 %v2505_v56, %v2212_v57  ;;  %v2214_v10 = vpop.f32.mrb[21].mxu0  ;;  %v3097_v15 = vpop.f32.mrb[21].mxu1 }
 0xac9   : > { %v2295_v23 = vadd.f32 %v2293_v60, %v2214_v10  ;;  %v2351_v15 = vld [vmem:[%s4883_s4] sm:$0x1] }
 0xaca   : > { %v2288_v16 = vmul.f32 0.5, %v2287_v9 }
 0xacb   : > { %v2296_v24 = vmul.f32 0.5, %v2295_v23 }
 0xacc   : > { %3917 = vtanh.f32 %v2288_v16 }
 0xacd   : > { %3919 = vtanh.f32 %v2296_v24 }
 0xad6   : > { %v3918_v26 = vpop.eup %3917 }
 0xad7   : > { %v2290_v32 = vadd.f32 1.0, %v3918_v26  ;;  %v3920_v44 = vpop.eup %3919 }
 0xad8   : > { %v2298_v50 = vadd.f32 1.0, %v3920_v44 }
 0xad9   : > { %v2291_v35 = vmul.f32 0.5, %v2290_v32 }
 0xada   : > { %v2299_v53 = vmul.f32 0.5, %v2298_v50 }
 0xadb   : > { %v2300_v41 = vmul.f32 %v2291_v35, %v2283_v58 }
 0xadc   : > { %v2305_v54 = vsub.f32 1.0, %v2299_v53  ;;  %v2307_v63 = vmul.f32 %v2299_v53, %v2121_v27  ;;  %v2347_v27 = vld [vmem:[%s4882_s3 + $0x60] sm:$0xff] }
 0xadd   : > { %v2303_v45 = vadd.f32 %v2301_v36, %v2300_v41  ;;  %v3768_v30 = vpack.c.bf16 %v2348_v29, %v2347_v27 }
 0xadf   : > { %3921 = vtanh.f32 %v2303_v45 }
 0xae9   : > { %v3922_v59 = vpop.eup %3921 }
 0xaea   : > { %v2306_v62 = vmul.f32 %v3922_v59, %v2305_v54 }
 0xaec   : > { %v2308_v2 = vadd.f32 %v2307_v63, %v2306_v62 }
 0xaee   : > { %v2309_v6 = vmul.f32 %v4635_v40, %v2308_v2  ;;  %v2338_v40 = vld [vmem:[%s4882_s3 + $0x18] sm:$0xff] }
 0xaef   : > { %v3753_v52 = vpack.c.bf16 %v2338_v40, %v2337_v1 }
 0xaf0   : > { %v2310_v11 = vsel %vm439_vm1, %v2309_v6, 0.0 }
 0xaf1   : > { %2311 = vadd.xlane.f32.xlu0 %v2310_v11  ;;  %3754 = vmatpush3.bf16.msra.mxu0 %v3753_v52 }
 0xaf2   : > { %3755 = vmatprep.subr.bf16.mxu0 %v3994_v7 }
 0xaf5   : > { %3757 = vmatpush3.bf16.msra.mxu0 %v3756_v13 }
 0xaf6   : > { %3758 = vmatprep.subr.bf16.mxu0 %v3994_v7 }
 0xaf9   : > { %3760 = vmatpush3.bf16.msra.mxu0 %v3759_v3 }
 0xafa   : > { %3761 = vmatprep.subr.bf16.mxu0 %v3994_v7 }
 0xafd   : > { %3763 = vmatpush3.bf16.msra.mxu0 %v3762_v21 }
 0xafe   : > { %3764 = vmatprep.subr.bf16.mxu0 %v3994_v7 }
 0xb01   : > { %3766 = vmatpush3.bf16.msra.mxu0 %v3765_v25 }
 0xb02   : > { %3767 = vmatprep.subr.bf16.mxu0 %v3994_v7 }
 0xb05   : > { %3769 = vmatpush3.bf16.msra.mxu0 %v3768_v30 }
 0xb06   : > { %3770 = vmatprep.subr.bf16.mxu0 %v3994_v7 }
 0xb09   : > { %3772 = vmatpush3.bf16.msra.mxu0 %v3771_v33 }
 0xb7e   : > { %v2312_v38 = vpop.xlane.xlu0 %2311 }
 0xb7f   : > { %v2314_v51 = vmax.f32 %v2313_v37, %v2312_v38 }
 0xb81   : > { %v2315_v28 = vsub.f32 %v2313_v37, %v2314_v51  ;;  %v2318_v42 = vsub.f32 %v2312_v38, %v2314_v51  ;;  %2330 = vst [vmem:[#allocation2] sm:$0x1] %v2314_v51 }
 0xb83   : > { %v2316_v34 = vmul.f32 1.442695, %v2315_v28  ;;  %v2319_v43 = vmul.f32 1.442695, %v2318_v42 }
 0xb85   : > { %3923 = vpow2.f32 %v2316_v34 }
 0xb86   : > { %3925 = vpow2.f32 %v2319_v43 }
 0xb8f   : > { %v3924_v46 = vpop.eup %3923 }
 0xb90   : > { %v3926_v49 = vpop.eup %3925  ;;  %v2322_v55 = vmul.f32 %v3924_v46, %v2321_v47  ;;  %v2326_v39 = vmul.f32 %v3924_v46, %v2325_v8 }
 0xb91   : > { %v2327_v7 = vmul.f32 %v3926_v49, %v2308_v2 }
 0xb92   : > { %v2323_v56 = vadd.f32 %v3926_v49, %v2322_v55 }
 0xb93   : > { %v2328_v57 = vadd.f32 %v2327_v7, %v2326_v39 }
 0xb94   : > { %2324 = vst [vmem:[#allocation3] sm:$0x1] %v2323_v56 }
 0xb95   : > { %2329 = vst [vmem:[#allocation4] sm:$0x1] %v2328_v57 }
 0xb9b   : > { %v2332_v58 = vld [vmem:[#allocation3] sm:$0x1] }
 0xb9c   : > { %3927 = vrcp.f32 %v2332_v58  ;;  %v2331_v9 = vld [vmem:[#allocation4] sm:$0x1] }
 0xba6   : > { %v3928_v60 = vpop.eup %3927 }
 0xba7   : > { %v2334_v10 = vmul.f32 %v3928_v60, %v2331_v9 }
 0xba9   : > { %3131 = vmatmul.mubr.f32.vlgmr.msra.gmra.mrb[22].mxu0 %v2334_v10 }
 0xc7c   : > { %v2418_v16 = vpop.f32.mrb[22].mxu0 }
 0xc7d   : > { %v2419_v23 = vadd.f32 %v2418_v16, %v2351_v15  ;;  %v3132_v24 = vpop.f32.mrb[23].mxu0 }
 0xc7f   : > { %2422 = vst [vmem:[%s216_s23] sm:$0x1] %v2419_v23 }
 0xc80   : > { %3943 = shalt.err (!%p3940_p3)
}
 0xc81   : > { %s3944_s11 = scalar_lea.hbm %s4837_s6, 16  ;;  %s3948_s14 = scalar_lea.hbm %s4884_s5, 32 }
 0xc82   : > { %p3945_p4 = scmp.ne.s32.totalorder %s4837_s6, %s3944_s11  ;;  %p3949_p9 = scmp.lt.u32.totalorder %s4837_s6, %s4884_s5 }
 0xc83   : > { %p3950_p10 = scmp.lt.u32.totalorder %s3948_s14, %s3944_s11  ;;  %p3952_p12 = scmp.lt.u32.totalorder %s3944_s11, %s4837_s6 }
 0xc84   : > { %p3946_p7 = pnand %p3945_p4, %p4067_p5 }
 0xc85   : > { %p3951_p11 = por %p3950_p10, %p3949_p9 }
 0xc86   : > { %p3947_p8 = pneg %p3946_p7 }
 0xc87   : > { %p3953_p13 = por %p3952_p12, %p3951_p11 }
 0xc89   : > { %p3954_p0 = pnand %p3953_p13, %p3947_p8 }
 0xc8b   : > { %3957 = shalt.err (!%p3954_p0)
}
 0xc8c   : > { %3774 = dma.vmem_to_hbm [thread:$0]  (%p4067_p5), %s4839_s25, 16, %s4837_s6, %s2424_s7  }
 0xc8d PF: > { %p3780_p1 = scmp.ge.s32.totalorder %s3992_s21, 2  ;;  %s2448_s17 = sand.u32 1, %s3980_s18  }
 0xc8e   : > { %s2449_s23 = scalar_lea.sflag [#allocation6], %s2448_s17 }
 0xc8f   : > { %p3777_p2 = pnand %p3780_p1, %p4071_p6 }
 0xc91   : > { %3975 = dma.done.wait (!%p3777_p2), %s2449_s23, 16  }
 0xc92   : > { %3977 = vsyncadd (!%p3777_p2), %s2449_s23, 4294967280  ;;  %p15_p3 = scmp.ge.s32.totalorder %s4054_s24, 4   ;;  %s4887_s18 = smov %s3984_s19 }
 0xc93   : > { %s4888_s19 = smov %s3988_s20  ;;  %s4889_s20 = smov %s4065_s27 }
 0xc94   : > { %s4890_s21 = smov %s4054_s24  ;;  %17 = sbr.rel (!%p15_p3) target bundleno = 3 (0x3), region = 85 }
 0xc9b   :  { %2453 = vsyncpa [#allocation6], 1 }
 0xc9c   :  { %2455 = vsyncpa [#allocation6 + $0x1], 1 }

</bundles_post_ra>
